<compile_context>
chip_gen: v7x
topology: tpu7x:2x2x1
jax: 0.10.0
libtpu: 0.0.40
codegen_flags: <defaults>
</compile_context>

<pallas_src>
import functools

import jax
import jax.numpy as jnp
from jax.experimental import pallas as pl
from jax.experimental.pallas import tpu as pltpu

BN_EPS = 1e-5
MXU_DTYPE = jnp.bfloat16      # native MXU dtype on v5e/v6e/v7x


def _round_up(x, m):
    return ((x + m - 1) // m) * m


_NUM_TC_CACHE = None


def _num_tensorcores():
    """Best-effort TensorCores-per-chip (1 on v5e/v6e, 2 on v7x).

    Defaults to 1 (the single-TC behaviour, which is also what v5e/v6e want)
    when the query is unavailable."""
    global _NUM_TC_CACHE
    if _NUM_TC_CACHE is not None:
        return _NUM_TC_CACHE
    n = 1
    try:
        info = pltpu.get_tpu_info()
        for attr in ("num_cores", "num_tensorcores", "tensorcores_per_chip",
                     "cores_per_chip", "core_count"):
            v = getattr(info, attr, None)
            if v is None:
                continue
            try:
                v = int(v)
            except Exception:
                continue
            if 1 <= v <= 4:
                n = v
                break
    except Exception:
        n = 1
    _NUM_TC_CACHE = n
    return n


def _choose_tm(m, max_tm=1024):
    """Row-tile size.

    Single-TC chips (v5e/v6e): one big tile (no forced split, amortizes the
    per-grid-step overhead and weight reuse).  Multi-TC chips (v7x): split just
    enough to expose >= num_cores parallel blocks for megacore sharding."""
    if m <= 16:
        return m
    tm = min(max_tm, max(16, (m // 16) * 16))
    nc = _num_tensorcores()
    if nc > 1 and pl.cdiv(m, tm) < nc:
        tm = max(16, min(tm, _round_up(pl.cdiv(m, nc), 16)))
    return tm


def _col_block_index_map(k_block):
    def index_map(i):
        return (i, k_block)
    return index_map


# ---------------------------------------------------------------------------
# Kernel 1: SiLU( sum_i A_i @ W_i + bias )   (1x1 convs, BN folded into W)
# ---------------------------------------------------------------------------
def _fused_matmul_bias_silu_kernel(*refs):
    bias_ref, o_ref = refs[-2], refs[-1]
    n_ops = (len(refs) - 2) // 2
    acc = None
    for i in range(n_ops):
        d = jnp.dot(refs[2 * i][...], refs[2 * i + 1][...],
                    preferred_element_type=jnp.float32)
        acc = d if acc is None else acc + d
    y = acc + bias_ref[...]
    o_ref[...] = (y * jax.nn.sigmoid(y)).astype(o_ref.dtype)


def fused_matmul_bias_silu(operands, bias, *, tm=None, out_dtype=jnp.float32):
    """operands: list of (a, w, k_block) with a:(M, Ka), w:(K, N), K <= Ka.

    Each operand contributes a[:, k_block*K:(k_block+1)*K] @ w; the column
    window is selected by the BlockSpec (no XLA slice / HBM copy).
    Returns SiLU(sum + bias), shape (M, N)."""
    M = operands[0][0].shape[0]
    N = operands[0][1].shape[1]
    if tm is None:
        tm = _choose_tm(M)

    in_specs, args = [], []
    flops = 0
    bytes_acc = M * N * jnp.dtype(out_dtype).itemsize + int(bias.size) * 4
    for a, wm, k_block in operands:
        K = wm.shape[0]
        assert a.shape[0] == M and wm.shape[1] == N
        assert K == a.shape[1] or (K % 128 == 0 and (k_block + 1) * K <= a.shape[1])
        in_specs.append(pl.BlockSpec((tm, K), _col_block_index_map(k_block)))
        in_specs.append(pl.BlockSpec((K, N), lambda i: (0, 0)))
        args += [a, wm]
        flops += 2 * M * K * N
        bytes_acc += M * K * a.dtype.itemsize + K * N * wm.dtype.itemsize
    in_specs.append(pl.BlockSpec((1, N), lambda i: (0, 0)))
    args.append(bias.reshape(1, N).astype(jnp.float32))

    return pl.pallas_call(
        _fused_matmul_bias_silu_kernel,
        out_shape=jax.ShapeDtypeStruct((M, N), out_dtype),
        grid=(pl.cdiv(M, tm),),
        in_specs=in_specs,
        out_specs=pl.BlockSpec((tm, N), lambda i: (i, 0)),
        compiler_params=pltpu.CompilerParams(
            dimension_semantics=("parallel",)),
        cost_estimate=pl.CostEstimate(flops=int(flops),
                                      transcendentals=int(M * N),
                                      bytes_accessed=int(bytes_acc)),
    )(*args)


# ---------------------------------------------------------------------------
# Kernel 2: 3x3 conv + BN + SiLU ('same', stride 1).
#   The input block is a group of images, each stored as H-padded, row-
#   flattened rows (1 zero lead row + trailing zeros for alignment).  All nine
#   taps are formed in-kernel from row-offset slices of that single block, so
#   the activation is DMA'd once (no 3x W-tap lane expansion through HBM).
#   The dw = -1 / +1 taps wrap across W image boundaries; those rows are
#   zeroed with a per-output-column mask.  H boundaries use the zero pad rows.
# ---------------------------------------------------------------------------
def _conv3x3_kernel(x_ref, w_ref, bias_ref, o_ref, *, g, h, w, rows_blk):
    hw = h * w
    cout = o_ref.shape[-1]
    # One load per block; slice it at f32 (cheap VPU upcast, robust sublane
    # shifts), cast each patch back to the MXU dtype right before the dot.
    xv = x_ref[...].astype(jnp.float32)
    accs = []
    for dw in range(3):                        # kw tap: reads column j + dw - 1
        acc = None
        for dh in range(3):                    # kh tap: reads row    i + dh - 1
            off = dh * w + dw
            wk = w_ref[dh, dw]                 # (cin, cout)
            parts = [
                xv[i * rows_blk + off:i * rows_blk + off + hw, :]
                for i in range(g)
            ]
            patch = parts[0] if g == 1 else jnp.concatenate(parts, axis=0)
            d = jnp.dot(patch.astype(wk.dtype), wk,
                        preferred_element_type=jnp.float32)
            acc = d if acc is None else acc + d
        accs.append(acc)
    # Mask the W-boundary wrap: left tap (dw=0) invalid at j == 0, right tap
    # (dw=2) invalid at j == w-1.
    col = jax.lax.broadcasted_iota(jnp.int32, (g * hw, cout), 0) % w
    mask_l = (col > 0).astype(jnp.float32)
    mask_r = (col < (w - 1)).astype(jnp.float32)
    y = accs[1] + accs[0] * mask_l + accs[2] * mask_r + bias_ref[...]
    o_ref[...] = (y * jax.nn.sigmoid(y)).astype(o_ref.dtype)


def conv3x3_bn_silu(act, n, h, w, wgt, bias, *, out_dtype=MXU_DTYPE,
                    imgs_per_step=None):
    """act: (n*h*w, cin) bf16 (already column-windowed), cin % 128 == 0.
    wgt: (3, 3, cin, cout) BN-folded, cout % 128 == 0.  -> (n*h*w, cout)."""
    hw = h * w
    cin = act.shape[-1]
    kh, kw, wcin, cout = wgt.shape
    assert (kh, kw) == (3, 3) and wcin == cin
    assert cin % 128 == 0 and cout % 128 == 0
    hp = h + 2
    rows = hp * w
    rows_blk = _round_up(rows + 2, 16)

    # Images per grid step: large enough M per dot for the MXU, must divide n.
    if imgs_per_step is None:
        g = max(1, min(n, -(-256 // hw)))
        while n % g:
            g -= 1
    else:
        g = imgs_per_step
    assert n % g == 0
    assert (g * hw) % 16 == 0 or n // g == 1, (g, hw)

    # XLA prep: H zero-pad + 1 lead row + trailing zeros (one fused copy).
    x4 = act.reshape(n, h, w, cin)
    x4 = jnp.pad(x4, ((0, 0), (1, 1), (0, 0), (0, 0)))
    xf = x4.reshape(n, rows, cin)
    xf = jnp.pad(xf, ((0, 0), (1, rows_blk - rows - 1), (0, 0)))
    xf = xf.reshape(n * rows_blk, cin)

    kern = functools.partial(_conv3x3_kernel, g=g, h=h, w=w, rows_blk=rows_blk)
    flops = 2 * n * hw * cin * cout * 9
    bytes_acc = (xf.size * xf.dtype.itemsize + wgt.size * wgt.dtype.itemsize
                 + n * hw * cout * jnp.dtype(out_dtype).itemsize)
    return pl.pallas_call(
        kern,
        out_shape=jax.ShapeDtypeStruct((n * hw, cout), out_dtype),
        grid=(n // g,),
        in_specs=[
            pl.BlockSpec((g * rows_blk, cin), lambda i: (i, 0)),
            pl.BlockSpec((3, 3, cin, cout), lambda i: (0, 0, 0, 0)),
            pl.BlockSpec((1, cout), lambda i: (0, 0)),
        ],
        out_specs=pl.BlockSpec((g * hw, cout), lambda i: (i, 0)),
        compiler_params=pltpu.CompilerParams(
            dimension_semantics=("parallel",)),
        cost_estimate=pl.CostEstimate(flops=int(flops),
                                      transcendentals=int(n * hw * cout),
                                      bytes_accessed=int(bytes_acc)),
    )(xf, wgt, bias.reshape(1, cout).astype(jnp.float32))


# ---------------------------------------------------------------------------
# Parameter folding / re-layout (compile-time constants under jit)
# ---------------------------------------------------------------------------
def _fold_bn(p):
    scale = p["gamma"] / jnp.sqrt(p["var"] + BN_EPS)
    bias = p["beta"] - p["mean"] * scale
    return scale, bias


def _prep_1x1(p, cout_pad=None):
    scale, bias = _fold_bn(p)
    wm = (p["w"][:, :, 0, 0] * scale[:, None]).T            # (Cin, Cout)
    if cout_pad is not None and cout_pad > wm.shape[1]:
        wm = jnp.pad(wm, ((0, 0), (0, cout_pad - wm.shape[1])))
        bias = jnp.pad(bias, (0, cout_pad - bias.shape[0]))
    return wm.astype(MXU_DTYPE), bias                       # bias stays f32


def _prep_3x3(p, cin_pad=None, cout_pad=None):
    scale, bias = _fold_bn(p)
    wf = p["w"] * scale[:, None, None, None]                # (Cout, Cin, 3, 3)
    wf = jnp.transpose(wf, (2, 3, 1, 0))                    # (kh, kw, Cin, Cout)
    kh, kw, cin, cout = wf.shape
    if cin_pad is not None and cin_pad > cin:
        wf = jnp.pad(wf, ((0, 0), (0, 0), (0, cin_pad - cin), (0, 0)))
    if cout_pad is not None and cout_pad > cout:
        wf = jnp.pad(wf, ((0, 0), (0, 0), (0, 0), (0, cout_pad - cout)))
        bias = jnp.pad(bias, (0, cout_pad - cout))
    return wf.astype(MXU_DTYPE), bias                       # bias stays f32


# ---------------------------------------------------------------------------
# Inception_1 forward
# ---------------------------------------------------------------------------
def inception_1_forward(x_nchw, params):
    n, c, h, w = x_nchw.shape
    m = n * h * w
    x2 = jnp.transpose(x_nchw, (0, 2, 3, 1)).reshape(m, c).astype(MXU_DTYPE)

    c0 = params["branch_0"]["w"].shape[0]      # 96
    c10 = params["branch_1_0"]["w"].shape[0]   # 64
    c20 = params["branch_2_0"]["w"].shape[0]   # 64
    c11 = params["branch_1_1"]["w"].shape[0]   # 96
    c21 = params["branch_2_1"]["w"].shape[0]   # 96
    c22 = params["branch_2_2"]["w"].shape[0]   # 96
    cf = params["conv_0"]["w"].shape[0]        # 96
    c0p = _round_up(c0, 128)                   # 128
    h1 = _round_up(c11, 128)                   # 128
    h2 = _round_up(c21, 128)                   # 128
    c22p = _round_up(c22, 128)                 # 128
    cfp = _round_up(cf, 128)                   # 128

    # --- fused 1x1 stems: one lane-dense 256-wide matmul.
    w_b0, b_b0 = _prep_1x1(params["branch_0"], cout_pad=c0p)
    w_b10, b_b10 = _prep_1x1(params["branch_1_0"])
    w_b20, b_b20 = _prep_1x1(params["branch_2_0"])
    w_stem = jnp.concatenate([w_b0, w_b10, w_b20], axis=1)       # (c, 256)
    b_stem = jnp.concatenate([b_b0, b_b10, b_b20])               # (256,)
    y_stem = fused_matmul_bias_silu([(x2, w_stem, 0)], b_stem,
                                    out_dtype=MXU_DTYPE)         # (m, 256)

    # --- fused branch_1_1 + branch_2_1: one 3x3 conv with a block-diagonal
    #     (128 -> 256) weight over stem columns [c0p, c0p+128).
    w11, b11 = _prep_3x3(params["branch_1_1"])                   # (3,3,64,96)
    w21, b21 = _prep_3x3(params["branch_2_1"])                   # (3,3,64,96)
    cin_f = c10 + c20                                            # 128
    w_f = jnp.zeros((3, 3, cin_f, h1 + h2), MXU_DTYPE)
    w_f = w_f.at[:, :, :c10, :c11].set(w11)
    w_f = w_f.at[:, :, c10:, h1:h1 + c21].set(w21)
    b_f = jnp.zeros((h1 + h2,), jnp.float32)
    b_f = b_f.at[:c11].set(b11)
    b_f = b_f.at[h1:h1 + c21].set(b21)
    stem_b1b2 = y_stem[:, c0p:c0p + cin_f]                       # fused w/ pad
    y_br = conv3x3_bn_silu(stem_b1b2, n, h, w, w_f, b_f,
                           out_dtype=MXU_DTYPE)                  # (m, 256)

    # --- branch_2_2: 3x3 on the t2 half of the fused output (aligned window).
    w22, b22 = _prep_3x3(params["branch_2_2"], cin_pad=h2, cout_pad=c22p)
    b2 = conv3x3_bn_silu(y_br[:, h1:h1 + h2], n, h, w, w22, b22,
                         out_dtype=MXU_DTYPE)                    # (m, 128)

    # --- conv_0 without the 480-channel concat: accumulate four K-chunks.
    #     Output padded to 128 lanes (lane-dense store), sliced once below.
    scale_c, bias_c = _fold_bn(params["conv_0"])
    wc = (params["conv_0"]["w"][:, :, 0, 0] * scale_c[:, None]).T   # (480, 96)
    wc = jnp.pad(wc, ((0, 0), (0, cfp - cf)))                       # (480, 128)
    bias_cp = jnp.pad(bias_c, (0, cfp - cf))
    wc_x = wc[:c]
    wc_b0 = jnp.pad(wc[c:c + c0], ((0, c0p - c0), (0, 0)))
    wc_b1 = jnp.pad(wc[c + c0:c + c0 + c11], ((0, h1 - c11), (0, 0)))
    wc_b2 = jnp.pad(wc[c + c0 + c11:c + c0 + c11 + c22],
                    ((0, c22p - c22), (0, 0)))
    out = fused_matmul_bias_silu(
        [(x2, wc_x.astype(MXU_DTYPE), 0),       # raw-input chunk
         (y_stem, wc_b0.astype(MXU_DTYPE), 0),  # branch_0: aligned 128-col win
         (y_br, wc_b1.astype(MXU_DTYPE), 0),    # branch_1: aligned 128-col win
         (b2, wc_b2.astype(MXU_DTYPE), 0)],     # branch_2
        bias_cp, out_dtype=jnp.float32)                              # (m, 128)

    out = out[:, :cf].reshape(n, h, w, cf)
    return jnp.transpose(out, (0, 3, 1, 2))


# ---------------------------------------------------------------------------
# Deterministic parameter initialisation (PyTorch-layout weights + BN stats)
# ---------------------------------------------------------------------------
def init_conv_bn(key, cin, cout, k):
    kw_, kg, kb, km, kv = jax.random.split(key, 5)
    return {
        "w": 0.05 * jax.random.normal(kw_, (cout, cin, k, k), jnp.float32),
        "gamma": 1.0 + 0.1 * jax.random.normal(kg, (cout,), jnp.float32),
        "beta": 0.1 * jax.random.normal(kb, (cout,), jnp.float32),
        "mean": 0.1 * jax.random.normal(km, (cout,), jnp.float32),
        "var": 1.0 + 0.1 * jax.random.uniform(kv, (cout,), jnp.float32),
    }


def init_inception_1(key, in_channels=192):
    keys = jax.random.split(key, 7)
    return {
        "branch_0":   init_conv_bn(keys[0], in_channels, 96, 1),
        "branch_1_0": init_conv_bn(keys[1], in_channels, 64, 1),
        "branch_1_1": init_conv_bn(keys[2], 64, 96, 3),
        "branch_2_0": init_conv_bn(keys[3], in_channels, 64, 1),
        "branch_2_1": init_conv_bn(keys[4], 64, 96, 3),
        "branch_2_2": init_conv_bn(keys[5], 96, 96, 3),
        "conv_0":     init_conv_bn(keys[6], in_channels + 3 * 96, 96, 1),
    }


# ---------------------------------------------------------------------------
# Pure-JAX reference (for correctness check; f32 end-to-end)
# ---------------------------------------------------------------------------
def _ref_conv_bn_silu(x_nhwc, p):
    w_hwio = jnp.transpose(p["w"], (2, 3, 1, 0))
    y = jax.lax.conv_general_dilated(
        x_nhwc, w_hwio, window_strides=(1, 1), padding="SAME",
        dimension_numbers=("NHWC", "HWIO", "NHWC"))
    scale = p["gamma"] / jnp.sqrt(p["var"] + BN_EPS)
    bias = p["beta"] - p["mean"] * scale
    y = y * scale + bias
    return y * jax.nn.sigmoid(y)


def _ref_forward(x_nchw, params):
    x = jnp.transpose(x_nchw, (0, 2, 3, 1)).astype(jnp.float32)
    b0 = _ref_conv_bn_silu(x, params["branch_0"])
    b1 = _ref_conv_bn_silu(x, params["branch_1_0"])
    b1 = _ref_conv_bn_silu(b1, params["branch_1_1"])
    b2 = _ref_conv_bn_silu(x, params["branch_2_0"])
    b2 = _ref_conv_bn_silu(b2, params["branch_2_1"])
    b2 = _ref_conv_bn_silu(b2, params["branch_2_2"])
    mix = jnp.concatenate([x, b0, b1, b2], axis=-1)
    out = _ref_conv_bn_silu(mix, params["conv_0"])
    return jnp.transpose(out, (0, 3, 1, 2))


# ---------------------------------------------------------------------------
if __name__ == "__main__":
    key = jax.random.PRNGKey(0)
    k_x, k_p = jax.random.split(key)

    in_channels = 192          # fixed by the module (conv_0 expects 480)
    batch, spatial = 2, 8
    x = jax.random.normal(k_x, (batch, in_channels, spatial, spatial),
                          jnp.float32)
    params = init_inception_1(k_p, in_channels)

    fwd = jax.jit(functools.partial(inception_1_forward, params=params))
    out = jax.block_until_ready(fwd(x))

    ref = jax.block_until_ready(_ref_forward(x, params))
    assert out.shape == (batch, 96, spatial, spatial), out.shape
    err_max = float(jnp.max(jnp.abs(out - ref)))
    err_mean = float(jnp.mean(jnp.abs(out - ref)))
    # bf16 MXU path: tolerances sized for bf16 inputs/weights with f32 accum.
    assert err_max < 0.15 and err_mean < 0.03, (err_max, err_mean)

    print("KERNEL_OK")
</pallas_src>

<mosaic_0001>
module attributes {stable_mosaic.version = 11 : i64} {
  func.func @_fused_matmul_bias_silu_kernel(%arg0: i32, %arg1: memref<128x192xbf16, #tpu.memory_space<vmem>>, %arg2: memref<192x256xbf16, #tpu.memory_space<vmem>>, %arg3: memref<1x256xf32, #tpu.memory_space<vmem>>, %arg4: memref<128x256xbf16, #tpu.memory_space<vmem>>) attributes {dimension_semantics = [#tpu.dimension_semantics<parallel>], iteration_bounds = array<i64: 1>, scalar_prefetch = 0 : i64, scratch_operands = 0 : i64, tpu.core_type = #tpu.core_type<tc>, window_params = [{transform_indices = @transform_0, window_bounds = array<i64: 128, 192>}, {pipeline_mode = #tpu.pipeline_mode<synchronous>, transform_indices = @transform_1, window_bounds = array<i64: 192, 256>}, {pipeline_mode = #tpu.pipeline_mode<synchronous>, transform_indices = @transform_2, window_bounds = array<i64: 1, 256>}, {transform_indices = @transform_3, window_bounds = array<i64: 128, 256>}]} {
    %c0 = arith.constant 0 : index
    %c0_0 = arith.constant 0 : index
    %0 = vector.load %arg1[%c0, %c0_0] : memref<128x192xbf16, #tpu.memory_space<vmem>>, vector<128x192xbf16>
    %c0_1 = arith.constant 0 : index
    %c0_2 = arith.constant 0 : index
    %1 = vector.load %arg2[%c0_1, %c0_2] : memref<192x256xbf16, #tpu.memory_space<vmem>>, vector<192x256xbf16>
    %cst = arith.constant dense<0.000000e+00> : vector<128x256xf32>
    %2 = tpu.matmul %0, %1, %cst {dimension_numbers = #tpu.dot_dimension_numbers<[1], [0], [0], [1], [0, 0, 1, 1], [], []>} : vector<128x192xbf16>, vector<192x256xbf16>, vector<128x256xf32> -> vector<128x256xf32>
    %c0_3 = arith.constant 0 : index
    %c0_4 = arith.constant 0 : index
    %3 = vector.load %arg3[%c0_3, %c0_4] : memref<1x256xf32, #tpu.memory_space<vmem>>, vector<1x256xf32>
    %4 = vector.broadcast %3 : vector<1x256xf32> to vector<128x256xf32>
    %5 = arith.addf %2, %4 : vector<128x256xf32>
    %6 = arith.negf %5 : vector<128x256xf32>
    %7 = math.exp %6 : vector<128x256xf32>
    %cst_5 = arith.constant 1.000000e+00 : f32
    %8 = vector.broadcast %cst_5 : f32 to vector<128x256xf32>
    %9 = arith.addf %8, %7 : vector<128x256xf32>
    %10 = arith.divf %8, %9 : vector<128x256xf32>
    %11 = arith.mulf %5, %10 : vector<128x256xf32>
    %12 = arith.truncf %11 : vector<128x256xf32> to vector<128x256xbf16>
    %c0_6 = arith.constant 0 : index
    %c0_7 = arith.constant 0 : index
    %13 = vector.load %arg4[%c0_6, %c0_7] : memref<128x256xbf16, #tpu.memory_space<vmem>>, vector<128x256xbf16>
    tpu.vector_store %arg4[%c0_6, %c0_7], %12 {strides = array<i32>} : memref<128x256xbf16, #tpu.memory_space<vmem>>, vector<128x256xbf16>,
    return
  }
  func.func @transform_0(%arg0: i32) -> (i32, i32) {
    %c0_i32 = arith.constant 0 : i32
    %c0_i32_0 = arith.constant 0 : i32
    return %arg0, %c0_i32 : i32, i32
  }
  func.func @transform_1(%arg0: i32) -> (i32, i32) {
    %c0_i32 = arith.constant 0 : i32
    %c0_i32_0 = arith.constant 0 : i32
    %c0_i32_1 = arith.constant 0 : i32
    return %c0_i32, %c0_i32_0 : i32, i32
  }
  func.func @transform_2(%arg0: i32) -> (i32, i32) {
    %c0_i32 = arith.constant 0 : i32
    %c0_i32_0 = arith.constant 0 : i32
    %c0_i32_1 = arith.constant 0 : i32
    return %c0_i32, %c0_i32_0 : i32, i32
  }
  func.func @transform_3(%arg0: i32) -> (i32, i32) {
    %c0_i32 = arith.constant 0 : i32
    %c0_i32_0 = arith.constant 0 : i32
    return %arg0, %c0_i32 : i32, i32
  }
}

module attributes {stable_mosaic.version = 11 : i64} {
  func.func @_conv3x3_kernel(%arg0: i32, %arg1: memref<192x128xbf16, #tpu.memory_space<vmem>>, %arg2: memref<3x3x128x256xbf16, #tpu.memory_space<vmem>>, %arg3: memref<1x256xf32, #tpu.memory_space<vmem>>, %arg4: memref<128x256xbf16, #tpu.memory_space<vmem>>) attributes {dimension_semantics = [#tpu.dimension_semantics<parallel>], iteration_bounds = array<i64: 1>, scalar_prefetch = 0 : i64, scratch_operands = 0 : i64, tpu.core_type = #tpu.core_type<tc>, window_params = [{transform_indices = @transform_0, window_bounds = array<i64: 192, 128>}, {pipeline_mode = #tpu.pipeline_mode<synchronous>, transform_indices = @transform_1, window_bounds = array<i64: 3, 3, 128, 256>}, {pipeline_mode = #tpu.pipeline_mode<synchronous>, transform_indices = @transform_2, window_bounds = array<i64: 1, 256>}, {transform_indices = @transform_3, window_bounds = array<i64: 128, 256>}]} {
    %c0 = arith.constant 0 : index
    %c0_0 = arith.constant 0 : index
    %0 = vector.load %arg1[%c0, %c0_0] : memref<192x128xbf16, #tpu.memory_space<vmem>>, vector<192x128xbf16>
    %1 = arith.extf %0 : vector<192x128xbf16> to vector<192x128xf32>
    %c0_1 = arith.constant 0 : index
    %c0_2 = arith.constant 0 : index
    %c0_3 = arith.constant 0 : index
    %c0_4 = arith.constant 0 : index
    %2 = vector.load %arg2[%c0_1, %c0_2, %c0_3, %c0_4] : memref<3x3x128x256xbf16, #tpu.memory_space<vmem>>, vector<1x1x128x256xbf16>
    %3 = vector.shape_cast %2 : vector<1x1x128x256xbf16> to vector<128x256xbf16>
    %4 = vector.extract_strided_slice %1 {offsets = [0, 0], sizes = [64, 128], strides = [1, 1]} : vector<192x128xf32> to vector<64x128xf32>
    %5 = vector.extract_strided_slice %1 {offsets = [96, 0], sizes = [64, 128], strides = [1, 1]} : vector<192x128xf32> to vector<64x128xf32>
    %6 = tpu.concatenate %4, %5 in 0 : vector<64x128xf32>, vector<64x128xf32> -> vector<128x128xf32>
    %7 = arith.truncf %6 : vector<128x128xf32> to vector<128x128xbf16>
    %cst = arith.constant dense<0.000000e+00> : vector<128x256xf32>
    %8 = tpu.matmul %7, %3, %cst {dimension_numbers = #tpu.dot_dimension_numbers<[1], [0], [0], [1], [0, 0, 1, 1], [], []>} : vector<128x128xbf16>, vector<128x256xbf16>, vector<128x256xf32> -> vector<128x256xf32>
    %c1 = arith.constant 1 : index
    %c0_5 = arith.constant 0 : index
    %c0_6 = arith.constant 0 : index
    %c0_7 = arith.constant 0 : index
    %9 = vector.load %arg2[%c1, %c0_5, %c0_6, %c0_7] : memref<3x3x128x256xbf16, #tpu.memory_space<vmem>>, vector<1x1x128x256xbf16>
    %10 = vector.shape_cast %9 : vector<1x1x128x256xbf16> to vector<128x256xbf16>
    %11 = vector.extract_strided_slice %1 {offsets = [8, 0], sizes = [64, 128], strides = [1, 1]} : vector<192x128xf32> to vector<64x128xf32>
    %12 = vector.extract_strided_slice %1 {offsets = [104, 0], sizes = [64, 128], strides = [1, 1]} : vector<192x128xf32> to vector<64x128xf32>
    %13 = tpu.concatenate %11, %12 in 0 : vector<64x128xf32>, vector<64x128xf32> -> vector<128x128xf32>
    %14 = arith.truncf %13 : vector<128x128xf32> to vector<128x128xbf16>
    %cst_8 = arith.constant dense<0.000000e+00> : vector<128x256xf32>
    %15 = tpu.matmul %14, %10, %cst_8 {dimension_numbers = #tpu.dot_dimension_numbers<[1], [0], [0], [1], [0, 0, 1, 1], [], []>} : vector<128x128xbf16>, vector<128x256xbf16>, vector<128x256xf32> -> vector<128x256xf32>
    %16 = arith.addf %8, %15 : vector<128x256xf32>
    %c2 = arith.constant 2 : index
    %c0_9 = arith.constant 0 : index
    %c0_10 = arith.constant 0 : index
    %c0_11 = arith.constant 0 : index
    %17 = vector.load %arg2[%c2, %c0_9, %c0_10, %c0_11] : memref<3x3x128x256xbf16, #tpu.memory_space<vmem>>, vector<1x1x128x256xbf16>
    %18 = vector.shape_cast %17 : vector<1x1x128x256xbf16> to vector<128x256xbf16>
    %19 = vector.extract_strided_slice %1 {offsets = [16, 0], sizes = [64, 128], strides = [1, 1]} : vector<192x128xf32> to vector<64x128xf32>
    %20 = vector.extract_strided_slice %1 {offsets = [112, 0], sizes = [64, 128], strides = [1, 1]} : vector<192x128xf32> to vector<64x128xf32>
    %21 = tpu.concatenate %19, %20 in 0 : vector<64x128xf32>, vector<64x128xf32> -> vector<128x128xf32>
    %22 = arith.truncf %21 : vector<128x128xf32> to vector<128x128xbf16>
    %cst_12 = arith.constant dense<0.000000e+00> : vector<128x256xf32>
    %23 = tpu.matmul %22, %18, %cst_12 {dimension_numbers = #tpu.dot_dimension_numbers<[1], [0], [0], [1], [0, 0, 1, 1], [], []>} : vector<128x128xbf16>, vector<128x256xbf16>, vector<128x256xf32> -> vector<128x256xf32>
    %24 = arith.addf %16, %23 : vector<128x256xf32>
    %c0_13 = arith.constant 0 : index
    %c1_14 = arith.constant 1 : index
    %c0_15 = arith.constant 0 : index
    %c0_16 = arith.constant 0 : index
    %25 = vector.load %arg2[%c0_13, %c1_14, %c0_15, %c0_16] : memref<3x3x128x256xbf16, #tpu.memory_space<vmem>>, vector<1x1x128x256xbf16>
    %26 = vector.shape_cast %25 : vector<1x1x128x256xbf16> to vector<128x256xbf16>
    %27 = vector.extract_strided_slice %1 {offsets = [1, 0], sizes = [64, 128], strides = [1, 1]} : vector<192x128xf32> to vector<64x128xf32>
    %28 = vector.extract_strided_slice %1 {offsets = [97, 0], sizes = [64, 128], strides = [1, 1]} : vector<192x128xf32> to vector<64x128xf32>
    %29 = tpu.concatenate %27, %28 in 0 : vector<64x128xf32>, vector<64x128xf32> -> vector<128x128xf32>
    %30 = arith.truncf %29 : vector<128x128xf32> to vector<128x128xbf16>
    %cst_17 = arith.constant dense<0.000000e+00> : vector<128x256xf32>
    %31 = tpu.matmul %30, %26, %cst_17 {dimension_numbers = #tpu.dot_dimension_numbers<[1], [0], [0], [1], [0, 0, 1, 1], [], []>} : vector<128x128xbf16>, vector<128x256xbf16>, vector<128x256xf32> -> vector<128x256xf32>
    %c1_18 = arith.constant 1 : index
    %c1_19 = arith.constant 1 : index
    %c0_20 = arith.constant 0 : index
    %c0_21 = arith.constant 0 : index
    %32 = vector.load %arg2[%c1_18, %c1_19, %c0_20, %c0_21] : memref<3x3x128x256xbf16, #tpu.memory_space<vmem>>, vector<1x1x128x256xbf16>
    %33 = vector.shape_cast %32 : vector<1x1x128x256xbf16> to vector<128x256xbf16>
    %34 = vector.extract_strided_slice %1 {offsets = [9, 0], sizes = [64, 128], strides = [1, 1]} : vector<192x128xf32> to vector<64x128xf32>
    %35 = vector.extract_strided_slice %1 {offsets = [105, 0], sizes = [64, 128], strides = [1, 1]} : vector<192x128xf32> to vector<64x128xf32>
    %36 = tpu.concatenate %34, %35 in 0 : vector<64x128xf32>, vector<64x128xf32> -> vector<128x128xf32>
    %37 = arith.truncf %36 : vector<128x128xf32> to vector<128x128xbf16>
    %cst_22 = arith.constant dense<0.000000e+00> : vector<128x256xf32>
    %38 = tpu.matmul %37, %33, %cst_22 {dimension_numbers = #tpu.dot_dimension_numbers<[1], [0], [0], [1], [0, 0, 1, 1], [], []>} : vector<128x128xbf16>, vector<128x256xbf16>, vector<128x256xf32> -> vector<128x256xf32>
    %39 = arith.addf %31, %38 : vector<128x256xf32>
    %c2_23 = arith.constant 2 : index
    %c1_24 = arith.constant 1 : index
    %c0_25 = arith.constant 0 : index
    %c0_26 = arith.constant 0 : index
    %40 = vector.load %arg2[%c2_23, %c1_24, %c0_25, %c0_26] : memref<3x3x128x256xbf16, #tpu.memory_space<vmem>>, vector<1x1x128x256xbf16>
    %41 = vector.shape_cast %40 : vector<1x1x128x256xbf16> to vector<128x256xbf16>
    %42 = vector.extract_strided_slice %1 {offsets = [17, 0], sizes = [64, 128], strides = [1, 1]} : vector<192x128xf32> to vector<64x128xf32>
    %43 = vector.extract_strided_slice %1 {offsets = [113, 0], sizes = [64, 128], strides = [1, 1]} : vector<192x128xf32> to vector<64x128xf32>
    %44 = tpu.concatenate %42, %43 in 0 : vector<64x128xf32>, vector<64x128xf32> -> vector<128x128xf32>
    %45 = arith.truncf %44 : vector<128x128xf32> to vector<128x128xbf16>
    %cst_27 = arith.constant dense<0.000000e+00> : vector<128x256xf32>
    %46 = tpu.matmul %45, %41, %cst_27 {dimension_numbers = #tpu.dot_dimension_numbers<[1], [0], [0], [1], [0, 0, 1, 1], [], []>} : vector<128x128xbf16>, vector<128x256xbf16>, vector<128x256xf32> -> vector<128x256xf32>
    %47 = arith.addf %39, %46 : vector<128x256xf32>
    %c0_28 = arith.constant 0 : index
    %c2_29 = arith.constant 2 : index
    %c0_30 = arith.constant 0 : index
    %c0_31 = arith.constant 0 : index
    %48 = vector.load %arg2[%c0_28, %c2_29, %c0_30, %c0_31] : memref<3x3x128x256xbf16, #tpu.memory_space<vmem>>, vector<1x1x128x256xbf16>
    %49 = vector.shape_cast %48 : vector<1x1x128x256xbf16> to vector<128x256xbf16>
    %50 = vector.extract_strided_slice %1 {offsets = [2, 0], sizes = [64, 128], strides = [1, 1]} : vector<192x128xf32> to vector<64x128xf32>
    %51 = vector.extract_strided_slice %1 {offsets = [98, 0], sizes = [64, 128], strides = [1, 1]} : vector<192x128xf32> to vector<64x128xf32>
    %52 = tpu.concatenate %50, %51 in 0 : vector<64x128xf32>, vector<64x128xf32> -> vector<128x128xf32>
    %53 = arith.truncf %52 : vector<128x128xf32> to vector<128x128xbf16>
    %cst_32 = arith.constant dense<0.000000e+00> : vector<128x256xf32>
    %54 = tpu.matmul %53, %49, %cst_32 {dimension_numbers = #tpu.dot_dimension_numbers<[1], [0], [0], [1], [0, 0, 1, 1], [], []>} : vector<128x128xbf16>, vector<128x256xbf16>, vector<128x256xf32> -> vector<128x256xf32>
    %c1_33 = arith.constant 1 : index
    %c2_34 = arith.constant 2 : index
    %c0_35 = arith.constant 0 : index
    %c0_36 = arith.constant 0 : index
    %55 = vector.load %arg2[%c1_33, %c2_34, %c0_35, %c0_36] : memref<3x3x128x256xbf16, #tpu.memory_space<vmem>>, vector<1x1x128x256xbf16>
    %56 = vector.shape_cast %55 : vector<1x1x128x256xbf16> to vector<128x256xbf16>
    %57 = vector.extract_strided_slice %1 {offsets = [10, 0], sizes = [64, 128], strides = [1, 1]} : vector<192x128xf32> to vector<64x128xf32>
    %58 = vector.extract_strided_slice %1 {offsets = [106, 0], sizes = [64, 128], strides = [1, 1]} : vector<192x128xf32> to vector<64x128xf32>
    %59 = tpu.concatenate %57, %58 in 0 : vector<64x128xf32>, vector<64x128xf32> -> vector<128x128xf32>
    %60 = arith.truncf %59 : vector<128x128xf32> to vector<128x128xbf16>
    %cst_37 = arith.constant dense<0.000000e+00> : vector<128x256xf32>
    %61 = tpu.matmul %60, %56, %cst_37 {dimension_numbers = #tpu.dot_dimension_numbers<[1], [0], [0], [1], [0, 0, 1, 1], [], []>} : vector<128x128xbf16>, vector<128x256xbf16>, vector<128x256xf32> -> vector<128x256xf32>
    %62 = arith.addf %54, %61 : vector<128x256xf32>
    %c2_38 = arith.constant 2 : index
    %c2_39 = arith.constant 2 : index
    %c0_40 = arith.constant 0 : index
    %c0_41 = arith.constant 0 : index
    %63 = vector.load %arg2[%c2_38, %c2_39, %c0_40, %c0_41] : memref<3x3x128x256xbf16, #tpu.memory_space<vmem>>, vector<1x1x128x256xbf16>
    %64 = vector.shape_cast %63 : vector<1x1x128x256xbf16> to vector<128x256xbf16>
    %65 = vector.extract_strided_slice %1 {offsets = [18, 0], sizes = [64, 128], strides = [1, 1]} : vector<192x128xf32> to vector<64x128xf32>
    %66 = vector.extract_strided_slice %1 {offsets = [114, 0], sizes = [64, 128], strides = [1, 1]} : vector<192x128xf32> to vector<64x128xf32>
    %67 = tpu.concatenate %65, %66 in 0 : vector<64x128xf32>, vector<64x128xf32> -> vector<128x128xf32>
    %68 = arith.truncf %67 : vector<128x128xf32> to vector<128x128xbf16>
    %cst_42 = arith.constant dense<0.000000e+00> : vector<128x256xf32>
    %69 = tpu.matmul %68, %64, %cst_42 {dimension_numbers = #tpu.dot_dimension_numbers<[1], [0], [0], [1], [0, 0, 1, 1], [], []>} : vector<128x128xbf16>, vector<128x256xbf16>, vector<128x256xf32> -> vector<128x256xf32>
    %70 = arith.addf %62, %69 : vector<128x256xf32>
    %71 = tpu.iota {dimensions = array<i32: 0>} : vector<128x256xi32>
    %c8_i32 = arith.constant 8 : i32
    %c0_i32 = arith.constant 0 : i32
    %72 = arith.cmpi eq, %c8_i32, %c0_i32 : i32
    %c1_i32 = arith.constant 1 : i32
    %73 = arith.select %72, %c1_i32, %c8_i32 : i32
    %74 = vector.broadcast %73 : i32 to vector<128x256xi32>
    %75 = arith.remsi %71, %74 : vector<128x256xi32>
    %c0_i32_43 = arith.constant 0 : i32
    %76 = vector.broadcast %c0_i32_43 : i32 to vector<128x256xi32>
    %77 = arith.cmpi ne, %75, %76 : vector<128x256xi32>
    %c0_i32_44 = arith.constant 0 : i32
    %78 = vector.broadcast %c0_i32_44 : i32 to vector<128x256xi32>
    %79 = arith.cmpi slt, %75, %78 : vector<128x256xi32>
    %c0_i32_45 = arith.constant 0 : i32
    %80 = arith.cmpi slt, %73, %c0_i32_45 : i32
    %81 = vector.broadcast %80 : i1 to vector<128x256xi1>
    %82 = vector.broadcast %81 : vector<128x256xi1> to vector<128x256xi1>
    %83 = arith.xori %79, %82 : vector<128x256xi1>
    %84 = arith.andi %83, %77 : vector<128x256xi1>
    %85 = vector.broadcast %73 : i32 to vector<128x256xi32>
    %86 = arith.addi %75, %85 : vector<128x256xi32>
    %87 = arith.select %84, %86, %75 : vector<128x256xi1>, vector<128x256xi32>
    %c0_i32_46 = arith.constant 0 : i32
    %88 = vector.broadcast %c0_i32_46 : i32 to vector<128x256xi32>
    %89 = arith.cmpi sgt, %87, %88 : vector<128x256xi32>
    %90 = arith.extui %89 : vector<128x256xi1> to vector<128x256xi32>
    %91 = arith.sitofp %90 : vector<128x256xi32> to vector<128x256xf32>
    %c7_i32 = arith.constant 7 : i32
    %92 = vector.broadcast %c7_i32 : i32 to vector<128x256xi32>
    %93 = arith.cmpi slt, %87, %92 : vector<128x256xi32>
    %94 = arith.extui %93 : vector<128x256xi1> to vector<128x256xi32>
    %95 = arith.sitofp %94 : vector<128x256xi32> to vector<128x256xf32>
    %96 = arith.mulf %24, %91 : vector<128x256xf32>
    %97 = arith.addf %47, %96 : vector<128x256xf32>
    %98 = arith.mulf %70, %95 : vector<128x256xf32>
    %99 = arith.addf %97, %98 : vector<128x256xf32>
    %c0_47 = arith.constant 0 : index
    %c0_48 = arith.constant 0 : index
    %100 = vector.load %arg3[%c0_47, %c0_48] : memref<1x256xf32, #tpu.memory_space<vmem>>, vector<1x256xf32>
    %101 = vector.broadcast %100 : vector<1x256xf32> to vector<128x256xf32>
    %102 = arith.addf %99, %101 : vector<128x256xf32>
    %103 = arith.negf %102 : vector<128x256xf32>
    %104 = math.exp %103 : vector<128x256xf32>
    %cst_49 = arith.constant 1.000000e+00 : f32
    %105 = vector.broadcast %cst_49 : f32 to vector<128x256xf32>
    %106 = arith.addf %105, %104 : vector<128x256xf32>
    %107 = arith.divf %105, %106 : vector<128x256xf32>
    %108 = arith.mulf %102, %107 : vector<128x256xf32>
    %109 = arith.truncf %108 : vector<128x256xf32> to vector<128x256xbf16>
    %c0_50 = arith.constant 0 : index
    %c0_51 = arith.constant 0 : index
    %110 = vector.load %arg4[%c0_50, %c0_51] : memref<128x256xbf16, #tpu.memory_space<vmem>>, vector<128x256xbf16>
    tpu.vector_store %arg4[%c0_50, %c0_51], %109 {strides = array<i32>} : memref<128x256xbf16, #tpu.memory_space<vmem>>, vector<128x256xbf16>,
    return
  }
  func.func @transform_0(%arg0: i32) -> (i32, i32) {
    %c0_i32 = arith.constant 0 : i32
    %c0_i32_0 = arith.constant 0 : i32
    return %arg0, %c0_i32 : i32, i32
  }
  func.func @transform_1(%arg0: i32) -> (i32, i32, i32, i32) {
    %c0_i32 = arith.constant 0 : i32
    %c0_i32_0 = arith.constant 0 : i32
    %c0_i32_1 = arith.constant 0 : i32
    %c0_i32_2 = arith.constant 0 : i32
    %c0_i32_3 = arith.constant 0 : i32
    return %c0_i32, %c0_i32_0, %c0_i32_1, %c0_i32_2 : i32, i32, i32, i32
  }
  func.func @transform_2(%arg0: i32) -> (i32, i32) {
    %c0_i32 = arith.constant 0 : i32
    %c0_i32_0 = arith.constant 0 : i32
    %c0_i32_1 = arith.constant 0 : i32
    return %c0_i32, %c0_i32_0 : i32, i32
  }
  func.func @transform_3(%arg0: i32) -> (i32, i32) {
    %c0_i32 = arith.constant 0 : i32
    %c0_i32_0 = arith.constant 0 : i32
    return %arg0, %c0_i32 : i32, i32
  }
}

module attributes {stable_mosaic.version = 11 : i64} {
  func.func @_conv3x3_kernel(%arg0: i32, %arg1: memref<192x128xbf16, #tpu.memory_space<vmem>>, %arg2: memref<3x3x128x128xbf16, #tpu.memory_space<vmem>>, %arg3: memref<1x128xf32, #tpu.memory_space<vmem>>, %arg4: memref<128x128xbf16, #tpu.memory_space<vmem>>) attributes {dimension_semantics = [#tpu.dimension_semantics<parallel>], iteration_bounds = array<i64: 1>, scalar_prefetch = 0 : i64, scratch_operands = 0 : i64, tpu.core_type = #tpu.core_type<tc>, window_params = [{transform_indices = @transform_0, window_bounds = array<i64: 192, 128>}, {pipeline_mode = #tpu.pipeline_mode<synchronous>, transform_indices = @transform_1, window_bounds = array<i64: 3, 3, 128, 128>}, {pipeline_mode = #tpu.pipeline_mode<synchronous>, transform_indices = @transform_2, window_bounds = array<i64: 1, 128>}, {transform_indices = @transform_3, window_bounds = array<i64: 128, 128>}]} {
    %c0 = arith.constant 0 : index
    %c0_0 = arith.constant 0 : index
    %0 = vector.load %arg1[%c0, %c0_0] : memref<192x128xbf16, #tpu.memory_space<vmem>>, vector<192x128xbf16>
    %1 = arith.extf %0 : vector<192x128xbf16> to vector<192x128xf32>
    %c0_1 = arith.constant 0 : index
    %c0_2 = arith.constant 0 : index
    %c0_3 = arith.constant 0 : index
    %c0_4 = arith.constant 0 : index
    %2 = vector.load %arg2[%c0_1, %c0_2, %c0_3, %c0_4] : memref<3x3x128x128xbf16, #tpu.memory_space<vmem>>, vector<1x1x128x128xbf16>
    %3 = vector.shape_cast %2 : vector<1x1x128x128xbf16> to vector<128x128xbf16>
    %4 = vector.extract_strided_slice %1 {offsets = [0, 0], sizes = [64, 128], strides = [1, 1]} : vector<192x128xf32> to vector<64x128xf32>
    %5 = vector.extract_strided_slice %1 {offsets = [96, 0], sizes = [64, 128], strides = [1, 1]} : vector<192x128xf32> to vector<64x128xf32>
    %6 = tpu.concatenate %4, %5 in 0 : vector<64x128xf32>, vector<64x128xf32> -> vector<128x128xf32>
    %7 = arith.truncf %6 : vector<128x128xf32> to vector<128x128xbf16>
    %cst = arith.constant dense<0.000000e+00> : vector<128x128xf32>
    %8 = tpu.matmul %7, %3, %cst {dimension_numbers = #tpu.dot_dimension_numbers<[1], [0], [0], [1], [0, 0, 1, 1], [], []>} : vector<128x128xbf16>, vector<128x128xbf16>, vector<128x128xf32> -> vector<128x128xf32>
    %c1 = arith.constant 1 : index
    %c0_5 = arith.constant 0 : index
    %c0_6 = arith.constant 0 : index
    %c0_7 = arith.constant 0 : index
    %9 = vector.load %arg2[%c1, %c0_5, %c0_6, %c0_7] : memref<3x3x128x128xbf16, #tpu.memory_space<vmem>>, vector<1x1x128x128xbf16>
    %10 = vector.shape_cast %9 : vector<1x1x128x128xbf16> to vector<128x128xbf16>
    %11 = vector.extract_strided_slice %1 {offsets = [8, 0], sizes = [64, 128], strides = [1, 1]} : vector<192x128xf32> to vector<64x128xf32>
    %12 = vector.extract_strided_slice %1 {offsets = [104, 0], sizes = [64, 128], strides = [1, 1]} : vector<192x128xf32> to vector<64x128xf32>
    %13 = tpu.concatenate %11, %12 in 0 : vector<64x128xf32>, vector<64x128xf32> -> vector<128x128xf32>
    %14 = arith.truncf %13 : vector<128x128xf32> to vector<128x128xbf16>
    %cst_8 = arith.constant dense<0.000000e+00> : vector<128x128xf32>
    %15 = tpu.matmul %14, %10, %cst_8 {dimension_numbers = #tpu.dot_dimension_numbers<[1], [0], [0], [1], [0, 0, 1, 1], [], []>} : vector<128x128xbf16>, vector<128x128xbf16>, vector<128x128xf32> -> vector<128x128xf32>
    %16 = arith.addf %8, %15 : vector<128x128xf32>
    %c2 = arith.constant 2 : index
    %c0_9 = arith.constant 0 : index
    %c0_10 = arith.constant 0 : index
    %c0_11 = arith.constant 0 : index
    %17 = vector.load %arg2[%c2, %c0_9, %c0_10, %c0_11] : memref<3x3x128x128xbf16, #tpu.memory_space<vmem>>, vector<1x1x128x128xbf16>
    %18 = vector.shape_cast %17 : vector<1x1x128x128xbf16> to vector<128x128xbf16>
    %19 = vector.extract_strided_slice %1 {offsets = [16, 0], sizes = [64, 128], strides = [1, 1]} : vector<192x128xf32> to vector<64x128xf32>
    %20 = vector.extract_strided_slice %1 {offsets = [112, 0], sizes = [64, 128], strides = [1, 1]} : vector<192x128xf32> to vector<64x128xf32>
    %21 = tpu.concatenate %19, %20 in 0 : vector<64x128xf32>, vector<64x128xf32> -> vector<128x128xf32>
    %22 = arith.truncf %21 : vector<128x128xf32> to vector<128x128xbf16>
    %cst_12 = arith.constant dense<0.000000e+00> : vector<128x128xf32>
    %23 = tpu.matmul %22, %18, %cst_12 {dimension_numbers = #tpu.dot_dimension_numbers<[1], [0], [0], [1], [0, 0, 1, 1], [], []>} : vector<128x128xbf16>, vector<128x128xbf16>, vector<128x128xf32> -> vector<128x128xf32>
    %24 = arith.addf %16, %23 : vector<128x128xf32>
    %c0_13 = arith.constant 0 : index
    %c1_14 = arith.constant 1 : index
    %c0_15 = arith.constant 0 : index
    %c0_16 = arith.constant 0 : index
    %25 = vector.load %arg2[%c0_13, %c1_14, %c0_15, %c0_16] : memref<3x3x128x128xbf16, #tpu.memory_space<vmem>>, vector<1x1x128x128xbf16>
    %26 = vector.shape_cast %25 : vector<1x1x128x128xbf16> to vector<128x128xbf16>
    %27 = vector.extract_strided_slice %1 {offsets = [1, 0], sizes = [64, 128], strides = [1, 1]} : vector<192x128xf32> to vector<64x128xf32>
    %28 = vector.extract_strided_slice %1 {offsets = [97, 0], sizes = [64, 128], strides = [1, 1]} : vector<192x128xf32> to vector<64x128xf32>
    %29 = tpu.concatenate %27, %28 in 0 : vector<64x128xf32>, vector<64x128xf32> -> vector<128x128xf32>
    %30 = arith.truncf %29 : vector<128x128xf32> to vector<128x128xbf16>
    %cst_17 = arith.constant dense<0.000000e+00> : vector<128x128xf32>
    %31 = tpu.matmul %30, %26, %cst_17 {dimension_numbers = #tpu.dot_dimension_numbers<[1], [0], [0], [1], [0, 0, 1, 1], [], []>} : vector<128x128xbf16>, vector<128x128xbf16>, vector<128x128xf32> -> vector<128x128xf32>
    %c1_18 = arith.constant 1 : index
    %c1_19 = arith.constant 1 : index
    %c0_20 = arith.constant 0 : index
    %c0_21 = arith.constant 0 : index
    %32 = vector.load %arg2[%c1_18, %c1_19, %c0_20, %c0_21] : memref<3x3x128x128xbf16, #tpu.memory_space<vmem>>, vector<1x1x128x128xbf16>
    %33 = vector.shape_cast %32 : vector<1x1x128x128xbf16> to vector<128x128xbf16>
    %34 = vector.extract_strided_slice %1 {offsets = [9, 0], sizes = [64, 128], strides = [1, 1]} : vector<192x128xf32> to vector<64x128xf32>
    %35 = vector.extract_strided_slice %1 {offsets = [105, 0], sizes = [64, 128], strides = [1, 1]} : vector<192x128xf32> to vector<64x128xf32>
    %36 = tpu.concatenate %34, %35 in 0 : vector<64x128xf32>, vector<64x128xf32> -> vector<128x128xf32>
    %37 = arith.truncf %36 : vector<128x128xf32> to vector<128x128xbf16>
    %cst_22 = arith.constant dense<0.000000e+00> : vector<128x128xf32>
    %38 = tpu.matmul %37, %33, %cst_22 {dimension_numbers = #tpu.dot_dimension_numbers<[1], [0], [0], [1], [0, 0, 1, 1], [], []>} : vector<128x128xbf16>, vector<128x128xbf16>, vector<128x128xf32> -> vector<128x128xf32>
    %39 = arith.addf %31, %38 : vector<128x128xf32>
    %c2_23 = arith.constant 2 : index
    %c1_24 = arith.constant 1 : index
    %c0_25 = arith.constant 0 : index
    %c0_26 = arith.constant 0 : index
    %40 = vector.load %arg2[%c2_23, %c1_24, %c0_25, %c0_26] : memref<3x3x128x128xbf16, #tpu.memory_space<vmem>>, vector<1x1x128x128xbf16>
    %41 = vector.shape_cast %40 : vector<1x1x128x128xbf16> to vector<128x128xbf16>
    %42 = vector.extract_strided_slice %1 {offsets = [17, 0], sizes = [64, 128], strides = [1, 1]} : vector<192x128xf32> to vector<64x128xf32>
    %43 = vector.extract_strided_slice %1 {offsets = [113, 0], sizes = [64, 128], strides = [1, 1]} : vector<192x128xf32> to vector<64x128xf32>
    %44 = tpu.concatenate %42, %43 in 0 : vector<64x128xf32>, vector<64x128xf32> -> vector<128x128xf32>
    %45 = arith.truncf %44 : vector<128x128xf32> to vector<128x128xbf16>
    %cst_27 = arith.constant dense<0.000000e+00> : vector<128x128xf32>
    %46 = tpu.matmul %45, %41, %cst_27 {dimension_numbers = #tpu.dot_dimension_numbers<[1], [0], [0], [1], [0, 0, 1, 1], [], []>} : vector<128x128xbf16>, vector<128x128xbf16>, vector<128x128xf32> -> vector<128x128xf32>
    %47 = arith.addf %39, %46 : vector<128x128xf32>
    %c0_28 = arith.constant 0 : index
    %c2_29 = arith.constant 2 : index
    %c0_30 = arith.constant 0 : index
    %c0_31 = arith.constant 0 : index
    %48 = vector.load %arg2[%c0_28, %c2_29, %c0_30, %c0_31] : memref<3x3x128x128xbf16, #tpu.memory_space<vmem>>, vector<1x1x128x128xbf16>
    %49 = vector.shape_cast %48 : vector<1x1x128x128xbf16> to vector<128x128xbf16>
    %50 = vector.extract_strided_slice %1 {offsets = [2, 0], sizes = [64, 128], strides = [1, 1]} : vector<192x128xf32> to vector<64x128xf32>
    %51 = vector.extract_strided_slice %1 {offsets = [98, 0], sizes = [64, 128], strides = [1, 1]} : vector<192x128xf32> to vector<64x128xf32>
    %52 = tpu.concatenate %50, %51 in 0 : vector<64x128xf32>, vector<64x128xf32> -> vector<128x128xf32>
    %53 = arith.truncf %52 : vector<128x128xf32> to vector<128x128xbf16>
    %cst_32 = arith.constant dense<0.000000e+00> : vector<128x128xf32>
    %54 = tpu.matmul %53, %49, %cst_32 {dimension_numbers = #tpu.dot_dimension_numbers<[1], [0], [0], [1], [0, 0, 1, 1], [], []>} : vector<128x128xbf16>, vector<128x128xbf16>, vector<128x128xf32> -> vector<128x128xf32>
    %c1_33 = arith.constant 1 : index
    %c2_34 = arith.constant 2 : index
    %c0_35 = arith.constant 0 : index
    %c0_36 = arith.constant 0 : index
    %55 = vector.load %arg2[%c1_33, %c2_34, %c0_35, %c0_36] : memref<3x3x128x128xbf16, #tpu.memory_space<vmem>>, vector<1x1x128x128xbf16>
    %56 = vector.shape_cast %55 : vector<1x1x128x128xbf16> to vector<128x128xbf16>
    %57 = vector.extract_strided_slice %1 {offsets = [10, 0], sizes = [64, 128], strides = [1, 1]} : vector<192x128xf32> to vector<64x128xf32>
    %58 = vector.extract_strided_slice %1 {offsets = [106, 0], sizes = [64, 128], strides = [1, 1]} : vector<192x128xf32> to vector<64x128xf32>
    %59 = tpu.concatenate %57, %58 in 0 : vector<64x128xf32>, vector<64x128xf32> -> vector<128x128xf32>
    %60 = arith.truncf %59 : vector<128x128xf32> to vector<128x128xbf16>
    %cst_37 = arith.constant dense<0.000000e+00> : vector<128x128xf32>
    %61 = tpu.matmul %60, %56, %cst_37 {dimension_numbers = #tpu.dot_dimension_numbers<[1], [0], [0], [1], [0, 0, 1, 1], [], []>} : vector<128x128xbf16>, vector<128x128xbf16>, vector<128x128xf32> -> vector<128x128xf32>
    %62 = arith.addf %54, %61 : vector<128x128xf32>
    %c2_38 = arith.constant 2 : index
    %c2_39 = arith.constant 2 : index
    %c0_40 = arith.constant 0 : index
    %c0_41 = arith.constant 0 : index
    %63 = vector.load %arg2[%c2_38, %c2_39, %c0_40, %c0_41] : memref<3x3x128x128xbf16, #tpu.memory_space<vmem>>, vector<1x1x128x128xbf16>
    %64 = vector.shape_cast %63 : vector<1x1x128x128xbf16> to vector<128x128xbf16>
    %65 = vector.extract_strided_slice %1 {offsets = [18, 0], sizes = [64, 128], strides = [1, 1]} : vector<192x128xf32> to vector<64x128xf32>
    %66 = vector.extract_strided_slice %1 {offsets = [114, 0], sizes = [64, 128], strides = [1, 1]} : vector<192x128xf32> to vector<64x128xf32>
    %67 = tpu.concatenate %65, %66 in 0 : vector<64x128xf32>, vector<64x128xf32> -> vector<128x128xf32>
    %68 = arith.truncf %67 : vector<128x128xf32> to vector<128x128xbf16>
    %cst_42 = arith.constant dense<0.000000e+00> : vector<128x128xf32>
    %69 = tpu.matmul %68, %64, %cst_42 {dimension_numbers = #tpu.dot_dimension_numbers<[1], [0], [0], [1], [0, 0, 1, 1], [], []>} : vector<128x128xbf16>, vector<128x128xbf16>, vector<128x128xf32> -> vector<128x128xf32>
    %70 = arith.addf %62, %69 : vector<128x128xf32>
    %71 = tpu.iota {dimensions = array<i32: 0>} : vector<128x128xi32>
    %c8_i32 = arith.constant 8 : i32
    %c0_i32 = arith.constant 0 : i32
    %72 = arith.cmpi eq, %c8_i32, %c0_i32 : i32
    %c1_i32 = arith.constant 1 : i32
    %73 = arith.select %72, %c1_i32, %c8_i32 : i32
    %74 = vector.broadcast %73 : i32 to vector<128x128xi32>
    %75 = arith.remsi %71, %74 : vector<128x128xi32>
    %c0_i32_43 = arith.constant 0 : i32
    %76 = vector.broadcast %c0_i32_43 : i32 to vector<128x128xi32>
    %77 = arith.cmpi ne, %75, %76 : vector<128x128xi32>
    %c0_i32_44 = arith.constant 0 : i32
    %78 = vector.broadcast %c0_i32_44 : i32 to vector<128x128xi32>
    %79 = arith.cmpi slt, %75, %78 : vector<128x128xi32>
    %c0_i32_45 = arith.constant 0 : i32
    %80 = arith.cmpi slt, %73, %c0_i32_45 : i32
    %81 = vector.broadcast %80 : i1 to vector<128x128xi1>
    %82 = vector.broadcast %81 : vector<128x128xi1> to vector<128x128xi1>
    %83 = arith.xori %79, %82 : vector<128x128xi1>
    %84 = arith.andi %83, %77 : vector<128x128xi1>
    %85 = vector.broadcast %73 : i32 to vector<128x128xi32>
    %86 = arith.addi %75, %85 : vector<128x128xi32>
    %87 = arith.select %84, %86, %75 : vector<128x128xi1>, vector<128x128xi32>
    %c0_i32_46 = arith.constant 0 : i32
    %88 = vector.broadcast %c0_i32_46 : i32 to vector<128x128xi32>
    %89 = arith.cmpi sgt, %87, %88 : vector<128x128xi32>
    %90 = arith.extui %89 : vector<128x128xi1> to vector<128x128xi32>
    %91 = arith.sitofp %90 : vector<128x128xi32> to vector<128x128xf32>
    %c7_i32 = arith.constant 7 : i32
    %92 = vector.broadcast %c7_i32 : i32 to vector<128x128xi32>
    %93 = arith.cmpi slt, %87, %92 : vector<128x128xi32>
    %94 = arith.extui %93 : vector<128x128xi1> to vector<128x128xi32>
    %95 = arith.sitofp %94 : vector<128x128xi32> to vector<128x128xf32>
    %96 = arith.mulf %24, %91 : vector<128x128xf32>
    %97 = arith.addf %47, %96 : vector<128x128xf32>
    %98 = arith.mulf %70, %95 : vector<128x128xf32>
    %99 = arith.addf %97, %98 : vector<128x128xf32>
    %c0_47 = arith.constant 0 : index
    %c0_48 = arith.constant 0 : index
    %100 = vector.load %arg3[%c0_47, %c0_48] : memref<1x128xf32, #tpu.memory_space<vmem>>, vector<1x128xf32>
    %101 = vector.broadcast %100 : vector<1x128xf32> to vector<128x128xf32>
    %102 = arith.addf %99, %101 : vector<128x128xf32>
    %103 = arith.negf %102 : vector<128x128xf32>
    %104 = math.exp %103 : vector<128x128xf32>
    %cst_49 = arith.constant 1.000000e+00 : f32
    %105 = vector.broadcast %cst_49 : f32 to vector<128x128xf32>
    %106 = arith.addf %105, %104 : vector<128x128xf32>
    %107 = arith.divf %105, %106 : vector<128x128xf32>
    %108 = arith.mulf %102, %107 : vector<128x128xf32>
    %109 = arith.truncf %108 : vector<128x128xf32> to vector<128x128xbf16>
    %c0_50 = arith.constant 0 : index
    %c0_51 = arith.constant 0 : index
    %110 = vector.load %arg4[%c0_50, %c0_51] : memref<128x128xbf16, #tpu.memory_space<vmem>>, vector<128x128xbf16>
    tpu.vector_store %arg4[%c0_50, %c0_51], %109 {strides = array<i32>} : memref<128x128xbf16, #tpu.memory_space<vmem>>, vector<128x128xbf16>,
    return
  }
  func.func @transform_0(%arg0: i32) -> (i32, i32) {
    %c0_i32 = arith.constant 0 : i32
    %c0_i32_0 = arith.constant 0 : i32
    return %arg0, %c0_i32 : i32, i32
  }
  func.func @transform_1(%arg0: i32) -> (i32, i32, i32, i32) {
    %c0_i32 = arith.constant 0 : i32
    %c0_i32_0 = arith.constant 0 : i32
    %c0_i32_1 = arith.constant 0 : i32
    %c0_i32_2 = arith.constant 0 : i32
    %c0_i32_3 = arith.constant 0 : i32
    return %c0_i32, %c0_i32_0, %c0_i32_1, %c0_i32_2 : i32, i32, i32, i32
  }
  func.func @transform_2(%arg0: i32) -> (i32, i32) {
    %c0_i32 = arith.constant 0 : i32
    %c0_i32_0 = arith.constant 0 : i32
    %c0_i32_1 = arith.constant 0 : i32
    return %c0_i32, %c0_i32_0 : i32, i32
  }
  func.func @transform_3(%arg0: i32) -> (i32, i32) {
    %c0_i32 = arith.constant 0 : i32
    %c0_i32_0 = arith.constant 0 : i32
    return %arg0, %c0_i32 : i32, i32
  }
}

module attributes {stable_mosaic.version = 11 : i64} {
  func.func @_fused_matmul_bias_silu_kernel(%arg0: i32, %arg1: memref<128x192xbf16, #tpu.memory_space<vmem>>, %arg2: memref<192x128xbf16, #tpu.memory_space<vmem>>, %arg3: memref<128x128xbf16, #tpu.memory_space<vmem>>, %arg4: memref<128x128xbf16, #tpu.memory_space<vmem>>, %arg5: memref<128x128xbf16, #tpu.memory_space<vmem>>, %arg6: memref<128x128xbf16, #tpu.memory_space<vmem>>, %arg7: memref<128x128xbf16, #tpu.memory_space<vmem>>, %arg8: memref<128x128xbf16, #tpu.memory_space<vmem>>, %arg9: memref<1x128xf32, #tpu.memory_space<vmem>>, %arg10: memref<128x128xf32, #tpu.memory_space<vmem>>) attributes {dimension_semantics = [#tpu.dimension_semantics<parallel>], iteration_bounds = array<i64: 1>, scalar_prefetch = 0 : i64, scratch_operands = 0 : i64, tpu.core_type = #tpu.core_type<tc>, window_params = [{transform_indices = @transform_0, window_bounds = array<i64: 128, 192>}, {pipeline_mode = #tpu.pipeline_mode<synchronous>, transform_indices = @transform_1, window_bounds = array<i64: 192, 128>}, {transform_indices = @transform_2, window_bounds = array<i64: 128, 128>}, {pipeline_mode = #tpu.pipeline_mode<synchronous>, transform_indices = @transform_3, window_bounds = array<i64: 128, 128>}, {transform_indices = @transform_4, window_bounds = array<i64: 128, 128>}, {pipeline_mode = #tpu.pipeline_mode<synchronous>, transform_indices = @transform_5, window_bounds = array<i64: 128, 128>}, {transform_indices = @transform_6, window_bounds = array<i64: 128, 128>}, {pipeline_mode = #tpu.pipeline_mode<synchronous>, transform_indices = @transform_7, window_bounds = array<i64: 128, 128>}, {pipeline_mode = #tpu.pipeline_mode<synchronous>, transform_indices = @transform_8, window_bounds = array<i64: 1, 128>}, {transform_indices = @transform_9, window_bounds = array<i64: 128, 128>}]} {
    %c0 = arith.constant 0 : index
    %c0_0 = arith.constant 0 : index
    %0 = vector.load %arg1[%c0, %c0_0] : memref<128x192xbf16, #tpu.memory_space<vmem>>, vector<128x192xbf16>
    %c0_1 = arith.constant 0 : index
    %c0_2 = arith.constant 0 : index
    %1 = vector.load %arg2[%c0_1, %c0_2] : memref<192x128xbf16, #tpu.memory_space<vmem>>, vector<192x128xbf16>
    %cst = arith.constant dense<0.000000e+00> : vector<128x128xf32>
    %2 = tpu.matmul %0, %1, %cst {dimension_numbers = #tpu.dot_dimension_numbers<[1], [0], [0], [1], [0, 0, 1, 1], [], []>} : vector<128x192xbf16>, vector<192x128xbf16>, vector<128x128xf32> -> vector<128x128xf32>
    %c0_3 = arith.constant 0 : index
    %c0_4 = arith.constant 0 : index
    %3 = vector.load %arg3[%c0_3, %c0_4] : memref<128x128xbf16, #tpu.memory_space<vmem>>, vector<128x128xbf16>
    %c0_5 = arith.constant 0 : index
    %c0_6 = arith.constant 0 : index
    %4 = vector.load %arg4[%c0_5, %c0_6] : memref<128x128xbf16, #tpu.memory_space<vmem>>, vector<128x128xbf16>
    %cst_7 = arith.constant dense<0.000000e+00> : vector<128x128xf32>
    %5 = tpu.matmul %3, %4, %cst_7 {dimension_numbers = #tpu.dot_dimension_numbers<[1], [0], [0], [1], [0, 0, 1, 1], [], []>} : vector<128x128xbf16>, vector<128x128xbf16>, vector<128x128xf32> -> vector<128x128xf32>
    %6 = arith.addf %2, %5 : vector<128x128xf32>
    %c0_8 = arith.constant 0 : index
    %c0_9 = arith.constant 0 : index
    %7 = vector.load %arg5[%c0_8, %c0_9] : memref<128x128xbf16, #tpu.memory_space<vmem>>, vector<128x128xbf16>
    %c0_10 = arith.constant 0 : index
    %c0_11 = arith.constant 0 : index
    %8 = vector.load %arg6[%c0_10, %c0_11] : memref<128x128xbf16, #tpu.memory_space<vmem>>, vector<128x128xbf16>
    %cst_12 = arith.constant dense<0.000000e+00> : vector<128x128xf32>
    %9 = tpu.matmul %7, %8, %cst_12 {dimension_numbers = #tpu.dot_dimension_numbers<[1], [0], [0], [1], [0, 0, 1, 1], [], []>} : vector<128x128xbf16>, vector<128x128xbf16>, vector<128x128xf32> -> vector<128x128xf32>
    %10 = arith.addf %6, %9 : vector<128x128xf32>
    %c0_13 = arith.constant 0 : index
    %c0_14 = arith.constant 0 : index
    %11 = vector.load %arg7[%c0_13, %c0_14] : memref<128x128xbf16, #tpu.memory_space<vmem>>, vector<128x128xbf16>
    %c0_15 = arith.constant 0 : index
    %c0_16 = arith.constant 0 : index
    %12 = vector.load %arg8[%c0_15, %c0_16] : memref<128x128xbf16, #tpu.memory_space<vmem>>, vector<128x128xbf16>
    %cst_17 = arith.constant dense<0.000000e+00> : vector<128x128xf32>
    %13 = tpu.matmul %11, %12, %cst_17 {dimension_numbers = #tpu.dot_dimension_numbers<[1], [0], [0], [1], [0, 0, 1, 1], [], []>} : vector<128x128xbf16>, vector<128x128xbf16>, vector<128x128xf32> -> vector<128x128xf32>
    %14 = arith.addf %10, %13 : vector<128x128xf32>
    %c0_18 = arith.constant 0 : index
    %c0_19 = arith.constant 0 : index
    %15 = vector.load %arg9[%c0_18, %c0_19] : memref<1x128xf32, #tpu.memory_space<vmem>>, vector<1x128xf32>
    %16 = vector.broadcast %15 : vector<1x128xf32> to vector<128x128xf32>
    %17 = arith.addf %14, %16 : vector<128x128xf32>
    %18 = arith.negf %17 : vector<128x128xf32>
    %19 = math.exp %18 : vector<128x128xf32>
    %cst_20 = arith.constant 1.000000e+00 : f32
    %20 = vector.broadcast %cst_20 : f32 to vector<128x128xf32>
    %21 = arith.addf %20, %19 : vector<128x128xf32>
    %22 = arith.divf %20, %21 : vector<128x128xf32>
    %23 = arith.mulf %17, %22 : vector<128x128xf32>
    %c0_21 = arith.constant 0 : index
    %c0_22 = arith.constant 0 : index
    %24 = vector.load %arg10[%c0_21, %c0_22] : memref<128x128xf32, #tpu.memory_space<vmem>>, vector<128x128xf32>
    tpu.vector_store %arg10[%c0_21, %c0_22], %23 {strides = array<i32>} : memref<128x128xf32, #tpu.memory_space<vmem>>, vector<128x128xf32>,
    return
  }
  func.func @transform_0(%arg0: i32) -> (i32, i32) {
    %c0_i32 = arith.constant 0 : i32
    %c0_i32_0 = arith.constant 0 : i32
    return %arg0, %c0_i32 : i32, i32
  }
  func.func @transform_1(%arg0: i32) -> (i32, i32) {
    %c0_i32 = arith.constant 0 : i32
    %c0_i32_0 = arith.constant 0 : i32
    %c0_i32_1 = arith.constant 0 : i32
    return %c0_i32, %c0_i32_0 : i32, i32
  }
  func.func @transform_2(%arg0: i32) -> (i32, i32) {
    %c0_i32 = arith.constant 0 : i32
    %c0_i32_0 = arith.constant 0 : i32
    return %arg0, %c0_i32 : i32, i32
  }
  func.func @transform_3(%arg0: i32) -> (i32, i32) {
    %c0_i32 = arith.constant 0 : i32
    %c0_i32_0 = arith.constant 0 : i32
    %c0_i32_1 = arith.constant 0 : i32
    return %c0_i32, %c0_i32_0 : i32, i32
  }
  func.func @transform_4(%arg0: i32) -> (i32, i32) {
    %c0_i32 = arith.constant 0 : i32
    %c0_i32_0 = arith.constant 0 : i32
    return %arg0, %c0_i32 : i32, i32
  }
  func.func @transform_5(%arg0: i32) -> (i32, i32) {
    %c0_i32 = arith.constant 0 : i32
    %c0_i32_0 = arith.constant 0 : i32
    %c0_i32_1 = arith.constant 0 : i32
    return %c0_i32, %c0_i32_0 : i32, i32
  }
  func.func @transform_6(%arg0: i32) -> (i32, i32) {
    %c0_i32 = arith.constant 0 : i32
    %c0_i32_0 = arith.constant 0 : i32
    return %arg0, %c0_i32 : i32, i32
  }
  func.func @transform_7(%arg0: i32) -> (i32, i32) {
    %c0_i32 = arith.constant 0 : i32
    %c0_i32_0 = arith.constant 0 : i32
    %c0_i32_1 = arith.constant 0 : i32
    return %c0_i32, %c0_i32_0 : i32, i32
  }
  func.func @transform_8(%arg0: i32) -> (i32, i32) {
    %c0_i32 = arith.constant 0 : i32
    %c0_i32_0 = arith.constant 0 : i32
    %c0_i32_1 = arith.constant 0 : i32
    return %c0_i32, %c0_i32_0 : i32, i32
  }
  func.func @transform_9(%arg0: i32) -> (i32, i32) {
    %c0_i32 = arith.constant 0 : i32
    %c0_i32_0 = arith.constant 0 : i32
    return %arg0, %c0_i32 : i32, i32
  }
}

</mosaic_0001>

<bundles_post_ra>
// kernel: inception_1_forward.4
= control target key start
LH: loop header
LB: loop body
LE: loop exit
PB: predicated region body
PF: predicated region fallthrough
CT: control target
= control target key end

     0   :  { %8 = vsyncpa [#allocation3], 0  ;;  %s1099_s12 = smov [#allocation2]   ;;  %s1496_s0 = inlined_call_operand.vmem [shape: bf16[128,192], index: 0, kind: input, shape index: {}]   ;;  %s1497_s1 = inlined_call_operand.vmem [shape: bf16[192,256], index: 1, kind: input, shape index: {}]   ;;  %s1498_s2 = inlined_call_operand.hbm [shape: f32[1,256], index: 2, kind: input, shape index: {}]   ;;  %s1499_s3 = inlined_call_operand.vmem [shape: bf16[128,256], index: 3, kind: output, shape index: {}]  }
   0x1   :  { %s19_s13 = sshll.u32 %s1099_s12, 4  ;;  %s1075_s16 = scalar_lea.hbm %s1498_s2, 32  ;;  %s20_s13 = int_to_ptr.vmem [resolvable:$true] %s19_s13 }
   0x2   :  { %p1076_p0 = scmp.ne.s32.totalorder %s1498_s2, %s1075_s16  ;;  %p1079_p1 = scmp.lt.u32.totalorder %s1075_s16, %s1498_s2 }
   0x4   :  { %p1081_p2 = pnand %p1079_p1, %p1076_p0 }
   0x6   :  { %1084 = shalt.err (!%p1081_p2)
}
   0x7   :  { %s1085_s21 = scalar_lea.vmem %s20_s13, 32  ;;  %p1090_p4 = scmp.lt.s32.totalorder %s20_s13, %s20_s13 }
   0x8   :  { %p1086_p3 = scmp.ne.s32.totalorder %s20_s13, %s1085_s21  ;;  %p1091_p5 = scmp.lt.s32.totalorder %s1085_s21, %s1085_s21 }
   0xa   :  { %p1092_p6 = por %p1091_p5, %p1090_p4 }
   0xc   :  { %p1093_p7 = pnand %p1092_p6, %p1086_p3 }
   0xe   :  { %1096 = shalt.err (!%p1093_p7)
}
   0xf   :  { %22 = dma.hbm_to_vmem [thread:$0]  %s1498_s2, 32, %s20_s13, [#allocation3]  }
  0x10   :  { %1097 = dma.done.wait [#allocation3], 32  }
  0x11   :  { %1098 = vsyncadd [#allocation3], 4294967264  ;;  %v887_v0 = vld [vmem:[%s1497_s1 + $0x4] ss:$8 sps:$4 sm:$0xff]   ;;  %v889_v1 = vld [vmem:[%s1497_s1] ss:$8 sps:$4 sm:$0xff]   ;;  %v69_v40 = vlaneseq }
  0x12   :  { %296 = vmatprep.subr.bf16.mxu0 %v887_v0  ;;  %862 = vmatprep.subr.bf16.mxu1 %v887_v0  ;;  %v890_v2 = vld [vmem:[%s1497_s1 + $0x14] ss:$8 sps:$4 sm:$0xff]   ;;  %v892_v3 = vld [vmem:[%s1497_s1 + $0x10] ss:$8 sps:$4 sm:$0xff]   ;;  %v893_v4 = vld [vmem:[%s1497_s1 + $0x24] ss:$8 sps:$4 sm:$0xff]  }
  0x13   :  { %297 = vmatpush1.bf16.msra.mxu0 %v889_v1  ;;  %874 = vmatpush1.bf16.msra.mxu1 %v889_v1  ;;  %v895_v5 = vld [vmem:[%s1497_s1 + $0x20] ss:$8 sps:$4 sm:$0xff]   ;;  %v896_v6 = vld [vmem:[%s1497_s1 + $0x34] ss:$8 sps:$4 sm:$0xff]   ;;  %v898_v7 = vld [vmem:[%s1497_s1 + $0x30] ss:$8 sps:$4 sm:$0xff]  }
  0x14   :  { %298 = vmatprep.subr.bf16.mxu0 %v890_v2  ;;  %863 = vmatprep.subr.bf16.mxu1 %v890_v2  ;;  %v899_v8 = vld [vmem:[%s1497_s1 + $0x44] ss:$8 sps:$4 sm:$0xff]   ;;  %v901_v9 = vld [vmem:[%s1497_s1 + $0x40] ss:$8 sps:$4 sm:$0xff]   ;;  %v902_v10 = vld [vmem:[%s1497_s1 + $0x54] ss:$8 sps:$4 sm:$0xff]  }
  0x15   :  { %v925_v11 = vld [vmem:[%s1496_s0 + $0x4] ss:$8 sps:$4 sm:$0xff]   ;;  %vm271_vm0 = vcmask 523264   ;;  %v904_v13 = vld [vmem:[%s1497_s1 + $0x50] ss:$8 sps:$4 sm:$0xff]   ;;  %v70_v41 = vshrl.u32 %v69_v40, 7 }
  0x16   :  { %v928_v12 = vld [vmem:[%s1496_s0 + $0x44] ss:$8 sps:$4 sm:$0xff]   ;;  %790 = vmatprep.mubr.msk.bf16.mxu0 %vm271_vm0, %v925_v11  ;;  %v907_v15 = vld [vmem:[%s1497_s1 + $0x60] ss:$8 sps:$4 sm:$0xff]   ;;  %v908_v16 = vld [vmem:[%s1497_s1 + $0x74] ss:$8 sps:$4 sm:$0xff]  }
  0x17   :  { %299 = vmatpush1.bf16.msra.mxu0 %v892_v3  ;;  %875 = vmatpush1.bf16.msra.mxu1 %v892_v3  ;;  %v905_v14 = vld [vmem:[%s1497_s1 + $0x64] ss:$8 sps:$4 sm:$0xff]   ;;  %v910_v17 = vld [vmem:[%s1497_s1 + $0x70] ss:$8 sps:$4 sm:$0xff]   ;;  %v913_v19 = vld [vmem:[%s1497_s1 + $0x80] ss:$8 sps:$4 sm:$0xff]  }
  0x18   :  { %300 = vmatprep.subr.bf16.mxu0 %v893_v4  ;;  %864 = vmatprep.subr.bf16.mxu1 %v893_v4  ;;  %v911_v18 = vld [vmem:[%s1497_s1 + $0x84] ss:$8 sps:$4 sm:$0xff]   ;;  %v914_v20 = vld [vmem:[%s1497_s1 + $0x94] ss:$8 sps:$4 sm:$0xff]   ;;  %v916_v21 = vld [vmem:[%s1497_s1 + $0x90] ss:$8 sps:$4 sm:$0xff]  }
  0x19   :  { %794 = vmatprep.mubr.msk.bf16.mxu1 %vm271_vm0, %v928_v12  ;;  %v917_v22 = vld [vmem:[%s1497_s1 + $0xa4] ss:$8 sps:$4 sm:$0xff]   ;;  %v919_v23 = vld [vmem:[%s1497_s1 + $0xa0] ss:$8 sps:$4 sm:$0xff]   ;;  %v920_v24 = vld [vmem:[%s1497_s1 + $0xb4] ss:$8 sps:$4 sm:$0xff]  }
  0x1a   :  { %v922_v25 = vld [vmem:[%s1497_s1 + $0xb0] ss:$8 sps:$4 sm:$0xff]   ;;  %v923_v26 = vld [vmem:[%s1496_s0] ss:$8 sps:$4 sm:$0xff]   ;;  %v929_v28 = vld [vmem:[%s1496_s0 + $0x14] ss:$8 sps:$4 sm:$0xff]  }
  0x1b   :  { %301 = vmatpush1.bf16.msra.mxu0 %v895_v5  ;;  %876 = vmatpush1.bf16.msra.mxu1 %v895_v5  ;;  %v926_v27 = vld [vmem:[%s1496_s0 + $0x40] ss:$8 sps:$4 sm:$0xff]   ;;  %v931_v29 = vld [vmem:[%s1496_s0 + $0x54] ss:$8 sps:$4 sm:$0xff]   ;;  %v933_v30 = vld [vmem:[%s1496_s0 + $0x10] ss:$8 sps:$4 sm:$0xff]  }
  0x1c   :  { %302 = vmatprep.subr.bf16.mxu0 %v896_v6  ;;  %865 = vmatprep.subr.bf16.mxu1 %v896_v6  ;;  %v934_v31 = vld [vmem:[%s1496_s0 + $0x50] ss:$8 sps:$4 sm:$0xff]   ;;  %v935_v32 = vld [vmem:[%s1496_s0 + $0x24] ss:$8 sps:$4 sm:$0xff]   ;;  %v939_v34 = vld [vmem:[%s1496_s0 + $0x20] ss:$8 sps:$4 sm:$0xff]  }
  0x1d   :  { %v937_v33 = vld [vmem:[%s1496_s0 + $0x64] ss:$8 sps:$4 sm:$0xff]   ;;  %v940_v35 = vld [vmem:[%s1496_s0 + $0x60] ss:$8 sps:$4 sm:$0xff]   ;;  %v941_v36 = vld [vmem:[%s1496_s0 + $0x34] ss:$8 sps:$4 sm:$0xff]  }
  0x1e   :  { %v943_v37 = vld [vmem:[%s1496_s0 + $0x74] ss:$8 sps:$4 sm:$0xff]   ;;  %v945_v38 = vld [vmem:[%s1496_s0 + $0x30] ss:$8 sps:$4 sm:$0xff]   ;;  %v71_v42 = vsub.s32 0, %v70_v41  ;;  %v75_v44 = vsub.s32 1, %v70_v41 }
  0x1f   :  { %303 = vmatpush1.bf16.msra.mxu0 %v898_v7  ;;  %877 = vmatpush1.bf16.msra.mxu1 %v898_v7  ;;  %v946_v39 = vld [vmem:[%s1496_s0 + $0x70] ss:$8 sps:$4 sm:$0xff]   ;;  %v67_v43 = vld [vmem:[#allocation2] sm:$0x3] }
  0x20   :  { %304 = vmatprep.subr.bf16.mxu0 %v899_v8  ;;  %866 = vmatprep.subr.bf16.mxu1 %v899_v8  ;;  %v1260_v45 = vrot.slane %v67_v43, %v71_v42  ;;  %v1262_v46 = vrot.slane %v67_v43, %v75_v44 }
  0x23   :  { %305 = vmatpush1.bf16.msra.mxu0 %v901_v9  ;;  %878 = vmatpush1.bf16.msra.mxu1 %v901_v9 }
  0x24   :  { %306 = vmatprep.subr.bf16.mxu0 %v902_v10  ;;  %867 = vmatprep.subr.bf16.mxu1 %v902_v10 }
  0x27   :  { %307 = vmatpush1.bf16.msra.mxu0 %v904_v13  ;;  %879 = vmatpush1.bf16.msra.mxu1 %v904_v13 }
  0x28   :  { %308 = vmatprep.subr.bf16.mxu0 %v905_v14  ;;  %868 = vmatprep.subr.bf16.mxu1 %v905_v14 }
  0x2b   :  { %309 = vmatpush1.bf16.msra.mxu0 %v907_v15  ;;  %880 = vmatpush1.bf16.msra.mxu1 %v907_v15 }
  0x2c   :  { %310 = vmatprep.subr.bf16.mxu0 %v908_v16  ;;  %869 = vmatprep.subr.bf16.mxu1 %v908_v16 }
  0x2f   :  { %311 = vmatpush1.bf16.msra.mxu0 %v910_v17  ;;  %881 = vmatpush1.bf16.msra.mxu1 %v910_v17 }
  0x30   :  { %312 = vmatprep.subr.bf16.mxu0 %v911_v18  ;;  %870 = vmatprep.subr.bf16.mxu1 %v911_v18 }
  0x33   :  { %313 = vmatpush1.bf16.msra.mxu0 %v913_v19  ;;  %882 = vmatpush1.bf16.msra.mxu1 %v913_v19 }
  0x34   :  { %314 = vmatprep.subr.bf16.mxu0 %v914_v20  ;;  %871 = vmatprep.subr.bf16.mxu1 %v914_v20 }
  0x37   :  { %315 = vmatpush1.bf16.msra.mxu0 %v916_v21  ;;  %883 = vmatpush1.bf16.msra.mxu1 %v916_v21 }
  0x38   :  { %316 = vmatprep.subr.bf16.mxu0 %v917_v22  ;;  %872 = vmatprep.subr.bf16.mxu1 %v917_v22 }
  0x3b   :  { %317 = vmatpush1.bf16.msra.mxu0 %v919_v23  ;;  %884 = vmatpush1.bf16.msra.mxu1 %v919_v23 }
  0x3c   :  { %318 = vmatprep.subr.bf16.mxu0 %v920_v24  ;;  %873 = vmatprep.subr.bf16.mxu1 %v920_v24 }
  0x3f   :  { %319 = vmatpush1.bf16.msra.mxu0 %v922_v25  ;;  %885 = vmatpush1.bf16.msra.mxu1 %v922_v25 }
  0x42   :  { %329 = vmatmul.mubr.bf16.vlgmr.msra.gmra.mrb[0].mxu0 %v923_v26  ;;  %369 = vmatmul.mubr.bf16.vlgmr.msra.gmra.mrb[0].mxu1 %v926_v27 }
  0x43   :  { %791 = vmatprep.mubr.msk.bf16.mxu0 %vm271_vm0, %v929_v28  ;;  %795 = vmatprep.mubr.msk.bf16.mxu1 %vm271_vm0, %v931_v29 }
  0x4a   :  { %339 = vmatmul.mubr.bf16.gmra.mrb[4].mxu0 %v933_v30  ;;  %379 = vmatmul.mubr.bf16.gmra.mrb[4].mxu1 %v934_v31 }
  0x4b   :  { %792 = vmatprep.mubr.msk.bf16.mxu0 %vm271_vm0, %v935_v32  ;;  %796 = vmatprep.mubr.msk.bf16.mxu1 %vm271_vm0, %v937_v33 }
  0x52   :  { %349 = vmatmul.mubr.bf16.gmra.mrb[8].mxu0 %v939_v34  ;;  %389 = vmatmul.mubr.bf16.gmra.mrb[8].mxu1 %v940_v35 }
  0x53   :  { %793 = vmatprep.mubr.msk.bf16.mxu0 %vm271_vm0, %v941_v36  ;;  %797 = vmatprep.mubr.msk.bf16.mxu1 %vm271_vm0, %v943_v37 }
  0x5a   :  { %359 = vmatmul.mubr.bf16.gmra.mrb[12].mxu0 %v945_v38  ;;  %399 = vmatmul.mubr.bf16.gmra.mrb[12].mxu1 %v946_v39 }
 0x115   :  { %v330_v47 = vpop.f32.mrb[0].mxu0  ;;  %v370_v48 = vpop.f32.mrb[0].mxu1 }
 0x116   :  { %v1265_v49 = vadd.f32 %v330_v47, %v1260_v45  ;;  %v1268_v50 = vadd.f32 %v370_v48, %v1260_v45  ;;  %v332_v51 = vpop.f32.mrb[1].mxu0  ;;  %v372_v52 = vpop.f32.mrb[1].mxu1 }
 0x117   :  { %v1271_v53 = vadd.f32 %v332_v51, %v1262_v46  ;;  %v1274_v54 = vadd.f32 %v372_v52, %v1262_v46  ;;  %v334_v55 = vpop.f32.mrb[2].mxu0  ;;  %v374_v56 = vpop.f32.mrb[2].mxu1 }
 0x118   :  { %v798_v57 = vmul.f32 -1.442695, %v1265_v49  ;;  %v814_v58 = vmul.f32 -1.442695, %v1268_v50  ;;  %v1279_v59 = vadd.f32 %v334_v55, %v1260_v45  ;;  %v1282_v60 = vadd.f32 %v374_v56, %v1260_v45  ;;  %v336_v61 = vpop.f32.mrb[3].mxu0  ;;  %v376_v62 = vpop.f32.mrb[3].mxu1 }
 0x119   :  { %v799_v63 = vmul.f32 -1.442695, %v1271_v53  ;;  %v815_v0 = vmul.f32 -1.442695, %v1274_v54  ;;  %v1287_v1 = vadd.f32 %v336_v61, %v1262_v46  ;;  %v1290_v2 = vadd.f32 %v376_v62, %v1262_v46 }
 0x11a   :  { %947 = vpow2.f32 %v798_v57  ;;  %v800_v3 = vmul.f32 -1.442695, %v1279_v59  ;;  %v816_v4 = vmul.f32 -1.442695, %v1282_v60 }
 0x11b   :  { %949 = vpow2.f32 %v814_v58  ;;  %v801_v5 = vmul.f32 -1.442695, %v1287_v1  ;;  %v817_v6 = vmul.f32 -1.442695, %v1290_v2 }
 0x11c   :  { %951 = vpow2.f32 %v799_v63 }
 0x11d   :  { %953 = vpow2.f32 %v815_v0  ;;  %v340_v7 = vpop.f32.mrb[4].mxu0  ;;  %v380_v8 = vpop.f32.mrb[4].mxu1 }
 0x11e   :  { %955 = vpow2.f32 %v800_v3  ;;  %v1297_v9 = vadd.f32 %v340_v7, %v1260_v45  ;;  %v1300_v10 = vadd.f32 %v380_v8, %v1260_v45  ;;  %v342_v11 = vpop.f32.mrb[5].mxu0  ;;  %v382_v12 = vpop.f32.mrb[5].mxu1 }
 0x11f   :  { %957 = vpow2.f32 %v816_v4  ;;  %v1303_v13 = vadd.f32 %v342_v11, %v1262_v46  ;;  %v1306_v14 = vadd.f32 %v382_v12, %v1262_v46  ;;  %v344_v15 = vpop.f32.mrb[6].mxu0  ;;  %v384_v16 = vpop.f32.mrb[6].mxu1 }
 0x120   :  { %959 = vpow2.f32 %v801_v5  ;;  %v802_v17 = vmul.f32 -1.442695, %v1297_v9  ;;  %v818_v18 = vmul.f32 -1.442695, %v1300_v10  ;;  %v1311_v19 = vadd.f32 %v344_v15, %v1260_v45  ;;  %v346_v20 = vpop.f32.mrb[7].mxu0  ;;  %v386_v21 = vpop.f32.mrb[7].mxu1 }
 0x121   :  { %961 = vpow2.f32 %v817_v6  ;;  %v803_v22 = vmul.f32 -1.442695, %v1303_v13  ;;  %v819_v23 = vmul.f32 -1.442695, %v1306_v14  ;;  %v1321_v56 = vadd.f32 %v384_v16, %v1260_v45 }
 0x122   :  { %963 = vpow2.f32 %v802_v17  ;;  %v804_v24 = vmul.f32 -1.442695, %v1311_v19  ;;  %v1324_v61 = vadd.f32 %v346_v20, %v1262_v46  ;;  %v1327_v62 = vadd.f32 %v386_v21, %v1262_v46 }
 0x123   :  { %965 = vpow2.f32 %v818_v18  ;;  %v820_v20 = vmul.f32 -1.442695, %v1321_v56 }
 0x124   :  { %v948_v25 = vpop.eup %947  ;;  %967 = vpow2.f32 %v803_v22 }
 0x125   :  { %v950_v26 = vpop.eup %949  ;;  %v505_v27 = vadd.f32 1.0, %v948_v25  ;;  %969 = vpow2.f32 %v819_v23  ;;  %v350_v28 = vpop.f32.mrb[8].mxu0 }
 0x126   :  { %v390_v29 = vpop.f32.mrb[8].mxu1  ;;  %v952_v30 = vpop.eup %951  ;;  %v521_v31 = vadd.f32 1.0, %v950_v26  ;;  %971 = vpow2.f32 %v804_v24  ;;  %v1330_v4 = vadd.f32 %v350_v28, %v1260_v45  ;;  %v805_v26 = vmul.f32 -1.442695, %v1324_v61 }
 0x127   :  { %v352_v32 = vpop.f32.mrb[9].mxu0  ;;  %v392_v33 = vpop.f32.mrb[9].mxu1  ;;  %973 = vrcp.f32 %v505_v27  ;;  %v506_v35 = vadd.f32 1.0, %v952_v30  ;;  %v1335_v11 = vadd.f32 %v390_v29, %v1260_v45  ;;  %v821_v27 = vmul.f32 -1.442695, %v1327_v62 }
 0x128   :  { %v954_v34 = vpop.eup %953  ;;  %v354_v36 = vpop.f32.mrb[10].mxu0  ;;  %975 = vrcp.f32 %v521_v31  ;;  %v1338_v12 = vadd.f32 %v352_v32, %v1262_v46  ;;  %v1346_v21 = vadd.f32 %v392_v33, %v1262_v46  ;;  %v806_v31 = vmul.f32 -1.442695, %v1330_v4 }
 0x129   :  { %v1316_v37 = vpop.f32.mrb[10].mxu1  ;;  %v956_v38 = vpop.eup %955  ;;  %v522_v39 = vadd.f32 1.0, %v954_v34  ;;  %977 = vrcp.f32 %v506_v35  ;;  %v1359_v32 = vadd.f32 %v354_v36, %v1260_v45  ;;  %v822_v35 = vmul.f32 -1.442695, %v1335_v11 }
 0x12a   :  { %v1318_v40 = vpop.f32.mrb[11].mxu0  ;;  %v958_v41 = vpop.eup %957  ;;  %v507_v42 = vadd.f32 1.0, %v956_v38  ;;  %v807_v38 = vmul.f32 -1.442695, %v1338_v12 }
 0x12b   :  { %v396_v43 = vpop.f32.mrb[11].mxu1  ;;  %v960_v44 = vpop.eup %959  ;;  %979 = vrcp.f32 %v522_v39  ;;  %v523_v47 = vadd.f32 1.0, %v958_v41 }
 0x12c   :  { %v962_v48 = vpop.eup %961  ;;  %981 = vrcp.f32 %v507_v42  ;;  %v508_v51 = vadd.f32 1.0, %v960_v44  ;;  %v1368_v42 = vadd.f32 %v1316_v37, %v1260_v45 }
 0x12d   :  { %v964_v52 = vpop.eup %963  ;;  %983 = vrcp.f32 %v523_v47  ;;  %v524_v55 = vadd.f32 1.0, %v962_v48  ;;  %v360_v63 = vpop.f32.mrb[12].mxu0  ;;  %v1376_v47 = vadd.f32 %v396_v43, %v1262_v46 }
 0x12e   :  { %v966_v57 = vpop.eup %965  ;;  %985 = vrcp.f32 %v508_v51  ;;  %v509_v58 = vadd.f32 1.0, %v964_v52  ;;  %v400_v5 = vpop.f32.mrb[12].mxu1  ;;  %v808_v52 = vmul.f32 -1.442695, %v1359_v32 }
 0x12f   :  { %v968_v0 = vpop.eup %967  ;;  %987 = vrcp.f32 %v524_v55  ;;  %v525_v3 = vadd.f32 1.0, %v966_v57  ;;  %v1332_v6 = vpop.f32.mrb[13].mxu0 }
 0x130   :  { %v970_v7 = vpop.eup %969  ;;  %989 = vrcp.f32 %v509_v58  ;;  %v510_v8 = vadd.f32 1.0, %v968_v0  ;;  %v1340_v15 = vpop.f32.mrb[13].mxu1  ;;  %v1390_v58 = vadd.f32 %v400_v5, %v1260_v45 }
 0x131   :  { %v1342_v16 = vpop.f32.mrb[14].mxu0  ;;  %v972_v17 = vpop.eup %971  ;;  %991 = vrcp.f32 %v525_v3  ;;  %v526_v18 = vadd.f32 1.0, %v970_v7 }
 0x132   :  { %v1348_v22 = vpop.f32.mrb[14].mxu1  ;;  %v1350_v23 = vpop.f32.mrb[15].mxu0  ;;  %993 = vrcp.f32 %v510_v8  ;;  %v511_v25 = vadd.f32 1.0, %v972_v17  ;;  %v825_v8 = vmul.f32 -1.442695, %v1376_v47 }
 0x133   :  { %v974_v24 = vpop.eup %973  ;;  %v1354_v28 = vpop.f32.mrb[15].mxu1  ;;  %995 = vrcp.f32 %v526_v18 }
 0x134   :  { %v976_v29 = vpop.eup %975  ;;  %v601_v30 = vmul.f32 %v974_v24, %v1265_v49  ;;  %997 = vrcp.f32 %v511_v25  ;;  %v823_v49 = vmul.f32 -1.442695, %v1346_v21 }
 0x135   :  { %v978_v33 = vpop.eup %977  ;;  %v617_v34 = vmul.f32 %v976_v29, %v1268_v50  ;;  %999 = vpow2.f32 %v820_v20  ;;  %v1373_v50 = vadd.f32 %v1318_v40, %v1262_v46 }
 0x136   :  { %v980_v39 = vpop.eup %979  ;;  %v602_v41 = vmul.f32 %v978_v33, %v1271_v53  ;;  %1001 = vpow2.f32 %v805_v26 }
 0x137   :  { %v982_v36 = vpop.eup %981  ;;  %v618_v44 = vmul.f32 %v980_v39, %v1274_v54  ;;  %1003 = vpow2.f32 %v821_v27  ;;  %v1382_v54 = vadd.f32 %v360_v63, %v1260_v45  ;;  %v809_v63 = vmul.f32 -1.442695, %v1373_v50 }
 0x138   :  { %v984_v48 = vpop.eup %983  ;;  %v846_v53 = vpack.c.bf16 %v602_v41, %v601_v30  ;;  %v603_v51 = vmul.f32 %v982_v36, %v1279_v59  ;;  %1005 = vpow2.f32 %v806_v31  ;;  %v824_v59 = vmul.f32 -1.442695, %v1368_v42 }
 0x139   :  { %v986_v37 = vpop.eup %985  ;;  %v854_v55 = vpack.c.bf16 %v618_v44, %v617_v34  ;;  %v619_v57 = vmul.f32 %v984_v48, %v1282_v60  ;;  %1007 = vpow2.f32 %v822_v35  ;;  %v810_v20 = vmul.f32 -1.442695, %v1382_v54 }
 0x13a   :  { %v988_v40 = vpop.eup %987  ;;  %729 = vst [vmem:[%s1499_s3] sm:$0xff] %v846_v53  ;;  %v604_v43 = vmul.f32 %v986_v37, %v1287_v1  ;;  %1009 = vpow2.f32 %v807_v38 }
 0x13b   :  { %v990_v0 = vpop.eup %989  ;;  %737 = vst [vmem:[%s1499_s3 + $0x40] sm:$0xff] %v854_v55  ;;  %v620_v60 = vmul.f32 %v988_v40, %v1290_v2  ;;  %1011 = vpow2.f32 %v823_v49 }
 0x13c   :  { %v992_v3 = vpop.eup %991  ;;  %v847_v7 = vpack.c.bf16 %v604_v43, %v603_v51  ;;  %v605_v1 = vmul.f32 %v990_v0, %v1297_v9  ;;  %1013 = vpow2.f32 %v808_v52  ;;  %v826_v9 = vmul.f32 -1.442695, %v1390_v58 }
 0x13d   :  { %v994_v17 = vpop.eup %993  ;;  %v855_v5 = vpack.c.bf16 %v620_v60, %v619_v57  ;;  %v621_v18 = vmul.f32 %v992_v3, %v1300_v10  ;;  %1015 = vpow2.f32 %v824_v59  ;;  %v1418_v52 = vadd.f32 %v1332_v6, %v1262_v46 }
 0x13e   :  { %v996_v24 = vpop.eup %995  ;;  %730 = vst [vmem:[%s1499_s3 + $0x8] sm:$0xff] %v847_v7  ;;  %v606_v2 = vmul.f32 %v994_v17, %v1303_v13  ;;  %1017 = vpow2.f32 %v809_v63  ;;  %v1422_v57 = vadd.f32 %v1340_v15, %v1262_v46  ;;  %v1426_v59 = vadd.f32 %v1342_v16, %v1260_v45 }
 0x13f   :  { %v998_v25 = vpop.eup %997  ;;  %738 = vst [vmem:[%s1499_s3 + $0x48] sm:$0xff] %v855_v5  ;;  %v622_v10 = vmul.f32 %v996_v24, %v1306_v14  ;;  %1019 = vpow2.f32 %v825_v8  ;;  %v1430_v6 = vadd.f32 %v1348_v22, %v1260_v45  ;;  %v811_v3 = vmul.f32 -1.442695, %v1418_v52 }
 0x140   :  { %v1000_v26 = vpop.eup %999  ;;  %v848_v27 = vpack.c.bf16 %v606_v2, %v605_v1  ;;  %1021 = vpow2.f32 %v810_v20  ;;  %v1435_v15 = vadd.f32 %v1350_v23, %v1262_v46  ;;  %v607_v1 = vmul.f32 %v998_v25, %v1311_v19 }
 0x141   :  { %v1002_v29 = vpop.eup %1001  ;;  %v856_v30 = vpack.c.bf16 %v622_v10, %v621_v18  ;;  %v527_v31 = vadd.f32 1.0, %v1000_v26  ;;  %1023 = vpow2.f32 %v826_v9  ;;  %v827_v16 = vmul.f32 -1.442695, %v1422_v57 }
 0x142   :  { %v1004_v33 = vpop.eup %1003  ;;  %731 = vst [vmem:[%s1499_s3 + $0x10] sm:$0xff] %v848_v27  ;;  %v512_v13 = vadd.f32 1.0, %v1002_v29  ;;  %v1441_v8 = vadd.f32 %v1354_v28, %v1262_v46  ;;  %v812_v17 = vmul.f32 -1.442695, %v1426_v59  ;;  %v828_v23 = vmul.f32 -1.442695, %v1430_v6 }
 0x143   :  { %v1006_v34 = vpop.eup %1005  ;;  %739 = vst [vmem:[%s1499_s3 + $0x50] sm:$0xff] %v856_v30  ;;  %1025 = vrcp.f32 %v527_v31  ;;  %v528_v14 = vadd.f32 1.0, %v1004_v33  ;;  %v813_v24 = vmul.f32 -1.442695, %v1435_v15 }
 0x144   :  { %v1008_v35 = vpop.eup %1007  ;;  %1027 = vrcp.f32 %v512_v13  ;;  %v513_v38 = vadd.f32 1.0, %v1006_v34 }
 0x145   :  { %v1010_v39 = vpop.eup %1009  ;;  %1029 = vrcp.f32 %v528_v14  ;;  %v529_v41 = vadd.f32 1.0, %v1008_v35 }
 0x146   :  { %v1012_v49 = vpop.eup %1011  ;;  %1031 = vrcp.f32 %v513_v38  ;;  %v514_v36 = vadd.f32 1.0, %v1010_v39 }
 0x147   :  { %v1014_v44 = vpop.eup %1013  ;;  %1033 = vrcp.f32 %v529_v41  ;;  %v530_v48 = vadd.f32 1.0, %v1012_v49 }
 0x148   :  { %v1016_v53 = vpop.eup %1015  ;;  %1035 = vrcp.f32 %v514_v36  ;;  %v515_v51 = vadd.f32 1.0, %v1014_v44 }
 0x149   :  { %v1018_v37 = vpop.eup %1017  ;;  %1037 = vrcp.f32 %v530_v48  ;;  %v531_v55 = vadd.f32 1.0, %v1016_v53 }
 0x14a   :  { %v1020_v40 = vpop.eup %1019  ;;  %1039 = vrcp.f32 %v515_v51  ;;  %v516_v43 = vadd.f32 1.0, %v1018_v37 }
 0x14b   :  { %v1022_v0 = vpop.eup %1021  ;;  %1041 = vrcp.f32 %v531_v55  ;;  %v532_v60 = vadd.f32 1.0, %v1020_v40 }
 0x14c   :  { %v1024_v63 = vpop.eup %1023  ;;  %1043 = vrcp.f32 %v516_v43  ;;  %v517_v30 = vadd.f32 1.0, %v1022_v0 }
 0x14d   :  { %v1026_v7 = vpop.eup %1025  ;;  %1045 = vrcp.f32 %v532_v60 }
 0x14e   :  { %v1028_v45 = vpop.eup %1027  ;;  %v623_v22 = vmul.f32 %v1026_v7, %v1321_v56  ;;  %1047 = vpow2.f32 %v811_v3  ;;  %v829_v56 = vmul.f32 -1.442695, %v1441_v8 }
 0x14f   :  { %v1030_v5 = vpop.eup %1029  ;;  %v608_v18 = vmul.f32 %v1028_v45, %v1324_v61  ;;  %1049 = vpow2.f32 %v827_v16 }
 0x150   :  { %v1032_v20 = vpop.eup %1031  ;;  %v624_v19 = vmul.f32 %v1030_v5, %v1327_v62  ;;  %1051 = vpow2.f32 %v812_v17 }
 0x151   :  { %v1034_v2 = vpop.eup %1033  ;;  %v849_v9 = vpack.c.bf16 %v608_v18, %v607_v1  ;;  %v609_v46 = vmul.f32 %v1032_v20, %v1330_v4  ;;  %1053 = vpow2.f32 %v828_v23 }
 0x152   :  { %v1036_v28 = vpop.eup %1035  ;;  %v857_v25 = vpack.c.bf16 %v624_v19, %v623_v22  ;;  %v625_v10 = vmul.f32 %v1034_v2, %v1335_v11  ;;  %1055 = vpow2.f32 %v813_v24 }
 0x153   :  { %v1038_v61 = vpop.eup %1037  ;;  %732 = vst [vmem:[%s1499_s3 + $0x18] sm:$0xff] %v849_v9  ;;  %v610_v62 = vmul.f32 %v1036_v28, %v1338_v12  ;;  %1057 = vpow2.f32 %v829_v56  ;;  %v533_v12 = vadd.f32 1.0, %v1024_v63 }
 0x154   :  { %v1040_v26 = vpop.eup %1039  ;;  %740 = vst [vmem:[%s1499_s3 + $0x58] sm:$0xff] %v857_v25  ;;  %v626_v4 = vmul.f32 %v1038_v61, %v1346_v21  ;;  %1059 = vrcp.f32 %v517_v30 }
 0x155   :  { %v1042_v27 = vpop.eup %1041  ;;  %v850_v29 = vpack.c.bf16 %v610_v62, %v609_v46  ;;  %v611_v11 = vmul.f32 %v1040_v26, %v1359_v32  ;;  %1061 = vrcp.f32 %v533_v12 }
 0x156   :  { %v1044_v31 = vpop.eup %1043  ;;  %v858_v33 = vpack.c.bf16 %v626_v4, %v625_v10  ;;  %v627_v13 = vmul.f32 %v1042_v27, %v1368_v42 }
 0x157   :  { %v1046_v34 = vpop.eup %1045  ;;  %733 = vst [vmem:[%s1499_s3 + $0x20] sm:$0xff] %v850_v29  ;;  %v612_v14 = vmul.f32 %v1044_v31, %v1373_v50 }
 0x158   :  { %741 = vst [vmem:[%s1499_s3 + $0x60] sm:$0xff] %v858_v33  ;;  %v628_v21 = vmul.f32 %v1046_v34, %v1376_v47  ;;  %v1048_v35 = vpop.eup %1047 }
 0x159   :  { %v851_v32 = vpack.c.bf16 %v612_v14, %v611_v11  ;;  %v1050_v42 = vpop.eup %1049  ;;  %v518_v39 = vadd.f32 1.0, %v1048_v35 }
 0x15a   :  { %v859_v38 = vpack.c.bf16 %v628_v21, %v627_v13  ;;  %v1052_v41 = vpop.eup %1051  ;;  %v534_v50 = vadd.f32 1.0, %v1050_v42 }
 0x15b   :  { %734 = vst [vmem:[%s1499_s3 + $0x28] sm:$0xff] %v851_v32  ;;  %v1054_v49 = vpop.eup %1053  ;;  %1063 = vrcp.f32 %v518_v39  ;;  %v519_v47 = vadd.f32 1.0, %v1052_v41 }
 0x15c   :  { %742 = vst [vmem:[%s1499_s3 + $0x68] sm:$0xff] %v859_v38  ;;  %v1056_v36 = vpop.eup %1055  ;;  %1065 = vrcp.f32 %v534_v50  ;;  %v535_v44 = vadd.f32 1.0, %v1054_v49 }
 0x15d   :  { %v1058_v48 = vpop.eup %1057  ;;  %1067 = vrcp.f32 %v519_v47  ;;  %v520_v53 = vadd.f32 1.0, %v1056_v36 }
 0x15e   :  { %1069 = vrcp.f32 %v535_v44  ;;  %v536_v51 = vadd.f32 1.0, %v1058_v48  ;;  %v1060_v37 = vpop.eup %1059 }
 0x15f   :  { %1071 = vrcp.f32 %v520_v53  ;;  %v1062_v55 = vpop.eup %1061  ;;  %v613_v40 = vmul.f32 %v1060_v37, %v1382_v54 }
 0x160   :  { %1073 = vrcp.f32 %v536_v51  ;;  %v629_v0 = vmul.f32 %v1062_v55, %v1390_v58 }
 0x165   :  { %v1064_v43 = vpop.eup %1063 }
 0x166   :  { %v1066_v60 = vpop.eup %1065  ;;  %v614_v63 = vmul.f32 %v1064_v43, %v1418_v52 }
 0x167   :  { %v1068_v3 = vpop.eup %1067  ;;  %v630_v7 = vmul.f32 %v1066_v60, %v1422_v57 }
 0x168   :  { %v1070_v1 = vpop.eup %1069  ;;  %v852_v16 = vpack.c.bf16 %v614_v63, %v613_v40  ;;  %v615_v45 = vmul.f32 %v1068_v3, %v1426_v59 }
 0x169   :  { %v1072_v22 = vpop.eup %1071  ;;  %v860_v17 = vpack.c.bf16 %v630_v7, %v629_v0  ;;  %v631_v5 = vmul.f32 %v1070_v1, %v1430_v6 }
 0x16a   :  { %v1074_v18 = vpop.eup %1073  ;;  %735 = vst [vmem:[%s1499_s3 + $0x30] sm:$0xff] %v852_v16  ;;  %v616_v54 = vmul.f32 %v1072_v22, %v1435_v15 }
 0x16b   :  { %743 = vst [vmem:[%s1499_s3 + $0x70] sm:$0xff] %v860_v17  ;;  %v632_v58 = vmul.f32 %v1074_v18, %v1441_v8 }
 0x16c   :  { %v853_v52 = vpack.c.bf16 %v616_v54, %v615_v45 }
 0x16d   :  { %v861_v57 = vpack.c.bf16 %v632_v58, %v631_v5 }
 0x16e   :  { %736 = vst [vmem:[%s1499_s3 + $0x38] sm:$0xff] %v853_v52 }
 0x16f   :  { %744 = vst [vmem:[%s1499_s3 + $0x78] sm:$0xff] %v861_v57 }
 0x170   :  { %749 = vsyncpa [#allocation3], 1 }

// kernel: inception_1_forward.7
= control target key start
LH: loop header
LB: loop body
LE: loop exit
PB: predicated region body
PF: predicated region fallthrough
CT: control target
= control target key end

     0   :  { %v1861_v1 = vmov 0   ;;  %vm645_vm0 = vcmask 523264   ;;  %s2350_s0 = inlined_call_operand.vmem [shape: bf16[128,192], index: 0, kind: input, shape index: {}]   ;;  %s2351_s1 = inlined_call_operand.vmem [shape: bf16[192,128], index: 1, kind: input, shape index: {}]   ;;  %s2352_s2 = inlined_call_operand.vmem [shape: bf16[128,256], index: 2, kind: input, shape index: {}]   ;;  %s2353_s3 = inlined_call_operand.vmem [shape: bf16[128,128], index: 3, kind: input, shape index: {}]   ;;  %s2354_s4 = inlined_call_operand.vmem [shape: bf16[128,256], index: 4, kind: input, shape index: {}]   ;;  %s2355_s5 = inlined_call_operand.vmem [shape: bf16[128,128], index: 5, kind: input, shape index: {}]   ;;  %s2356_s6 = inlined_call_operand.vmem [shape: bf16[128,128], index: 6, kind: input, shape index: {}]   ;;  %s2357_s7 = inlined_call_operand.vmem [shape: bf16[128,128], index: 7, kind: input, shape index: {}]   ;;  %s2358_s8 = inlined_call_operand.vmem [shape: f32[1,128], index: 8, kind: input, shape index: {}]   ;;  %s2359_s9 = inlined_call_operand.hbm [shape: f32[128,128], index: 9, kind: output, shape index: {}]  }
   0x1   :  { %v1689_v0 = vld [vmem:[%s2353_s3] sm:$0xff]   ;;  %670 = vmatprep.subr.bf16.mxu1 %v1861_v1  ;;  %v1691_v3 = vld [vmem:[%s2353_s3 + $0x8] sm:$0xff]   ;;  %v1693_v5 = vld [vmem:[%s2353_s3 + $0x10] sm:$0xff]  }
   0x2   :  { %v1690_v2 = vld [vmem:[%s2351_s1] sm:$0xff]   ;;  %1573 = vmatprep.subr.bf16.mxu0 %v1689_v0  ;;  %v1692_v4 = vld [vmem:[%s2351_s1 + $0x8] sm:$0xff]   ;;  %v1694_v6 = vld [vmem:[%s2351_s1 + $0x10] sm:$0xff]  }
   0x3   :  { %671 = vmatpush1.bf16.msra.mxu1 %v1690_v2  ;;  %1574 = vmatpush3.bf16.msra.mxu0 %v1689_v0  ;;  %v1695_v7 = vld [vmem:[%s2353_s3 + $0x18] sm:$0xff]   ;;  %v1697_v9 = vld [vmem:[%s2353_s3 + $0x20] sm:$0xff]   ;;  %v1699_v11 = vld [vmem:[%s2353_s3 + $0x28] sm:$0xff]  }
   0x4   :  { %672 = vmatprep.subr.bf16.mxu1 %v1861_v1  ;;  %1575 = vmatprep.subr.bf16.mxu0 %v1691_v3  ;;  %v1696_v8 = vld [vmem:[%s2351_s1 + $0x18] sm:$0xff]   ;;  %v1698_v10 = vld [vmem:[%s2351_s1 + $0x20] sm:$0xff]   ;;  %v38_v13 = vld [vmem:[%s2352_s2 + $0x8] sm:$0xf] }
   0x5   :  { %v36_v12 = vld [vmem:[%s2352_s2] sm:$0xf]  ;;  %v40_v14 = vld [vmem:[%s2352_s2 + $0x10] sm:$0xf]  ;;  %39 = vst [vmem:[#allocation2 + $0x4] sm:$0xf] %v38_v13 }
   0x6   :  { %37 = vst [vmem:[#allocation2] sm:$0xf] %v36_v12  ;;  %41 = vst [vmem:[#allocation2 + $0x8] sm:$0xf] %v40_v14  ;;  %v42_v15 = vld [vmem:[%s2352_s2 + $0x18] sm:$0xf] }
   0x7   :  { %673 = vmatpush1.bf16.msra.mxu1 %v1692_v4  ;;  %1576 = vmatpush3.bf16.msra.mxu0 %v1691_v3  ;;  %43 = vst [vmem:[#allocation2 + $0xc] sm:$0xf] %v42_v15  ;;  %v1700_v16 = vld [vmem:[%s2351_s1 + $0x28] sm:$0xff]   ;;  %v1701_v17 = vld [vmem:[%s2353_s3 + $0x30] sm:$0xff]   ;;  %v44_v19 = vld [vmem:[%s2352_s2 + $0x20] sm:$0xf] }
   0x8   :  { %674 = vmatprep.subr.bf16.mxu1 %v1861_v1  ;;  %1577 = vmatprep.subr.bf16.mxu0 %v1693_v5  ;;  %v1702_v18 = vld [vmem:[%s2351_s1 + $0x30] sm:$0xff]   ;;  %v46_v20 = vld [vmem:[%s2352_s2 + $0x28] sm:$0xf]  ;;  %45 = vst [vmem:[#allocation2 + $0x10] sm:$0xf] %v44_v19  ;;  %v1703_v23 = vld [vmem:[%s2353_s3 + $0x38] sm:$0xff]  }
   0x9   :  { %47 = vst [vmem:[#allocation2 + $0x14] sm:$0xf] %v46_v20  ;;  %v48_v21 = vld [vmem:[%s2352_s2 + $0x30] sm:$0xf]  ;;  %v50_v22 = vld [vmem:[%s2352_s2 + $0x38] sm:$0xf] }
   0xa   :  { %49 = vst [vmem:[#allocation2 + $0x18] sm:$0xf] %v48_v21  ;;  %51 = vst [vmem:[#allocation2 + $0x1c] sm:$0xf] %v50_v22  ;;  %v1704_v25 = vld [vmem:[%s2351_s1 + $0x38] sm:$0xff]   ;;  %v1708_v26 = vld [vmem:[%s2355_s5] sm:$0xff]  }
   0xb   :  { %675 = vmatpush1.bf16.msra.mxu1 %v1694_v6  ;;  %1578 = vmatpush3.bf16.msra.mxu0 %v1693_v5  ;;  %v1707_v27 = vld [vmem:[%s2351_s1 + $0x40] sm:$0xff]   ;;  %v1710_v29 = vld [vmem:[%s2355_s5 + $0x8] sm:$0xff]   ;;  %v56_v34 = vld [vmem:[%s2352_s2 + $0x50] sm:$0xf] }
   0xc   :  { %676 = vmatprep.subr.bf16.mxu1 %v1861_v1  ;;  %1579 = vmatprep.subr.bf16.mxu0 %v1695_v7  ;;  %v1719_v31 = vld [vmem:[%s2350_s0 + $0x4] ss:$8 sps:$4 sm:$0xff]   ;;  %v52_v32 = vld [vmem:[%s2352_s2 + $0x40] sm:$0xf]  ;;  %v54_v33 = vld [vmem:[%s2352_s2 + $0x48] sm:$0xf] }
   0xd   :  { %v1705_v24 = vld [vmem:[#allocation2] sm:$0xff]   ;;  %1468 = vmatprep.mubr.msk.bf16.mxu1 %vm645_vm0, %v1719_v31  ;;  %53 = vst [vmem:[#allocation2 + $0x20] sm:$0xf] %v52_v32  ;;  %55 = vst [vmem:[#allocation2 + $0x24] sm:$0xf] %v54_v33  ;;  %v1709_v36 = vld [vmem:[%s2351_s1 + $0x48] sm:$0xff]  }
   0xe   :  { %1589 = vmatprep.mubr.bf16.mxu0 %v1705_v24  ;;  %v1706_v28 = vld [vmem:[#allocation2 + $0x8] sm:$0xff]   ;;  %57 = vst [vmem:[#allocation2 + $0x28] sm:$0xf] %v56_v34  ;;  %v58_v35 = vld [vmem:[%s2352_s2 + $0x58] sm:$0xf]  ;;  %v1714_v37 = vld [vmem:[%s2355_s5 + $0x10] sm:$0xff]  }
   0xf   :  { %677 = vmatpush1.bf16.msra.mxu1 %v1696_v8  ;;  %1580 = vmatpush3.bf16.msra.mxu0 %v1695_v7  ;;  %59 = vst [vmem:[#allocation2 + $0x2c] sm:$0xf] %v58_v35  ;;  %v60_v38 = vld [vmem:[%s2352_s2 + $0x60] sm:$0xf]  ;;  %v62_v39 = vld [vmem:[%s2352_s2 + $0x68] sm:$0xf] }
  0x10   :  { %678 = vmatprep.subr.bf16.mxu1 %v1861_v1  ;;  %1581 = vmatprep.subr.bf16.mxu0 %v1697_v9  ;;  %v1711_v30 = vld [vmem:[#allocation2 + $0x10] sm:$0xff]   ;;  %61 = vst [vmem:[#allocation2 + $0x30] sm:$0xf] %v60_v38  ;;  %63 = vst [vmem:[#allocation2 + $0x34] sm:$0xf] %v62_v39  ;;  %v1716_v44 = vld [vmem:[%s2355_s5 + $0x18] sm:$0xff]  }
  0x11   :  { %v1712_v40 = vld [vmem:[#allocation2 + $0x18] sm:$0xff]   ;;  %v64_v41 = vld [vmem:[%s2352_s2 + $0x70] sm:$0xf]  ;;  %v1717_v47 = vld [vmem:[%s2350_s0] ss:$8 sps:$4 sm:$0xff]  }
  0x12   :  { %v66_v42 = vld [vmem:[%s2352_s2 + $0x78] sm:$0xf]  ;;  %v1713_v43 = vld [vmem:[%s2351_s1 + $0x50] sm:$0xff]   ;;  %65 = vst [vmem:[#allocation2 + $0x38] sm:$0xf] %v64_v41  ;;  %v1722_v48 = vld [vmem:[%s2355_s5 + $0x20] sm:$0xff]  }
  0x13   :  { %679 = vmatpush1.bf16.msra.mxu1 %v1698_v10  ;;  %1582 = vmatpush3.bf16.msra.mxu0 %v1697_v9  ;;  %67 = vst [vmem:[#allocation2 + $0x3c] sm:$0xf] %v66_v42  ;;  %v1715_v46 = vld [vmem:[%s2351_s1 + $0x58] sm:$0xff]   ;;  %v2060_v49 = vld [vmem:[%s2357_s7] sm:$0xff]   ;;  %v1724_v51 = vld [vmem:[%s2355_s5 + $0x28] sm:$0xff]  }
  0x14   :  { %680 = vmatprep.subr.bf16.mxu1 %v1861_v1  ;;  %1583 = vmatprep.subr.bf16.mxu0 %v1699_v11  ;;  %v1720_v45 = vld [vmem:[#allocation2 + $0x20] sm:$0xff]   ;;  %v1725_v52 = vld [vmem:[%s2350_s0 + $0x14] ss:$8 sps:$4 sm:$0xff]   ;;  %v141_v54 = vld [vmem:[%s2354_s4 + $0x8] sm:$0xf] }
  0x15   :  { %v139_v53 = vld [vmem:[%s2354_s4] sm:$0xf]  ;;  %142 = vst [vmem:[#allocation3 + $0x4] sm:$0xf] %v141_v54  ;;  %v143_v55 = vld [vmem:[%s2354_s4 + $0x10] sm:$0xf] }
  0x16   :  { %v1721_v50 = vld [vmem:[#allocation2 + $0x28] sm:$0xff]   ;;  %140 = vst [vmem:[#allocation3] sm:$0xf] %v139_v53  ;;  %v145_v56 = vld [vmem:[%s2354_s4 + $0x18] sm:$0xf]  ;;  %v1730_v58 = vld [vmem:[%s2355_s5 + $0x30] sm:$0xff]  }
  0x17   :  { %681 = vmatpush1.bf16.msra.mxu1 %v1700_v16  ;;  %1584 = vmatpush3.bf16.msra.mxu0 %v1699_v11  ;;  %v1727_v57 = vld [vmem:[#allocation2 + $0x30] sm:$0xff]   ;;  %144 = vst [vmem:[#allocation3 + $0x8] sm:$0xf] %v143_v55  ;;  %146 = vst [vmem:[#allocation3 + $0xc] sm:$0xf] %v145_v56  ;;  %v2087_v59 = vld [vmem:[%s2357_s7 + $0x8] sm:$0xff]  }
  0x18   :  { %682 = vmatprep.subr.bf16.mxu1 %v1861_v1  ;;  %1585 = vmatprep.subr.bf16.mxu0 %v1701_v17  ;;  %v147_v60 = vld [vmem:[%s2354_s4 + $0x20] sm:$0xf]  ;;  %v149_v61 = vld [vmem:[%s2354_s4 + $0x28] sm:$0xf]  ;;  %v151_v62 = vld [vmem:[%s2354_s4 + $0x30] sm:$0xf] }
  0x19   :  { %148 = vst [vmem:[#allocation3 + $0x10] sm:$0xf] %v147_v60  ;;  %150 = vst [vmem:[#allocation3 + $0x14] sm:$0xf] %v149_v61  ;;  %v153_v63 = vld [vmem:[%s2354_s4 + $0x38] sm:$0xf] }
  0x1a   :  { %152 = vst [vmem:[#allocation3 + $0x18] sm:$0xf] %v151_v62  ;;  %v1728_v0 = vld [vmem:[%s2350_s0 + $0x10] ss:$8 sps:$4 sm:$0xff]   ;;  %154 = vst [vmem:[#allocation3 + $0x1c] sm:$0xf] %v153_v63 }
  0x1b   :  { %683 = vmatpush1.bf16.msra.mxu1 %v1702_v18  ;;  %1586 = vmatpush3.bf16.msra.mxu0 %v1701_v17  ;;  %v1732_v2 = vld [vmem:[%s2355_s5 + $0x38] sm:$0xff]   ;;  %v1738_v3 = vld [vmem:[%s2357_s7 + $0x10] sm:$0xff]   ;;  %v155_v4 = vld [vmem:[%s2354_s4 + $0x40] sm:$0xf] }
  0x1c   :  { %684 = vmatprep.subr.bf16.mxu1 %v1861_v1  ;;  %1587 = vmatprep.subr.bf16.mxu0 %v1703_v23  ;;  %v1733_v5 = vld [vmem:[%s2350_s0 + $0x24] ss:$8 sps:$4 sm:$0xff]   ;;  %156 = vst [vmem:[#allocation3 + $0x20] sm:$0xf] %v155_v4  ;;  %v157_v7 = vld [vmem:[%s2354_s4 + $0x48] sm:$0xf] }
  0x1d   :  { %v1736_v6 = vld [vmem:[#allocation3] sm:$0xff]   ;;  %v159_v8 = vld [vmem:[%s2354_s4 + $0x50] sm:$0xf]  ;;  %v161_v9 = vld [vmem:[%s2354_s4 + $0x58] sm:$0xf] }
  0x1e   :  { %158 = vst [vmem:[#allocation3 + $0x24] sm:$0xf] %v157_v7  ;;  %160 = vst [vmem:[#allocation3 + $0x28] sm:$0xf] %v159_v8  ;;  %v1735_v10 = vld [vmem:[%s2350_s0 + $0x20] ss:$8 sps:$4 sm:$0xff]  }
  0x1f   :  { %685 = vmatpush1.bf16.msra.mxu1 %v1704_v25  ;;  %1588 = vmatpush3.bf16.msra.mxu0 %v1703_v23  ;;  %162 = vst [vmem:[#allocation3 + $0x2c] sm:$0xf] %v161_v9  ;;  %v1744_v11 = vld [vmem:[%s2357_s7 + $0x18] sm:$0xff]   ;;  %v1737_v12 = vld [vmem:[#allocation3 + $0x8] sm:$0xff]   ;;  %v163_v15 = vld [vmem:[%s2354_s4 + $0x60] sm:$0xf] }
  0x20   :  { %686 = vmatprep.subr.bf16.mxu1 %v1861_v1  ;;  %1605 = vmatprep.subr.bf16.mxu0 %v1708_v26  ;;  %v1739_v13 = vld [vmem:[%s2350_s0 + $0x34] ss:$8 sps:$4 sm:$0xff]   ;;  %164 = vst [vmem:[#allocation3 + $0x30] sm:$0xf] %v163_v15  ;;  %v165_v16 = vld [vmem:[%s2354_s4 + $0x68] sm:$0xf] }
  0x21   :  { %v1742_v14 = vld [vmem:[#allocation3 + $0x10] sm:$0xff]   ;;  %v169_v18 = vld [vmem:[%s2354_s4 + $0x78] sm:$0xf]  ;;  %166 = vst [vmem:[#allocation3 + $0x34] sm:$0xf] %v165_v16  ;;  %v1750_v19 = vld [vmem:[%s2357_s7 + $0x20] sm:$0xff]  }
  0x22   :  { %1590 = vmatmul.mubr.bf16.vlgmr.msra.gmra.mrb[0].mxu0 %v1706_v28  ;;  %v167_v17 = vld [vmem:[%s2354_s4 + $0x70] sm:$0xf]  ;;  %170 = vst [vmem:[#allocation3 + $0x3c] sm:$0xf] %v169_v18  ;;  %v1745_v21 = vld [vmem:[%s2350_s0 + $0x44] ss:$8 sps:$4 sm:$0xff]  }
  0x23   :  { %687 = vmatpush1.bf16.msra.mxu1 %v1707_v27  ;;  %1606 = vmatpush3.bf16.msra.mxu0 %v1708_v26  ;;  %168 = vst [vmem:[#allocation3 + $0x38] sm:$0xf] %v167_v17  ;;  %v1741_v20 = vld [vmem:[%s2350_s0 + $0x30] ss:$8 sps:$4 sm:$0xff]   ;;  %v1751_v22 = vld [vmem:[%s2357_s7 + $0x28] sm:$0xff]  }
  0x24   :  { %688 = vmatprep.subr.bf16.mxu1 %v1861_v1  ;;  %1607 = vmatprep.subr.bf16.mxu0 %v1710_v29  ;;  %v1743_v23 = vld [vmem:[#allocation3 + $0x18] sm:$0xff]   ;;  %v1757_v25 = vld [vmem:[%s2357_s7 + $0x30] sm:$0xff]   ;;  %v1747_v26 = vld [vmem:[%s2350_s0 + $0x40] ss:$8 sps:$4 sm:$0xff]  }
  0x25   :  { %1593 = vmatprep.mubr.bf16.mxu0 %v1711_v30  ;;  %v1748_v24 = vld [vmem:[#allocation3 + $0x20] sm:$0xff]   ;;  %v1752_v28 = vld [vmem:[%s2350_s0 + $0x54] ss:$8 sps:$4 sm:$0xff]  }
  0x26   :  { %v1749_v27 = vld [vmem:[#allocation3 + $0x28] sm:$0xff]  }
  0x27   :  { %689 = vmatpush1.bf16.msra.mxu1 %v1709_v36  ;;  %1608 = vmatpush3.bf16.msra.mxu0 %v1710_v29 }
  0x28   :  { %690 = vmatprep.subr.bf16.mxu1 %v1861_v1  ;;  %1609 = vmatprep.subr.bf16.mxu0 %v1714_v37  ;;  %v1755_v29 = vld [vmem:[#allocation3 + $0x30] sm:$0xff]  }
  0x2a   :  { %1594 = vmatmul.mubr.bf16.gmra.mrb[4].mxu0 %v1712_v40 }
  0x2b   :  { %691 = vmatpush1.bf16.msra.mxu1 %v1713_v43  ;;  %1610 = vmatpush3.bf16.msra.mxu0 %v1714_v37 }
  0x2c   :  { %692 = vmatprep.subr.bf16.mxu1 %v1861_v1  ;;  %1611 = vmatprep.subr.bf16.mxu0 %v1716_v44  ;;  %v1729_v1 = vld [vmem:[#allocation2 + $0x38] sm:$0xff]  }
  0x2d   :  { %1597 = vmatprep.mubr.bf16.mxu0 %v1720_v45 }
  0x2f   :  { %693 = vmatpush1.bf16.msra.mxu1 %v1715_v46  ;;  %1612 = vmatpush3.bf16.msra.mxu0 %v1716_v44 }
  0x30   :  { %1613 = vmatprep.subr.bf16.mxu0 %v1722_v48  ;;  %1669 = vmatprep.subr.bf16.mxu1 %v2060_v49 }
  0x32   :  { %703 = vmatmul.mubr.bf16.vlgmr.msra.gmra.mrb[0].mxu1 %v1717_v47  ;;  %1598 = vmatmul.mubr.bf16.gmra.mrb[8].mxu0 %v1721_v50 }
  0x33   :  { %1614 = vmatpush3.bf16.msra.mxu0 %v1722_v48  ;;  %1677 = vmatpush3.bf16.msra.mxu1 %v2060_v49 }
  0x34   :  { %1615 = vmatprep.subr.bf16.mxu0 %v1724_v51  ;;  %1469 = vmatprep.mubr.msk.bf16.mxu1 %vm645_vm0, %v1725_v52 }
  0x35   :  { %1601 = vmatprep.mubr.bf16.mxu0 %v1727_v57  ;;  %1670 = vmatprep.subr.bf16.mxu1 %v2087_v59 }
  0x37   :  { %1616 = vmatpush3.bf16.msra.mxu0 %v1724_v51  ;;  %1678 = vmatpush3.bf16.msra.mxu1 %v2087_v59 }
  0x38   :  { %1617 = vmatprep.subr.bf16.mxu0 %v1730_v58  ;;  %1671 = vmatprep.subr.bf16.mxu1 %v1738_v3 }
  0x3a   :  { %711 = vmatmul.mubr.bf16.gmra.mrb[4].mxu1 %v1728_v0  ;;  %1602 = vmatmul.mubr.bf16.gmra.mrb[12].mxu0 %v1729_v1 }
  0x3b   :  { %1618 = vmatpush3.bf16.msra.mxu0 %v1730_v58  ;;  %1470 = vmatprep.mubr.msk.bf16.mxu1 %vm645_vm0, %v1733_v5 }
  0x3c   :  { %1619 = vmatprep.subr.bf16.mxu0 %v1732_v2  ;;  %1621 = vmatprep.mubr.bf16.mxu0 %v1736_v6 }
  0x3d   :  { %1679 = vmatpush3.bf16.msra.mxu1 %v1738_v3 }
  0x3e   :  { %1672 = vmatprep.subr.bf16.mxu1 %v1744_v11 }
  0x3f   :  { %1620 = vmatpush3.bf16.msra.mxu0 %v1732_v2 }
  0x40   :  { %1637 = vmatprep.subr.bf16.mxu0 %v2060_v49 }
  0x41   :  { %1680 = vmatpush3.bf16.msra.mxu1 %v1744_v11 }
  0x42   :  { %719 = vmatmul.mubr.bf16.gmra.mrb[8].mxu1 %v1735_v10  ;;  %1622 = vmatmul.mubr.bf16.vlgmr.msra.gmra.mrb[16].mxu0 %v1737_v12 }
  0x43   :  { %1638 = vmatpush3.bf16.msra.mxu0 %v2060_v49  ;;  %1471 = vmatprep.mubr.msk.bf16.mxu1 %vm645_vm0, %v1739_v13 }
  0x44   :  { %1639 = vmatprep.subr.bf16.mxu0 %v2087_v59  ;;  %1625 = vmatprep.mubr.bf16.mxu0 %v1742_v14 }
  0x45   :  { %1673 = vmatprep.subr.bf16.mxu1 %v1750_v19 }
  0x46   :  { %1681 = vmatpush3.bf16.msra.mxu1 %v1750_v19 }
  0x47   :  { %1640 = vmatpush3.bf16.msra.mxu0 %v2087_v59  ;;  %1674 = vmatprep.subr.bf16.mxu1 %v1751_v22 }
  0x48   :  { %1641 = vmatprep.subr.bf16.mxu0 %v1738_v3 }
  0x4a   :  { %727 = vmatmul.mubr.bf16.gmra.mrb[12].mxu1 %v1741_v20  ;;  %1626 = vmatmul.mubr.bf16.gmra.mrb[20].mxu0 %v1743_v23 }
  0x4b   :  { %1642 = vmatpush3.bf16.msra.mxu0 %v1738_v3  ;;  %1472 = vmatprep.mubr.msk.bf16.mxu1 %vm645_vm0, %v1745_v21 }
  0x4c   :  { %1643 = vmatprep.subr.bf16.mxu0 %v1744_v11  ;;  %1629 = vmatprep.mubr.bf16.mxu0 %v1748_v24 }
  0x4d   :  { %1682 = vmatpush3.bf16.msra.mxu1 %v1751_v22 }
  0x4e   :  { %1675 = vmatprep.subr.bf16.mxu1 %v1757_v25 }
  0x4f   :  { %1644 = vmatpush3.bf16.msra.mxu0 %v1744_v11 }
  0x50   :  { %1645 = vmatprep.subr.bf16.mxu0 %v1750_v19 }
  0x51   :  { %1683 = vmatpush3.bf16.msra.mxu1 %v1757_v25 }
  0x52   :  { %14 = vsyncpa [#allocation5], 0  ;;  %735 = vmatmul.mubr.bf16.gmra.mrb[16].mxu1 %v1747_v26  ;;  %1630 = vmatmul.mubr.bf16.gmra.mrb[24].mxu0 %v1749_v27  ;;  %v1758_v30 = vld [vmem:[%s2357_s7 + $0x38] sm:$0xff]   ;;  %v1759_v33 = vld [vmem:[%s2350_s0 + $0x64] ss:$8 sps:$4 sm:$0xff]  }
  0x53   :  { %1646 = vmatpush3.bf16.msra.mxu0 %v1750_v19  ;;  %1473 = vmatprep.mubr.msk.bf16.mxu1 %vm645_vm0, %v1752_v28  ;;  %v1754_v31 = vld [vmem:[%s2350_s0 + $0x50] ss:$8 sps:$4 sm:$0xff]   ;;  %v1762_v34 = vld [vmem:[%s2356_s6] sm:$0xff]   ;;  %v1763_v36 = vld [vmem:[%s2356_s6 + $0x8] sm:$0xff]  }
  0x54   :  { %1647 = vmatprep.subr.bf16.mxu0 %v1751_v22  ;;  %1633 = vmatprep.mubr.bf16.mxu0 %v1755_v29  ;;  %v1756_v32 = vld [vmem:[#allocation3 + $0x38] sm:$0xff]   ;;  %v1761_v35 = vld [vmem:[%s2350_s0 + $0x60] ss:$8 sps:$4 sm:$0xff]   ;;  %v1767_v38 = vld [vmem:[%s2356_s6 + $0x10] sm:$0xff]  }
  0x55   :  { %1676 = vmatprep.subr.bf16.mxu1 %v1758_v30  ;;  %v1764_v37 = vld [vmem:[%s2350_s0 + $0x74] ss:$8 sps:$4 sm:$0xff]   ;;  %v1766_v39 = vld [vmem:[%s2350_s0 + $0x70] ss:$8 sps:$4 sm:$0xff]   ;;  %v1770_v42 = vld [vmem:[%s2356_s6 + $0x20] sm:$0xff]  }
  0x56   :  { %1684 = vmatpush3.bf16.msra.mxu1 %v1758_v30  ;;  %v1768_v40 = vld [vmem:[%s2356_s6 + $0x18] sm:$0xff]   ;;  %v1769_v41 = vld [vmem:[%s2356_s6 + $0x30] sm:$0xff]   ;;  %v1772_v44 = vld [vmem:[%s2356_s6 + $0x28] sm:$0xff]  }
  0x57   :  { %1648 = vmatpush3.bf16.msra.mxu0 %v1751_v22  ;;  %v1771_v43 = vld [vmem:[%s2356_s6 + $0x38] sm:$0xff]  }
  0x58   :  { %1649 = vmatprep.subr.bf16.mxu0 %v1757_v25 }
  0x5a   :  { %743 = vmatmul.mubr.bf16.gmra.mrb[20].mxu1 %v1754_v31  ;;  %1634 = vmatmul.mubr.bf16.gmra.mrb[28].mxu0 %v1756_v32 }
  0x5b   :  { %1650 = vmatpush3.bf16.msra.mxu0 %v1757_v25  ;;  %1474 = vmatprep.mubr.msk.bf16.mxu1 %vm645_vm0, %v1759_v33 }
  0x5c   :  { %1651 = vmatprep.subr.bf16.mxu0 %v1758_v30  ;;  %1653 = vmatprep.mubr.bf16.mxu0 %v1762_v34 }
  0x5f   :  { %1652 = vmatpush3.bf16.msra.mxu0 %v1758_v30 }
  0x62   :  { %751 = vmatmul.mubr.bf16.gmra.mrb[24].mxu1 %v1761_v35  ;;  %1654 = vmatmul.mubr.bf16.vlgmr.msra.gmra.mrb[32].mxu0 %v1763_v36 }
  0x63   :  { %1475 = vmatprep.mubr.msk.bf16.mxu1 %vm645_vm0, %v1764_v37  ;;  %1657 = vmatprep.mubr.bf16.mxu0 %v1767_v38 }
  0x6a   :  { %759 = vmatmul.mubr.bf16.gmra.mrb[28].mxu1 %v1766_v39  ;;  %1658 = vmatmul.mubr.bf16.gmra.mrb[36].mxu0 %v1768_v40 }
  0x6b   :  { %1665 = vmatprep.mubr.bf16.mxu1 %v1769_v41  ;;  %1661 = vmatprep.mubr.bf16.mxu0 %v1770_v42 }
  0x72   :  { %1666 = vmatmul.mubr.bf16.vlgmr.msra.gmra.mrb[32].mxu1 %v1771_v43  ;;  %1662 = vmatmul.mubr.bf16.gmra.mrb[40].mxu0 %v1772_v44 }
  0xf5   :  { %v1591_v45 = vpop.f32.mrb[0].mxu0 }
  0xf6   :  { %v438_v46 = vpop.f32.mrb[1].mxu0 }
  0xf7   :  { %v1592_v47 = vpop.f32.mrb[2].mxu0 }
  0xf8   :  { %v441_v48 = vpop.f32.mrb[3].mxu0 }
  0xfd   :  { %v1595_v49 = vpop.f32.mrb[4].mxu0 }
  0xfe   :  { %v454_v50 = vpop.f32.mrb[5].mxu0 }
  0xff   :  { %v1596_v51 = vpop.f32.mrb[6].mxu0 }
 0x100   :  { %v457_v52 = vpop.f32.mrb[7].mxu0 }
 0x105   :  { %v704_v53 = vpop.f32.mrb[0].mxu1  ;;  %v1599_v54 = vpop.f32.mrb[8].mxu0 }
 0x106   :  { %v705_v55 = vadd.f32 %v704_v53, %v438_v46  ;;  %v706_v56 = vpop.f32.mrb[1].mxu1  ;;  %v470_v57 = vpop.f32.mrb[9].mxu0 }
 0x107   :  { %v707_v58 = vpop.f32.mrb[2].mxu1  ;;  %v1600_v59 = vpop.f32.mrb[10].mxu0 }
 0x108   :  { %v708_v60 = vadd.f32 %v707_v58, %v441_v48  ;;  %v709_v61 = vpop.f32.mrb[3].mxu1  ;;  %v473_v62 = vpop.f32.mrb[11].mxu0 }
 0x10d   :  { %v712_v63 = vpop.f32.mrb[4].mxu1  ;;  %v2223_v0 = vpop.f32.mrb[12].mxu0 }
 0x10e   :  { %v713_v1 = vadd.f32 %v1591_v45, %v712_v63  ;;  %v714_v2 = vpop.f32.mrb[5].mxu1  ;;  %v486_v3 = vpop.f32.mrb[13].mxu0 }
 0x10f   :  { %v715_v4 = vpop.f32.mrb[6].mxu1  ;;  %v2225_v5 = vpop.f32.mrb[14].mxu0  ;;  %v2244_v2 = vld [vmem:[%s2358_s8] ss:$0 sm:$0xff]  ;;  %s1862_s8 = smov [#allocation4]  }
 0x110   :  { %v716_v6 = vadd.f32 %v1592_v47, %v715_v4  ;;  %v717_v7 = vpop.f32.mrb[7].mxu1  ;;  %v2227_v8 = vpop.f32.mrb[15].mxu0  ;;  %s1405_s25 = sshll.u32 %s1862_s8, 4  ;;  %s1406_s25 = int_to_ptr.vmem [resolvable:$true] %s1405_s25 }
 0x111   :  { %s1837_s26 = scalar_lea.vmem %s1406_s25, 2048  ;;  %p1842_p1 = scmp.lt.s32.totalorder %s1406_s25, %s1406_s25 }
 0x112   :  { %p1838_p0 = scmp.ne.s32.totalorder %s1406_s25, %s1837_s26  ;;  %p1843_p2 = scmp.lt.s32.totalorder %s1837_s26, %s1837_s26 }
 0x114   :  { %p1844_p3 = por %p1843_p2, %p1842_p1 }
 0x115   :  { %v720_v9 = vpop.f32.mrb[8].mxu1  ;;  %v1623_v10 = vpop.f32.mrb[16].mxu0 }
 0x116   :  { %v721_v11 = vadd.f32 %v720_v9, %v454_v50  ;;  %v722_v12 = vpop.f32.mrb[9].mxu1  ;;  %v994_v13 = vadd.f32 %v1623_v10, %v713_v1  ;;  %v929_v14 = vpop.f32.mrb[17].mxu0  ;;  %p1845_p4 = pnand %p1844_p3, %p1838_p0 }
 0x117   :  { %v723_v15 = vpop.f32.mrb[10].mxu1  ;;  %v992_v16 = vadd.f32 %v929_v14, %v705_v55  ;;  %v1624_v17 = vpop.f32.mrb[18].mxu0 }
 0x118   :  { %v724_v18 = vadd.f32 %v723_v15, %v457_v52  ;;  %v725_v19 = vpop.f32.mrb[11].mxu1  ;;  %v995_v20 = vadd.f32 %v1624_v17, %v716_v6  ;;  %v932_v21 = vpop.f32.mrb[19].mxu0 }
 0x119   :  { %v993_v22 = vadd.f32 %v932_v21, %v708_v60 }
 0x11d   :  { %v728_v23 = vpop.f32.mrb[12].mxu1  ;;  %v1627_v24 = vpop.f32.mrb[20].mxu0 }
 0x11e   :  { %v729_v25 = vadd.f32 %v1595_v49, %v728_v23  ;;  %v730_v26 = vpop.f32.mrb[13].mxu1  ;;  %v945_v27 = vpop.f32.mrb[21].mxu0 }
 0x11f   :  { %v731_v28 = vpop.f32.mrb[14].mxu1  ;;  %v2229_v29 = vadd.f32 %v945_v27, %v721_v11  ;;  %v1628_v30 = vpop.f32.mrb[22].mxu0 }
 0x120   :  { %v998_v31 = vadd.f32 %v1627_v24, %v729_v25  ;;  %v732_v32 = vadd.f32 %v1596_v51, %v731_v28  ;;  %v733_v33 = vpop.f32.mrb[15].mxu1  ;;  %v948_v34 = vpop.f32.mrb[23].mxu0 }
 0x121   :  { %v2231_v35 = vadd.f32 %v948_v34, %v724_v18 }
 0x122   :  { %v2233_v36 = vadd.f32 %v1628_v30, %v732_v32 }
 0x125   :  { %v736_v37 = vpop.f32.mrb[16].mxu1  ;;  %v1631_v38 = vpop.f32.mrb[24].mxu0 }
 0x126   :  { %v737_v39 = vadd.f32 %v736_v37, %v470_v57  ;;  %v738_v40 = vpop.f32.mrb[17].mxu1  ;;  %v961_v41 = vpop.f32.mrb[25].mxu0 }
 0x127   :  { %v739_v42 = vpop.f32.mrb[18].mxu1  ;;  %v1632_v43 = vpop.f32.mrb[26].mxu0 }
 0x128   :  { %v740_v44 = vadd.f32 %v739_v42, %v473_v62  ;;  %v2235_v45 = vadd.f32 %v961_v41, %v737_v39  ;;  %v741_v46 = vpop.f32.mrb[19].mxu1  ;;  %v964_v47 = vpop.f32.mrb[27].mxu0 }
 0x12a   :  { %v2237_v48 = vadd.f32 %v964_v47, %v740_v44 }
 0x12d   :  { %v744_v49 = vpop.f32.mrb[20].mxu1  ;;  %v1635_v50 = vpop.f32.mrb[28].mxu0 }
 0x12e   :  { %v745_v51 = vadd.f32 %v1599_v54, %v744_v49  ;;  %v746_v52 = vpop.f32.mrb[21].mxu1  ;;  %v977_v53 = vpop.f32.mrb[29].mxu0 }
 0x12f   :  { %v747_v55 = vpop.f32.mrb[22].mxu1  ;;  %v1636_v56 = vpop.f32.mrb[30].mxu0 }
 0x130   :  { %v748_v58 = vadd.f32 %v1600_v59, %v747_v55  ;;  %v749_v57 = vpop.f32.mrb[23].mxu1  ;;  %v980_v60 = vpop.f32.mrb[31].mxu0  ;;  %v1002_v61 = vadd.f32 %v1631_v38, %v745_v51 }
 0x132   :  { %v2239_v63 = vadd.f32 %v1632_v43, %v748_v58 }
 0x135   :  { %v752_v62 = vpop.f32.mrb[24].mxu1  ;;  %v1655_v1 = vpop.f32.mrb[32].mxu0 }
 0x136   :  { %v753_v4 = vadd.f32 %v752_v62, %v486_v3  ;;  %v754_v6 = vpop.f32.mrb[25].mxu1  ;;  %v1235_v54 = vadd.f32 %v1655_v1, %v994_v13  ;;  %v1170_v7 = vpop.f32.mrb[33].mxu0 }
 0x137   :  { %v755_v9 = vpop.f32.mrb[26].mxu1  ;;  %v1233_v10 = vadd.f32 %v1170_v7, %v992_v16  ;;  %v1656_v11 = vpop.f32.mrb[34].mxu0 }
 0x138   :  { %v2247_v59 = vadd.f32 %v2244_v2, %v1235_v54  ;;  %v756_v12 = vadd.f32 %v755_v9, %v2227_v8  ;;  %v757_v14 = vpop.f32.mrb[27].mxu1  ;;  %v1236_v15 = vadd.f32 %v1656_v11, %v995_v20  ;;  %v1173_v17 = vpop.f32.mrb[35].mxu0  ;;  %v1004_v18 = vadd.f32 %v977_v53, %v753_v4 }
 0x139   :  { %v2251_v19 = vadd.f32 %v2244_v2, %v1233_v10  ;;  %v1234_v21 = vadd.f32 %v1173_v17, %v993_v22 }
 0x13a   :  { %v1511_v3 = vmul.f32 -1.442695, %v2247_v59  ;;  %v2255_v13 = vadd.f32 %v2244_v2, %v1236_v15  ;;  %v2257_v16 = vadd.f32 %v980_v60, %v756_v12 }
 0x13b   :  { %v1509_v23 = vmul.f32 -1.442695, %v2251_v19  ;;  %v2261_v24 = vadd.f32 %v2244_v2, %v1234_v21 }
 0x13c   :  { %1773 = vpow2.f32 %v1511_v3  ;;  %v1512_v8 = vmul.f32 -1.442695, %v2255_v13 }
 0x13d   :  { %1775 = vpow2.f32 %v1509_v23  ;;  %v1510_v20 = vmul.f32 -1.442695, %v2261_v24  ;;  %v760_v25 = vpop.f32.mrb[28].mxu1  ;;  %v1659_v22 = vpop.f32.mrb[36].mxu0 }
 0x13e   :  { %1777 = vpow2.f32 %v1512_v8  ;;  %v761_v26 = vadd.f32 %v2223_v0, %v760_v25  ;;  %v762_v27 = vpop.f32.mrb[29].mxu1  ;;  %v1239_v28 = vadd.f32 %v1659_v22, %v998_v31  ;;  %v1186_v30 = vpop.f32.mrb[37].mxu0 }
 0x13f   :  { %1779 = vpow2.f32 %v1510_v20  ;;  %v763_v32 = vpop.f32.mrb[30].mxu1  ;;  %v1237_v33 = vadd.f32 %v1186_v30, %v2229_v29  ;;  %v1660_v34 = vpop.f32.mrb[38].mxu0 }
 0x140   :  { %v2268_v37 = vadd.f32 %v2244_v2, %v1239_v28  ;;  %v764_v38 = vadd.f32 %v2225_v5, %v763_v32  ;;  %v765_v39 = vpop.f32.mrb[31].mxu1  ;;  %v1240_v40 = vadd.f32 %v1660_v34, %v2233_v36  ;;  %v1189_v41 = vpop.f32.mrb[39].mxu0  ;;  %v1006_v42 = vadd.f32 %v1635_v50, %v761_v26 }
 0x141   :  { %v2273_v0 = vadd.f32 %v2244_v2, %v1237_v33  ;;  %v1238_v31 = vadd.f32 %v1189_v41, %v2231_v35 }
 0x142   :  { %v1515_v43 = vmul.f32 -1.442695, %v2268_v37  ;;  %v2278_v29 = vadd.f32 %v2244_v2, %v1240_v40  ;;  %v1007_v44 = vadd.f32 %v1636_v56, %v764_v38 }
 0x143   :  { %v1513_v46 = vmul.f32 -1.442695, %v2273_v0  ;;  %v2282_v5 = vadd.f32 %v2244_v2, %v1238_v31 }
 0x144   :  { %1781 = vpow2.f32 %v1515_v43  ;;  %v1516_v36 = vmul.f32 -1.442695, %v2278_v29 }
 0x145   :  { %1783 = vpow2.f32 %v1513_v46  ;;  %v1514_v47 = vmul.f32 -1.442695, %v2282_v5  ;;  %v1667_v49 = vpop.f32.mrb[32].mxu1  ;;  %v1663_v50 = vpop.f32.mrb[40].mxu0 }
 0x146   :  { %v1774_v35 = vpop.eup %1773  ;;  %1785 = vpow2.f32 %v1516_v36  ;;  %v1247_v51 = vadd.f32 %v1667_v49, %v1006_v42  ;;  %v1243_v52 = vadd.f32 %v1663_v50, %v1002_v61  ;;  %v1218_v53 = vpop.f32.mrb[33].mxu1 }
 0x147   :  { %v1202_v55 = vpop.f32.mrb[41].mxu0  ;;  %v1776_v56 = vpop.eup %1775  ;;  %v1322_v58 = vadd.f32 1.0, %v1774_v35  ;;  %1787 = vpow2.f32 %v1514_v47  ;;  %v1245_v57 = vadd.f32 %v1218_v53, %v1004_v18 }
 0x148   :  { %v1241_v60 = vadd.f32 %v1202_v55, %v2235_v45  ;;  %v1668_v62 = vpop.f32.mrb[34].mxu1  ;;  %v1664_v1 = vpop.f32.mrb[42].mxu0  ;;  %v1320_v6 = vadd.f32 1.0, %v1776_v56  ;;  %v2288_v54 = vadd.f32 %v2244_v2, %v1247_v51  ;;  %v2291_v7 = vadd.f32 %v2244_v2, %v1243_v52 }
 0x149   :  { %v1778_v4 = vpop.eup %1777  ;;  %v1248_v9 = vadd.f32 %v1668_v62, %v1007_v44  ;;  %v1221_v61 = vpop.f32.mrb[35].mxu1  ;;  %1789 = vrcp.f32 %v1322_v58  ;;  %v2294_v14 = vadd.f32 %v2244_v2, %v1245_v57  ;;  %v1244_v23 = vadd.f32 %v1664_v1, %v2239_v63 }
 0x14a   :  { %v1205_v10 = vpop.f32.mrb[43].mxu0  ;;  %v1780_v11 = vpop.eup %1779  ;;  %v1323_v12 = vadd.f32 1.0, %v1778_v4  ;;  %v2297_v45 = vadd.f32 %v2244_v2, %v1241_v60  ;;  %1791 = vrcp.f32 %v1320_v6  ;;  %v1523_v17 = vmul.f32 -1.442695, %v2288_v54 }
 0x14b   :  { %v1321_v15 = vadd.f32 1.0, %v1780_v11  ;;  %v1519_v18 = vmul.f32 -1.442695, %v2291_v7  ;;  %v1521_v21 = vmul.f32 -1.442695, %v2294_v14  ;;  %v1246_v8 = vadd.f32 %v1221_v61, %v2257_v16 }
 0x14c   :  { %1793 = vrcp.f32 %v1323_v12  ;;  %v1517_v3 = vmul.f32 -1.442695, %v2297_v45  ;;  %v1242_v20 = vadd.f32 %v1205_v10, %v2237_v48  ;;  %v2307_v25 = vadd.f32 %v2244_v2, %v1248_v9 }
 0x14d   :  { %1795 = vrcp.f32 %v1321_v15  ;;  %v2310_v26 = vadd.f32 %v2244_v2, %v1244_v23  ;;  %v2313_v30 = vadd.f32 %v2244_v2, %v1246_v8 }
 0x14e   :  { %1797 = vpow2.f32 %v1523_v17  ;;  %v1782_v22 = vpop.eup %1781  ;;  %v2316_v48 = vadd.f32 %v2244_v2, %v1242_v20  ;;  %v1524_v34 = vmul.f32 -1.442695, %v2307_v25 }
 0x14f   :  { %1799 = vpow2.f32 %v1519_v18  ;;  %v1784_v27 = vpop.eup %1783  ;;  %v1326_v28 = vadd.f32 1.0, %v1782_v22  ;;  %v1520_v39 = vmul.f32 -1.442695, %v2310_v26  ;;  %v1522_v41 = vmul.f32 -1.442695, %v2313_v30 }
 0x150   :  { %1801 = vpow2.f32 %v1521_v21  ;;  %v1786_v63 = vpop.eup %1785  ;;  %v1324_v32 = vadd.f32 1.0, %v1784_v27  ;;  %v1518_v2 = vmul.f32 -1.442695, %v2316_v48 }
 0x151   :  { %1803 = vpow2.f32 %v1517_v3  ;;  %v1788_v16 = vpop.eup %1787  ;;  %v1327_v33 = vadd.f32 1.0, %v1786_v63 }
 0x152   :  { %1805 = vrcp.f32 %v1326_v28  ;;  %v1325_v38 = vadd.f32 1.0, %v1788_v16 }
 0x153   :  { %1807 = vrcp.f32 %v1324_v32  ;;  %v1790_v40 = vpop.eup %1789 }
 0x154   :  { %1809 = vrcp.f32 %v1327_v33  ;;  %v1792_v42 = vpop.eup %1791  ;;  %v1370_v31 = vmul.f32 %v1790_v40, %v2247_v59 }
 0x155   :  { %1811 = vrcp.f32 %v1325_v38  ;;  %v1368_v44 = vmul.f32 %v1792_v42, %v2251_v19 }
 0x156   :  { %v1794_v43 = vpop.eup %1793  ;;  %1813 = vpow2.f32 %v1524_v34  ;;  %1386 = vst [vmem:[#allocation4 + $0x10] sm:$0xff] %v1370_v31 }
 0x157   :  { %v1796_v46 = vpop.eup %1795  ;;  %v1371_v36 = vmul.f32 %v1794_v43, %v2255_v13  ;;  %1815 = vpow2.f32 %v1520_v39  ;;  %1384 = vst [vmem:[#allocation4] sm:$0xff] %v1368_v44 }
 0x158   :  { %v1798_v47 = vpop.eup %1797  ;;  %v1369_v49 = vmul.f32 %v1796_v46, %v2261_v24  ;;  %1817 = vpow2.f32 %v1522_v41 }
 0x159   :  { %v1800_v50 = vpop.eup %1799  ;;  %1387 = vst [vmem:[#allocation4 + $0x18] sm:$0xff] %v1371_v36  ;;  %v1334_v59 = vadd.f32 1.0, %v1798_v47  ;;  %1819 = vpow2.f32 %v1518_v2 }
 0x15a   :  { %v1802_v35 = vpop.eup %1801  ;;  %1385 = vst [vmem:[#allocation4 + $0x8] sm:$0xff] %v1369_v49  ;;  %v1330_v51 = vadd.f32 1.0, %v1800_v50 }
 0x15b   :  { %v1804_v52 = vpop.eup %1803  ;;  %1821 = vrcp.f32 %v1334_v59  ;;  %v1332_v19 = vadd.f32 1.0, %v1802_v35 }
 0x15c   :  { %v1806_v53 = vpop.eup %1805  ;;  %1823 = vrcp.f32 %v1330_v51  ;;  %v1328_v55 = vadd.f32 1.0, %v1804_v52 }
 0x15d   :  { %v1808_v13 = vpop.eup %1807  ;;  %v1374_v56 = vmul.f32 %v1806_v53, %v2268_v37  ;;  %1825 = vrcp.f32 %v1332_v19 }
 0x15e   :  { %v1810_v58 = vpop.eup %1809  ;;  %v1372_v24 = vmul.f32 %v1808_v13, %v2273_v0  ;;  %1827 = vrcp.f32 %v1328_v55 }
 0x15f   :  { %v1812_v57 = vpop.eup %1811  ;;  %1390 = vst [vmem:[#allocation4 + $0x30] sm:$0xff] %v1374_v56  ;;  %v1375_v60 = vmul.f32 %v1810_v58, %v2278_v29 }
 0x160   :  { %v1814_v62 = vpop.eup %1813  ;;  %1388 = vst [vmem:[#allocation4 + $0x20] sm:$0xff] %v1372_v24  ;;  %v1373_v1 = vmul.f32 %v1812_v57, %v2282_v5 }
 0x161   :  { %v1816_v4 = vpop.eup %1815  ;;  %1391 = vst [vmem:[#allocation4 + $0x38] sm:$0xff] %v1375_v60  ;;  %v1335_v6 = vadd.f32 1.0, %v1814_v62 }
 0x162   :  { %v1818_v9 = vpop.eup %1817  ;;  %1389 = vst [vmem:[#allocation4 + $0x28] sm:$0xff] %v1373_v1  ;;  %v1331_v61 = vadd.f32 1.0, %v1816_v4 }
 0x163   :  { %v1820_v37 = vpop.eup %1819  ;;  %1829 = vrcp.f32 %v1335_v6  ;;  %v1333_v10 = vadd.f32 1.0, %v1818_v9 }
 0x164   :  { %1831 = vrcp.f32 %v1331_v61  ;;  %v1329_v0 = vadd.f32 1.0, %v1820_v37 }
 0x165   :  { %v1822_v11 = vpop.eup %1821  ;;  %1833 = vrcp.f32 %v1333_v10 }
 0x166   :  { %v1824_v12 = vpop.eup %1823  ;;  %v1382_v29 = vmul.f32 %v1822_v11, %v2288_v54  ;;  %1835 = vrcp.f32 %v1329_v0 }
 0x167   :  { %v1826_v15 = vpop.eup %1825  ;;  %v1378_v5 = vmul.f32 %v1824_v12, %v2291_v7 }
 0x168   :  { %v1828_v17 = vpop.eup %1827  ;;  %1398 = vst [vmem:[#allocation4 + $0x70] sm:$0xff] %v1382_v29  ;;  %v1380_v18 = vmul.f32 %v1826_v15, %v2294_v14 }
 0x169   :  { %1394 = vst [vmem:[#allocation4 + $0x50] sm:$0xff] %v1378_v5  ;;  %v1376_v21 = vmul.f32 %v1828_v17, %v2297_v45 }
 0x16a   :  { %1396 = vst [vmem:[#allocation4 + $0x60] sm:$0xff] %v1380_v18 }
 0x16b   :  { %1392 = vst [vmem:[#allocation4 + $0x40] sm:$0xff] %v1376_v21 }
 0x16d   :  { %v1830_v3 = vpop.eup %1829 }
 0x16e   :  { %v1832_v23 = vpop.eup %1831  ;;  %v1383_v8 = vmul.f32 %v1830_v3, %v2307_v25 }
 0x16f   :  { %v1834_v54 = vpop.eup %1833  ;;  %v1379_v20 = vmul.f32 %v1832_v23, %v2310_v26 }
 0x170   :  { %v1836_v22 = vpop.eup %1835  ;;  %1399 = vst [vmem:[#allocation4 + $0x78] sm:$0xff] %v1383_v8  ;;  %v1381_v7 = vmul.f32 %v1834_v54, %v2313_v30 }
 0x171   :  { %1395 = vst [vmem:[#allocation4 + $0x58] sm:$0xff] %v1379_v20  ;;  %v1377_v14 = vmul.f32 %v1836_v22, %v2316_v48 }
 0x172   :  { %1397 = vst [vmem:[#allocation4 + $0x68] sm:$0xff] %v1381_v7 }
 0x173   :  { %1393 = vst [vmem:[#allocation4 + $0x48] sm:$0xff] %v1377_v14 }
 0x174   :  { %1848 = shalt.err (!%p1845_p4)
}
 0x175   :  { %s1849_s29 = scalar_lea.hbm %s2359_s9, 2048 }
 0x176   :  { %p1850_p5 = scmp.ne.s32.totalorder %s2359_s9, %s1849_s29  ;;  %p1853_p6 = scmp.lt.u32.totalorder %s1849_s29, %s2359_s9 }
 0x178   :  { %p1855_p7 = pnand %p1853_p6, %p1850_p5 }
 0x17a   :  { %1858 = shalt.err (!%p1855_p7)
}
 0x17b   :  { %s1863_s11 = smov 128   ;;  %s1864_s12 = smov 8  }
 0x17c   :  { %1411 = dma.vmem_to_hbm [thread:$0]  %s1406_s25, 2048, %s2359_s9, [#allocation5], %s1863_s11, %s1863_s11, %s1864_s12  }
 0x17d   :  { %1859 = dma.done.wait [#allocation5], 2048  }
 0x17e   :  { %1860 = vsyncadd [#allocation5], 4294965248 }
 0x17f   :  { %1415 = vsyncpa [#allocation5], 1 }

// kernel: inception_1_forward.6
= control target key start
LH: loop header
LB: loop body
LE: loop exit
PB: predicated region body
PF: predicated region fallthrough
CT: control target
= control target key end

     0   :  { %vm604_vm0 = vcmask 1046528   ;;  %vm1200_vm1 = vcmask 1045504   ;;  %s4549_s1 = inlined_call_operand.vmem [shape: bf16[3,3,128,128], index: 1, kind: input, shape index: {}]   ;;  %s4550_s0 = inlined_call_operand.vmem [shape: bf16[192,128], index: 0, kind: input, shape index: {}]   ;;  %s4551_s2 = inlined_call_operand.vmem [shape: f32[1,128], index: 2, kind: input, shape index: {}]   ;;  %s4552_s3 = inlined_call_operand.vmem [shape: bf16[128,128], index: 3, kind: output, shape index: {}]  }
   0x1   :  { %v3245_v0 = vld [vmem:[%s4549_s1 + $0xc0] sm:$0xff]   ;;  %v3247_v2 = vld [vmem:[%s4549_s1 + $0xc8] sm:$0xff]   ;;  %v3249_v4 = vld [vmem:[%s4549_s1 + $0xd0] sm:$0xff]  }
   0x2   :  { %v3246_v1 = vld [vmem:[%s4549_s1] sm:$0xff]   ;;  %2844 = vmatprep.subr.bf16.mxu1 %v3245_v0  ;;  %v3248_v3 = vld [vmem:[%s4549_s1 + $0x8] sm:$0xff]   ;;  %v3250_v5 = vld [vmem:[%s4549_s1 + $0x10] sm:$0xff]  }
   0x3   :  { %2876 = vmatprep.subr.bf16.mxu0 %v3246_v1  ;;  %2845 = vmatpush3.bf16.msra.mxu1 %v3245_v0  ;;  %v3251_v6 = vld [vmem:[%s4549_s1 + $0xd8] sm:$0xff]   ;;  %v3253_v8 = vld [vmem:[%s4549_s1 + $0xe0] sm:$0xff]   ;;  %v3255_v10 = vld [vmem:[%s4549_s1 + $0xe8] sm:$0xff]  }
   0x4   :  { %2877 = vmatpush3.bf16.msra.mxu0 %v3246_v1  ;;  %2846 = vmatprep.subr.bf16.mxu1 %v3247_v2  ;;  %v3252_v7 = vld [vmem:[%s4549_s1 + $0x18] sm:$0xff]   ;;  %v3254_v9 = vld [vmem:[%s4549_s1 + $0x20] sm:$0xff]   ;;  %v3461_v12 = vld [vmem:[%s4550_s0 + $0x8] sm:$0xf] }
   0x5   :  { %2878 = vmatprep.subr.bf16.mxu0 %v3248_v3  ;;  %v3456_v11 = vld [vmem:[%s4550_s0 + $0x4] sm:$0xf]  ;;  %v3466_v13 = vld [vmem:[%s4550_s0] sm:$0xf]  ;;  %v3256_v14 = vld [vmem:[%s4549_s1 + $0x28] sm:$0xff]   ;;  %v39_v50 = vunpack.c.l.bf16 %v3461_v12 }
   0x6   :  { %v2378_v15 = vcombine.low %v3456_v11, %v3461_v12  ;;  %v2354_v16 = vcombine.low %v3466_v13, %v3456_v11  ;;  %v3257_v17 = vld [vmem:[%s4549_s1 + $0xf0] sm:$0xff]   ;;  %v3259_v19 = vld [vmem:[%s4549_s1 + $0xf8] sm:$0xff]   ;;  %v3490_v21 = vld [vmem:[%s4550_s0 + $0xc] sm:$0xf]  ;;  %v38_v47 = vunpack.c.l.bf16 %v3456_v11 }
   0x7   :  { %2847 = vmatpush3.bf16.msra.mxu1 %v3247_v2  ;;  %v3258_v18 = vld [vmem:[%s4549_s1 + $0x30] sm:$0xff]   ;;  %v3260_v20 = vld [vmem:[%s4549_s1 + $0x38] sm:$0xff]   ;;  %v3266_v23 = vld [vmem:[%s4549_s1 + $0x100] sm:$0xff]   ;;  %v3517_v28 = vcombine.low %v3461_v12, %v3490_v21  ;;  %v40_v52 = vunpack.c.l.bf16 %v3490_v21  ;;  %v608_v58 = vrot.slane %v39_v50, 1 }
   0x8   :  { %2879 = vmatpush3.bf16.msra.mxu0 %v3248_v3  ;;  %2848 = vmatprep.subr.bf16.mxu1 %v3249_v4  ;;  %v3495_v22 = vld [vmem:[%s4550_s0 + $0x10] sm:$0xf]  ;;  %v3265_v24 = vld [vmem:[%s4549_s1 + $0x180] sm:$0xff]   ;;  %v3506_v25 = vld [vmem:[%s4550_s0 + $0x14] sm:$0xf]  ;;  %v3614_v56 = vrot.slane %v38_v47, 1 }
   0x9   :  { %2880 = vmatprep.subr.bf16.mxu0 %v3250_v5  ;;  %2860 = vmatprep.mubr.bf16.mxu1 %v2378_v15  ;;  %v2379_v26 = vcombine.low %v3490_v21, %v3495_v22  ;;  %v3513_v27 = vld [vmem:[%s4550_s0 + $0x18] sm:$0xf]  ;;  %v3268_v29 = vld [vmem:[%s4549_s1 + $0x108] sm:$0xff]   ;;  %v3529_v32 = vcombine.low %v3495_v22, %v3506_v25  ;;  %v3534_v33 = vld [vmem:[%s4550_s0 + $0x1c] sm:$0xf]  ;;  %v610_v62 = vrot.slane %v40_v52, 1  ;;  %v41_v63 = vunpack.c.l.bf16 %v3495_v22 }
   0xa   :  { %2892 = vmatprep.mubr.bf16.mxu0 %v2354_v16  ;;  %v3267_v30 = vld [vmem:[%s4549_s1 + $0x188] sm:$0xff]   ;;  %v2380_v31 = vcombine.low %v3506_v25, %v3513_v27  ;;  %v3540_v34 = vld [vmem:[%s4550_s0 + $0x20] sm:$0xf]  ;;  %v3273_v35 = vld [vmem:[%s4549_s1 + $0x190] sm:$0xff]   ;;  %v3563_v40 = vcombine.low %v3513_v27, %v3534_v33  ;;  %v4562_v2 = vunpack.c.l.bf16 %v3506_v25 }
   0xb   :  { %2849 = vmatpush3.bf16.msra.mxu1 %v3249_v4  ;;  %v3274_v36 = vld [vmem:[%s4549_s1 + $0x110] sm:$0xff]   ;;  %v2381_v38 = vcombine.low %v3534_v33, %v3540_v34  ;;  %v3559_v39 = vld [vmem:[%s4550_s0 + $0x38] sm:$0xf]  ;;  %v3583_v46 = vld [vmem:[%s4550_s0 + $0x3c] sm:$0xf] }
   0xc   :  { %2881 = vmatpush3.bf16.msra.mxu0 %v3250_v5  ;;  %2850 = vmatprep.subr.bf16.mxu1 %v3251_v6  ;;  %v3551_v37 = vld [vmem:[%s4550_s0 + $0x34] sm:$0xf]  ;;  %v3568_v41 = vld [vmem:[%s4550_s0 + $0x30] sm:$0xf]  ;;  %v3276_v42 = vld [vmem:[%s4549_s1 + $0x118] sm:$0xff]   ;;  %v3618_v57 = vcombine.low %v3559_v39, %v3583_v46 }
   0xd   :  { %2882 = vmatprep.subr.bf16.mxu0 %v3252_v7  ;;  %v3275_v43 = vld [vmem:[%s4549_s1 + $0x198] sm:$0xff]   ;;  %v2382_v44 = vcombine.low %v3551_v37, %v3559_v39  ;;  %v2358_v45 = vcombine.low %v3568_v41, %v3551_v37  ;;  %v3590_v48 = vld [vmem:[%s4550_s0 + $0x40] sm:$0xf]  ;;  %v3603_v53 = vld [vmem:[%s4550_s0 + $0x44] sm:$0xf] }
   0xe   :  { %v3281_v49 = vld [vmem:[%s4549_s1 + $0x1a0] sm:$0xff]   ;;  %v2383_v54 = vcombine.low %v3583_v46, %v3590_v48  ;;  %v3610_v55 = vld [vmem:[%s4550_s0 + $0x48] sm:$0xf]  ;;  %v3635_v0 = vcombine.low %v3590_v48, %v3603_v53  ;;  %v3640_v1 = vld [vmem:[%s4550_s0 + $0x4c] sm:$0xf] }
   0xf   :  { %2851 = vmatpush3.bf16.msra.mxu1 %v3251_v6  ;;  %v3282_v51 = vld [vmem:[%s4549_s1 + $0x120] sm:$0xff]   ;;  %v3284_v59 = vld [vmem:[%s4549_s1 + $0x128] sm:$0xff]   ;;  %v2384_v61 = vcombine.low %v3603_v53, %v3610_v55  ;;  %v3647_v3 = vld [vmem:[%s4550_s0 + $0x50] sm:$0xf]  ;;  %v612_v6 = vrot.slane %v41_v63, 1  ;;  %v3670_v15 = vcombine.low %v3610_v55, %v3640_v1 }
  0x10   :  { %2883 = vmatpush3.bf16.msra.mxu0 %v3252_v7  ;;  %2852 = vmatprep.subr.bf16.mxu1 %v3253_v8  ;;  %v3283_v60 = vld [vmem:[%s4549_s1 + $0x1a8] sm:$0xff]   ;;  %v3290_v4 = vld [vmem:[%s4549_s1 + $0x130] sm:$0xff]   ;;  %v4561_v7 = vunpack.c.l.bf16 %v3513_v27  ;;  %v3292_v16 = vld [vmem:[%s4549_s1 + $0x138] sm:$0xff]  }
  0x11   :  { %2884 = vmatprep.subr.bf16.mxu0 %v3254_v9  ;;  %v3289_v5 = vld [vmem:[%s4549_s1 + $0x1b0] sm:$0xff]  }
  0x12   :  { %v3308_v12 = vld [vmem:[%s4549_s1 + $0x170] sm:$0xff]  }
  0x13   :  { %2853 = vmatpush3.bf16.msra.mxu1 %v3253_v8  ;;  %v2385_v8 = vcombine.low %v3640_v1, %v3647_v3 }
  0x14   :  { %2885 = vmatpush3.bf16.msra.mxu0 %v3254_v9  ;;  %2854 = vmatprep.subr.bf16.mxu1 %v3255_v10  ;;  %v3663_v9 = vsel %vm604_vm0, %v3614_v56, %v608_v58 }
  0x15   :  { %2886 = vmatprep.subr.bf16.mxu0 %v3256_v14 }
  0x17   :  { %2855 = vmatpush3.bf16.msra.mxu1 %v3255_v10  ;;  %v614_v10 = vrot.slane %v4562_v2, 1 }
  0x18   :  { %2887 = vmatpush3.bf16.msra.mxu0 %v3256_v14  ;;  %2856 = vmatprep.subr.bf16.mxu1 %v3257_v17  ;;  %v4560_v14 = vunpack.c.l.bf16 %v3534_v33 }
  0x19   :  { %2888 = vmatprep.subr.bf16.mxu0 %v3258_v18 }
  0x1b   :  { %2857 = vmatpush3.bf16.msra.mxu1 %v3257_v17  ;;  %v3676_v17 = vsel %vm604_vm0, %v608_v58, %v610_v62  ;;  %v3296_v58 = vld [vmem:[%s4549_s1 + $0x148] sm:$0xff]  }
  0x1c   :  { %2889 = vmatpush3.bf16.msra.mxu0 %v3258_v18  ;;  %2858 = vmatprep.subr.bf16.mxu1 %v3259_v19  ;;  %v3681_v18 = vld [vmem:[%s4550_s0 + $0x24] sm:$0xf] }
  0x1d   :  { %2890 = vmatprep.subr.bf16.mxu0 %v3260_v20 }
  0x1f   :  { %2859 = vmatpush3.bf16.msra.mxu1 %v3259_v19  ;;  %v3291_v19 = vld [vmem:[%s4549_s1 + $0x1b8] sm:$0xff]  }
  0x20   :  { %2891 = vmatpush3.bf16.msra.mxu0 %v3260_v20  ;;  %2940 = vmatprep.subr.bf16.mxu1 %v3266_v23  ;;  %v45_v20 = vunpack.c.l.bf16 %v3540_v34 }
  0x21   :  { %2908 = vmatprep.subr.bf16.mxu0 %v3265_v24 }
  0x22   :  { %2861 = vmatmul.mubr.bf16.vlgmr.msra.gmra.mrb[0].mxu1 %v2379_v26  ;;  %v3693_v26 = vsel %vm604_vm0, %v610_v62, %v612_v6 }
  0x23   :  { %2893 = vmatmul.mubr.bf16.vlgmr.msra.gmra.mrb[0].mxu0 %v3517_v28  ;;  %2941 = vmatpush3.bf16.msra.mxu1 %v3266_v23  ;;  %v697_v23 = vpack.c.bf16 %v3676_v17, %v3663_v9 }
  0x24   :  { %2909 = vmatpush3.bf16.msra.mxu0 %v3265_v24  ;;  %2942 = vmatprep.subr.bf16.mxu1 %v3268_v29  ;;  %v616_v24 = vrot.slane %v4561_v7, 1 }
  0x25   :  { %2910 = vmatprep.subr.bf16.mxu0 %v3267_v30  ;;  %2864 = vmatprep.mubr.bf16.mxu1 %v2380_v31  ;;  %v46_v31 = vunpack.c.l.bf16 %v3681_v18 }
  0x26   :  { %2896 = vmatprep.mubr.bf16.mxu0 %v3529_v32 }
  0x27   :  { %2943 = vmatpush3.bf16.msra.mxu1 %v3268_v29  ;;  %v3696_v29 = vsel %vm604_vm0, %v612_v6, %v614_v10 }
  0x28   :  { %2911 = vmatpush3.bf16.msra.mxu0 %v3267_v30  ;;  %2944 = vmatprep.subr.bf16.mxu1 %v3274_v36  ;;  %v618_v30 = vrot.slane %v4560_v14, 1 }
  0x29   :  { %2912 = vmatprep.subr.bf16.mxu0 %v3273_v35 }
  0x2a   :  { %2865 = vmatmul.mubr.bf16.gmra.mrb[4].mxu1 %v2381_v38  ;;  %v4559_v38 = vunpack.c.l.bf16 %v3551_v37 }
  0x2b   :  { %2897 = vmatmul.mubr.bf16.gmra.mrb[4].mxu0 %v3563_v40  ;;  %2945 = vmatpush3.bf16.msra.mxu1 %v3274_v36  ;;  %v3294_v36 = vld [vmem:[%s4549_s1 + $0x140] sm:$0xff]  }
  0x2c   :  { %2913 = vmatpush3.bf16.msra.mxu0 %v3273_v35  ;;  %2946 = vmatprep.subr.bf16.mxu1 %v3276_v42  ;;  %v3293_v35 = vld [vmem:[%s4549_s1 + $0x40] sm:$0xff]  }
  0x2d   :  { %2914 = vmatprep.subr.bf16.mxu0 %v3275_v43  ;;  %2868 = vmatprep.mubr.bf16.mxu1 %v2382_v44  ;;  %v3713_v44 = vsel %vm604_vm0, %v614_v10, %v616_v24 }
  0x2e   :  { %2900 = vmatprep.mubr.bf16.mxu0 %v2358_v45  ;;  %v4556_v45 = vunpack.c.l.bf16 %v3583_v46 }
  0x2f   :  { %2947 = vmatpush3.bf16.msra.mxu1 %v3276_v42  ;;  %v4557_v42 = vunpack.c.l.bf16 %v3559_v39 }
  0x30   :  { %2915 = vmatpush3.bf16.msra.mxu0 %v3275_v43  ;;  %2948 = vmatprep.subr.bf16.mxu1 %v3282_v51  ;;  %v698_v43 = vpack.c.bf16 %v3696_v29, %v3693_v26  ;;  %v644_v10 = vrot.slane %v4556_v45, 1  ;;  %v25_v45 = vld [vmem:[%s4550_s0 + $0x28] ss:$48 sps:$4 sm:$0xff]  }
  0x31   :  { %2916 = vmatprep.subr.bf16.mxu0 %v3281_v49  ;;  %v642_v62 = vrot.slane %v4557_v42, 1 }
  0x32   :  { %2869 = vmatmul.mubr.bf16.gmra.mrb[8].mxu1 %v2383_v54  ;;  %v3295_v54 = vld [vmem:[%s4549_s1 + $0x48] sm:$0xff]  }
  0x33   :  { %2901 = vmatmul.mubr.bf16.gmra.mrb[8].mxu0 %v3618_v57  ;;  %2949 = vmatpush3.bf16.msra.mxu1 %v3282_v51  ;;  %v620_v51 = vrot.slane %v45_v20, 1  ;;  %v3779_v11 = vsel %vm604_vm0, %v642_v62, %v644_v10 }
  0x34   :  { %2917 = vmatpush3.bf16.msra.mxu0 %v3281_v49  ;;  %2950 = vmatprep.subr.bf16.mxu1 %v3284_v59  ;;  %v3719_v49 = vrot.slane %v46_v31, 1 }
  0x35   :  { %2918 = vmatprep.subr.bf16.mxu0 %v3283_v60  ;;  %2872 = vmatprep.mubr.bf16.mxu1 %v2384_v61  ;;  %v3734_v61 = vrot.slane %v4559_v38, 1 }
  0x36   :  { %2904 = vmatprep.mubr.bf16.mxu0 %v3635_v0  ;;  %v3745_v6 = vsel %vm604_vm0, %v620_v51, %v3719_v49 }
  0x37   :  { %2951 = vmatpush3.bf16.msra.mxu1 %v3284_v59  ;;  %v4554_v59 = vunpack.c.l.bf16 %v3590_v48 }
  0x38   :  { %2919 = vmatpush3.bf16.msra.mxu0 %v3283_v60  ;;  %2952 = vmatprep.subr.bf16.mxu1 %v3290_v4 }
  0x39   :  { %2920 = vmatprep.subr.bf16.mxu0 %v3289_v5 }
  0x3a   :  { %2873 = vmatmul.mubr.bf16.gmra.mrb[12].mxu1 %v2385_v8  ;;  %v3298_v8 = vld [vmem:[%s4549_s1 + $0x50] sm:$0xff]  }
  0x3b   :  { %2905 = vmatmul.mubr.bf16.gmra.mrb[12].mxu0 %v3670_v15  ;;  %2953 = vmatpush3.bf16.msra.mxu1 %v3290_v4  ;;  %v4553_v4 = vunpack.c.l.bf16 %v3603_v53 }
  0x3c   :  { %2921 = vmatpush3.bf16.msra.mxu0 %v3289_v5  ;;  %2954 = vmatprep.subr.bf16.mxu1 %v3292_v16  ;;  %v3741_v5 = vsel %vm604_vm0, %v618_v30, %v620_v51  ;;  %v3300_v51 = vld [vmem:[%s4549_s1 + $0x58] sm:$0xff]  }
  0x3d   :  { %2922 = vmatprep.subr.bf16.mxu0 %v3291_v19  ;;  %2924 = vmatprep.mubr.bf16.mxu0 %v3517_v28  ;;  %v3717_v28 = vsel %vm604_vm0, %v616_v24, %v618_v30  ;;  %v3765_v24 = vrot.slane %v38_v47, 2  ;;  %v56_v30 = vunpack.c.l.bf16 %v3647_v3  ;;  %v648_v47 = vrot.slane %v4553_v4, 1 }
  0x3e   :  { %2956 = vmatprep.mubr.bf16.mxu1 %v697_v23  ;;  %v699_v60 = vpack.c.bf16 %v3717_v28, %v3713_v44  ;;  %v3761_v23 = vld [vmem:[%s4550_s0 + $0x54] sm:$0xf] }
  0x3f   :  { %2955 = vmatpush3.bf16.msra.mxu1 %v3292_v16  ;;  %v4555_v16 = vunpack.c.l.bf16 %v3610_v55 }
  0x40   :  { %2923 = vmatpush3.bf16.msra.mxu0 %v3291_v19  ;;  %2972 = vmatprep.subr.bf16.mxu1 %v3293_v35  ;;  %v4558_v19 = vunpack.c.l.bf16 %v3640_v1 }
  0x41   :  { %3036 = vmatprep.subr.bf16.mxu0 %v3294_v36 }
  0x42   :  { %2957 = vmatmul.mubr.bf16.vlgmr.msra.gmra.mrb[16].mxu1 %v698_v43  ;;  %v3776_v43 = vsel %vm604_vm0, %v3734_v61, %v642_v62  ;;  %v652_v62 = vrot.slane %v4558_v19, 1  ;;  %v58_v19 = vunpack.c.h.bf16 %v25_v45 }
  0x43   :  { %2925 = vmatmul.mubr.bf16.vlgmr.msra.gmra.mrb[0].mxu0 %v3529_v32  ;;  %2973 = vmatpush3.bf16.msra.mxu1 %v3293_v35  ;;  %v3299_v32 = vld [vmem:[%s4549_s1 + $0x150] sm:$0xff]   ;;  %v700_v35 = vpack.c.bf16 %v3745_v6, %v3741_v5  ;;  %v701_v4 = vpack.c.bf16 %v3779_v11, %v3776_v43 }
  0x44   :  { %3037 = vmatpush3.bf16.msra.mxu0 %v3294_v36  ;;  %2974 = vmatprep.subr.bf16.mxu1 %v3295_v54  ;;  %v646_v36 = vrot.slane %v4554_v59, 1 }
  0x45   :  { %3038 = vmatprep.subr.bf16.mxu0 %v3296_v58  ;;  %2928 = vmatprep.mubr.bf16.mxu0 %v3563_v40  ;;  %v2418_v40 = vcombine.low %v3540_v34, %v3681_v18  ;;  %v57_v18 = vunpack.c.l.bf16 %v3761_v23 }
  0x46   :  { %2960 = vmatprep.mubr.bf16.mxu1 %v699_v60  ;;  %v3301_v60 = vld [vmem:[%s4549_s1 + $0x158] sm:$0xff]   ;;  %v3797_v59 = vsel %vm604_vm0, %v644_v10, %v646_v36  ;;  %v3803_v42 = vsel %vm604_vm0, %v646_v36, %v648_v47  ;;  %v47_v10 = vunpack.c.l.bf16 %v25_v45  ;;  %v37_v36 = vunpack.c.l.bf16 %v3466_v13  ;;  %v3324_v13 = vld [vmem:[%s4549_s1 + $0xb0] sm:$0xff]  }
  0x47   :  { %2975 = vmatpush3.bf16.msra.mxu1 %v3295_v54  ;;  %v650_v54 = vrot.slane %v4555_v16, 1  ;;  %v654_v16 = vrot.slane %v56_v30, 1  ;;  %v1279_v38 = vrot.slane %v57_v18, 2  ;;  %v702_v34 = vpack.c.bf16 %v3803_v42, %v3797_v59 }
  0x48   :  { %3039 = vmatpush3.bf16.msra.mxu0 %v3296_v58  ;;  %2976 = vmatprep.subr.bf16.mxu1 %v3298_v8  ;;  %v1276_v58 = vrot.slane %v46_v31, 2  ;;  %v3302_v31 = vld [vmem:[%s4549_s1 + $0x60] sm:$0xff]   ;;  %v1013_v14 = vrot.slane %v47_v10, 1  ;;  %v1017_v45 = vrot.slane %v58_v19, 1 }
  0x49   :  { %3040 = vmatprep.subr.bf16.mxu0 %v3299_v32  ;;  %v3825_v7 = vsel %vm604_vm0, %v650_v54, %v652_v62 }
  0x4a   :  { %2961 = vmatmul.mubr.bf16.gmra.mrb[20].mxu1 %v700_v35  ;;  %v3810_v35 = vrot.slane %v45_v20, 2  ;;  %v3819_v20 = vrot.slane %v56_v30, 2  ;;  %v3829_v2 = vsel %vm604_vm0, %v3719_v49, %v1013_v14  ;;  %v605_v14 = vrot.slane %v37_v36, 1  ;;  %v3305_v49 = vld [vmem:[%s4549_s1 + $0x168] sm:$0xff]  }
  0x4b   :  { %2929 = vmatmul.mubr.bf16.gmra.mrb[4].mxu0 %v2418_v40  ;;  %2977 = vmatpush3.bf16.msra.mxu1 %v3298_v8  ;;  %v3303_v40 = vld [vmem:[%s4549_s1 + $0x160] sm:$0xff]   ;;  %v694_v8 = vrot.slane %v57_v18, 1 }
  0x4c   :  { %3041 = vmatpush3.bf16.msra.mxu0 %v3299_v32  ;;  %2978 = vmatprep.subr.bf16.mxu1 %v3300_v51  ;;  %v3822_v32 = vsel %vm604_vm0, %v648_v47, %v650_v54  ;;  %v1600_v54 = vrot.slane %v58_v19, 2  ;;  %v3849_v18 = vsel %vm1200_vm1, %v3810_v35, %v1276_v58 }
  0x4d   :  { %3042 = vmatprep.subr.bf16.mxu0 %v3301_v60  ;;  %2932 = vmatprep.mubr.bf16.mxu0 %v3618_v57  ;;  %v1597_v57 = vrot.slane %v47_v10, 2  ;;  %v3835_v30 = vsel %vm604_vm0, %v654_v16, %v694_v8  ;;  %v703_v19 = vpack.c.bf16 %v3825_v7, %v3822_v32 }
  0x4e   :  { %2964 = vmatprep.mubr.bf16.mxu1 %v701_v4  ;;  %v3304_v4 = vld [vmem:[%s4549_s1 + $0x68] sm:$0xff]   ;;  %v3865_v47 = vsel %vm1200_vm1, %v1279_v38, %v1600_v54 }
  0x4f   :  { %2979 = vmatpush3.bf16.msra.mxu1 %v3300_v51  ;;  %v3840_v51 = vsel %vm604_vm0, %v694_v8, %v1017_v45  ;;  %v3854_v10 = vsel %vm1200_vm1, %v1276_v58, %v1597_v57  ;;  %v3860_v8 = vsel %vm1200_vm1, %v3819_v20, %v1279_v38  ;;  %v3871_v58 = vsel %vm604_vm0, %v652_v62, %v654_v16  ;;  %v3307_v38 = vld [vmem:[%s4549_s1 + $0x70] sm:$0xff]  }
  0x50   :  { %3043 = vmatpush3.bf16.msra.mxu0 %v3301_v60  ;;  %2980 = vmatprep.subr.bf16.mxu1 %v3302_v31  ;;  %v1603_v45 = vpack.c.bf16 %v3854_v10, %v3849_v18  ;;  %v1204_v60 = vrot.slane %v39_v50, 2  ;;  %v1604_v57 = vpack.c.bf16 %v3865_v47, %v3860_v8  ;;  %v704_v21 = vpack.c.bf16 %v3835_v30, %v3871_v58 }
  0x51   :  { %3044 = vmatprep.subr.bf16.mxu0 %v3303_v40  ;;  %v607_v50 = vsel %vm604_vm0, %v605_v14, %v3614_v56  ;;  %v1208_v16 = vrot.slane %v41_v63, 2  ;;  %v4563_v62 = vunpack.c.l.bf16 %v3506_v25  ;;  %v3309_v56 = vld [vmem:[%s4549_s1 + $0x78] sm:$0xff]   ;;  %v4564_v25 = vunpack.c.l.bf16 %v3513_v27  ;;  %v3312_v27 = vld [vmem:[%s4549_s1 + $0x80] sm:$0xff]  }
  0x52   :  { %2965 = vmatmul.mubr.bf16.gmra.mrb[24].mxu1 %v702_v34  ;;  %v1206_v34 = vrot.slane %v40_v52, 2  ;;  %v2419_v52 = vcombine.low %v3647_v3, %v3761_v23  ;;  %v3310_v3 = vld [vmem:[%s4549_s1 + $0x178] sm:$0xff]   ;;  %v664_v23 = vpack.c.bf16 %v3663_v9, %v607_v50  ;;  %v3311_v9 = vld [vmem:[%s4549_s1 + $0x1c0] sm:$0xff]   ;;  %v4566_v50 = vunpack.c.l.bf16 %v3551_v37  ;;  %v3316_v37 = vld [vmem:[%s4549_s1 + $0x90] sm:$0xff]  }
  0x53   :  { %2933 = vmatmul.mubr.bf16.gmra.mrb[8].mxu0 %v3635_v0  ;;  %2981 = vmatpush3.bf16.msra.mxu1 %v3302_v31  ;;  %v3892_v0 = vsel %vm1200_vm1, %v3765_v24, %v1204_v60  ;;  %v1210_v31 = vrot.slane %v4563_v62, 2  ;;  %v1212_v63 = vrot.slane %v4564_v25, 2 }
  0x54   :  { %3045 = vmatpush3.bf16.msra.mxu0 %v3303_v40  ;;  %2982 = vmatprep.subr.bf16.mxu1 %v3304_v4  ;;  %v4565_v40 = vunpack.c.l.bf16 %v3534_v33  ;;  %v3915_v54 = vsel %vm1200_vm1, %v1206_v34, %v1208_v16  ;;  %v48_v33 = vunpack.c.l.bf16 %v3568_v41 }
  0x55   :  { %3046 = vmatprep.subr.bf16.mxu0 %v3305_v49  ;;  %2936 = vmatprep.mubr.bf16.mxu0 %v3670_v15  ;;  %v3895_v15 = vsel %vm1200_vm1, %v1204_v60, %v1206_v34  ;;  %v3918_v14 = vsel %vm1200_vm1, %v1208_v16, %v1210_v31  ;;  %v4567_v16 = vunpack.c.l.bf16 %v3559_v39  ;;  %v3975_v39 = vpack.c.bf16 %v3741_v5, %v3717_v28  ;;  %v3317_v28 = vld [vmem:[%s4549_s1 + $0x1d8] sm:$0xff]  }
  0x56   :  { %2968 = vmatprep.mubr.bf16.mxu1 %v703_v19  ;;  %v1282_v22 = vpack.c.bf16 %v3895_v15, %v3892_v0  ;;  %v1283_v60 = vpack.c.bf16 %v3918_v14, %v3915_v54  ;;  %v3934_v19 = vsel %vm1200_vm1, %v1210_v31, %v1212_v63  ;;  %v3315_v31 = vld [vmem:[%s4549_s1 + $0x1d0] sm:$0xff]   ;;  %v4569_v5 = vunpack.c.l.bf16 %v3590_v48 }
  0x57   :  { %2983 = vmatpush3.bf16.msra.mxu1 %v3304_v4  ;;  %v1214_v4 = vrot.slane %v4565_v40, 2  ;;  %v1229_v62 = vrot.slane %v4567_v16, 2  ;;  %v4571_v48 = vunpack.c.l.bf16 %v3610_v55  ;;  %v3320_v55 = vld [vmem:[%s4549_s1 + $0xa0] sm:$0xff]  }
  0x58   :  { %3047 = vmatpush3.bf16.msra.mxu0 %v3305_v49  ;;  %2984 = vmatprep.subr.bf16.mxu1 %v3307_v38  ;;  %v3929_v49 = vpack.c.bf16 %v3693_v26, %v3676_v17  ;;  %v3314_v17 = vld [vmem:[%s4549_s1 + $0x88] sm:$0xff]   ;;  %v3947_v26 = vpack.c.bf16 %v3713_v44, %v3696_v29  ;;  %v4568_v29 = vunpack.c.l.bf16 %v3583_v46 }
  0x59   :  { %3048 = vmatprep.subr.bf16.mxu0 %v3308_v12  ;;  %v3937_v34 = vsel %vm1200_vm1, %v1212_v63, %v1214_v4  ;;  %v3318_v63 = vld [vmem:[%s4549_s1 + $0x98] sm:$0xff]  }
  0x5a   :  { %2969 = vmatmul.mubr.bf16.gmra.mrb[28].mxu1 %v704_v21  ;;  %v1284_v21 = vpack.c.bf16 %v3937_v34, %v3934_v19  ;;  %v1231_v44 = vrot.slane %v4568_v29, 2  ;;  %v3323_v29 = vld [vmem:[%s4549_s1 + $0x1f0] sm:$0xff]  }
  0x5b   :  { %2937 = vmatmul.mubr.bf16.gmra.mrb[12].mxu0 %v2419_v52  ;;  %2985 = vmatpush3.bf16.msra.mxu1 %v3307_v38  ;;  %v3313_v38 = vld [vmem:[%s4549_s1 + $0x1c8] sm:$0xff]   ;;  %v3956_v52 = vrot.slane %v4566_v50, 2 }
  0x5c   :  { %3049 = vmatpush3.bf16.msra.mxu0 %v3308_v12  ;;  %2986 = vmatprep.subr.bf16.mxu1 %v3309_v56  ;;  %v639_v12 = vrot.slane %v48_v33, 1  ;;  %v3321_v50 = vld [vmem:[%s4549_s1 + $0x1e8] sm:$0xff]  }
  0x5d   :  { %3050 = vmatprep.subr.bf16.mxu0 %v3310_v3  ;;  %2988 = vmatprep.mubr.bf16.mxu1 %v664_v23  ;;  %v3986_v23 = vsel %vm1200_vm1, %v1229_v62, %v1231_v44 }
  0x5e   :  { %3052 = vmatprep.mubr.bf16.mxu0 %v1282_v22  ;;  %v641_v46 = vsel %vm604_vm0, %v639_v12, %v3734_v61  ;;  %v1233_v61 = vrot.slane %v4569_v5, 2  ;;  %v4570_v22 = vunpack.c.l.bf16 %v3603_v53  ;;  %v4572_v53 = vunpack.c.l.bf16 %v3640_v1 }
  0x5f   :  { %2987 = vmatpush3.bf16.msra.mxu1 %v3309_v56  ;;  %v3967_v56 = vsel %vm1200_vm1, %v1214_v4, %v3810_v35  ;;  %v668_v40 = vpack.c.bf16 %v3776_v43, %v641_v46  ;;  %v4020_v1 = vpack.c.bf16 %v3797_v59, %v3779_v11  ;;  %v3322_v59 = vld [vmem:[%s4549_s1 + $0xa8] sm:$0xff]   ;;  %v4038_v11 = vpack.c.bf16 %v3822_v32, %v3803_v42 }
  0x60   :  { %3051 = vmatpush3.bf16.msra.mxu0 %v3310_v3  ;;  %3004 = vmatprep.subr.bf16.mxu1 %v3311_v9  ;;  %v1285_v35 = vpack.c.bf16 %v3849_v18, %v3967_v56  ;;  %v3983_v3 = vsel %vm1200_vm1, %v3956_v52, %v1229_v62  ;;  %v1235_v25 = vrot.slane %v4570_v22, 2  ;;  %v4010_v43 = vsel %vm1200_vm1, %v1231_v44, %v1233_v61  ;;  %v3325_v44 = vld [vmem:[%s4549_s1 + $0x1f8] sm:$0xff]  }
  0x61   :  { %3068 = vmatprep.subr.bf16.mxu0 %v3312_v27  ;;  %v1286_v4 = vpack.c.bf16 %v3986_v23, %v3983_v3  ;;  %v1201_v62 = vrot.slane %v37_v36, 2  ;;  %v4058_v36 = vpack.c.bf16 %v3871_v58, %v3825_v7  ;;  %v1252_v58 = vpack.c.bf16 %v3915_v54, %v3895_v15  ;;  %v3329_v15 = vld [vmem:[%s4549_s1 + $0x210] sm:$0xff]  }
  0x62   :  { %2989 = vmatmul.mubr.bf16.vlgmr.msra.gmra.mrb[16].mxu1 %v3929_v49  ;;  %v1254_v54 = vpack.c.bf16 %v3967_v56, %v3937_v34  ;;  %v3331_v34 = vld [vmem:[%s4549_s1 + $0x220] sm:$0xff]   ;;  %v4574_v46 = vpack.c.bf16 %v3840_v51, %v3835_v30 }
  0x63   :  { %3053 = vmatmul.mubr.bf16.vlgmr.msra.gmra.mrb[16].mxu0 %v1283_v60  ;;  %3005 = vmatpush3.bf16.msra.mxu1 %v3311_v9  ;;  %v1237_v9 = vrot.slane %v4571_v48, 2  ;;  %v3319_v60 = vld [vmem:[%s4549_s1 + $0x1e0] sm:$0xff]  }
  0x64   :  { %3069 = vmatpush3.bf16.msra.mxu0 %v3312_v27  ;;  %3006 = vmatprep.subr.bf16.mxu1 %v3313_v38  ;;  %v1239_v27 = vrot.slane %v4572_v53, 2 }
  0x65   :  { %3070 = vmatprep.subr.bf16.mxu0 %v3314_v17  ;;  %2992 = vmatprep.mubr.bf16.mxu1 %v3947_v26  ;;  %v4025_v12 = vsel %vm1200_vm1, %v1235_v25, %v1237_v9 }
  0x66   :  { %3056 = vmatprep.mubr.bf16.mxu0 %v1284_v21  ;;  %v4028_v21 = vsel %vm1200_vm1, %v1237_v9, %v1239_v27  ;;  %v4050_v42 = vsel %vm1200_vm1, %v1239_v27, %v3819_v20  ;;  %v1203_v20 = vsel %vm1200_vm1, %v1201_v62, %v3765_v24  ;;  %v3327_v24 = vld [vmem:[%s4549_s1 + $0x200] sm:$0xff]  }
  0x67   :  { %3007 = vmatpush3.bf16.msra.mxu1 %v3313_v38  ;;  %v4013_v38 = vsel %vm1200_vm1, %v1233_v61, %v1235_v25  ;;  %v1288_v16 = vpack.c.bf16 %v4028_v21, %v4025_v12  ;;  %v1289_v32 = vpack.c.bf16 %v3860_v8, %v4050_v42  ;;  %v1251_v7 = vpack.c.bf16 %v3892_v0, %v1203_v20  ;;  %v3328_v0 = vld [vmem:[%s4549_s1 + $0x208] sm:$0xff]  }
  0x68   :  { %3071 = vmatpush3.bf16.msra.mxu0 %v3314_v17  ;;  %3008 = vmatprep.subr.bf16.mxu1 %v3315_v31  ;;  %v1287_v17 = vpack.c.bf16 %v4013_v38, %v4010_v43  ;;  %v1258_v56 = vpack.c.bf16 %v4050_v42, %v4028_v21 }
  0x69   :  { %3072 = vmatprep.subr.bf16.mxu0 %v3316_v37 }
  0x6a   :  { %2993 = vmatmul.mubr.bf16.gmra.mrb[20].mxu1 %v3975_v39 }
  0x6b   :  { %3057 = vmatmul.mubr.bf16.gmra.mrb[20].mxu0 %v1285_v35  ;;  %3009 = vmatpush3.bf16.msra.mxu1 %v3315_v31  ;;  %v3326_v31 = vld [vmem:[%s4549_s1 + $0xb8] sm:$0xff]  }
  0x6c   :  { %3073 = vmatpush3.bf16.msra.mxu0 %v3316_v37  ;;  %3010 = vmatprep.subr.bf16.mxu1 %v3317_v28  ;;  %v1253_v37 = vpack.c.bf16 %v3934_v19, %v3918_v14  ;;  %v3330_v14 = vld [vmem:[%s4549_s1 + $0x218] sm:$0xff]  }
  0x6d   :  { %3074 = vmatprep.subr.bf16.mxu0 %v3318_v63  ;;  %2996 = vmatprep.mubr.bf16.mxu1 %v668_v40 }
  0x6e   :  { %3060 = vmatprep.mubr.bf16.mxu0 %v1286_v4 }
  0x6f   :  { %3011 = vmatpush3.bf16.msra.mxu1 %v3317_v28 }
  0x70   :  { %3075 = vmatpush3.bf16.msra.mxu0 %v3318_v63  ;;  %3012 = vmatprep.subr.bf16.mxu1 %v3319_v60 }
  0x71   :  { %3076 = vmatprep.subr.bf16.mxu0 %v3320_v55 }
  0x72   :  { %2997 = vmatmul.mubr.bf16.gmra.mrb[24].mxu1 %v4020_v1 }
  0x73   :  { %3061 = vmatmul.mubr.bf16.gmra.mrb[24].mxu0 %v1287_v17  ;;  %3013 = vmatpush3.bf16.msra.mxu1 %v3319_v60 }
  0x74   :  { %3077 = vmatpush3.bf16.msra.mxu0 %v3320_v55  ;;  %3014 = vmatprep.subr.bf16.mxu1 %v3321_v50 }
  0x75   :  { %3078 = vmatprep.subr.bf16.mxu0 %v3322_v59  ;;  %3000 = vmatprep.mubr.bf16.mxu1 %v4038_v11 }
  0x76   :  { %3064 = vmatprep.mubr.bf16.mxu0 %v1288_v16 }
  0x77   :  { %3015 = vmatpush3.bf16.msra.mxu1 %v3321_v50 }
  0x78   :  { %3079 = vmatpush3.bf16.msra.mxu0 %v3322_v59  ;;  %3016 = vmatprep.subr.bf16.mxu1 %v3323_v29 }
  0x79   :  { %3080 = vmatprep.subr.bf16.mxu0 %v3324_v13 }
  0x7a   :  { %3001 = vmatmul.mubr.bf16.gmra.mrb[28].mxu1 %v4058_v36 }
  0x7b   :  { %3065 = vmatmul.mubr.bf16.gmra.mrb[28].mxu0 %v1289_v32  ;;  %3017 = vmatpush3.bf16.msra.mxu1 %v3323_v29 }
  0x7c   :  { %3081 = vmatpush3.bf16.msra.mxu0 %v3324_v13  ;;  %3018 = vmatprep.subr.bf16.mxu1 %v3325_v44 }
  0x7d   :  { %3082 = vmatprep.subr.bf16.mxu0 %v3326_v31  ;;  %3020 = vmatprep.mubr.bf16.mxu1 %v3929_v49  ;;  %v1226_v49 = vrot.slane %v48_v33, 2  ;;  %v4573_v33 = vpack.c.bf16 %v3829_v2, %v3745_v6  ;;  %v3332_v2 = vld [vmem:[%s4549_s1 + $0x228] sm:$0xff]   ;;  %v1257_v6 = vpack.c.bf16 %v4025_v12, %v4013_v38 }
  0x7e   :  { %3084 = vmatprep.mubr.bf16.mxu0 %v1251_v7 }
  0x7f   :  { %3019 = vmatpush3.bf16.msra.mxu1 %v3325_v44  ;;  %v1228_v41 = vsel %vm1200_vm1, %v1226_v49, %v3956_v52  ;;  %v3333_v52 = vld [vmem:[%s4549_s1 + $0x230] sm:$0xff]  }
  0x80   :  { %3083 = vmatpush3.bf16.msra.mxu0 %v3326_v31  ;;  %3132 = vmatprep.subr.bf16.mxu1 %v3327_v24  ;;  %v1255_v19 = vpack.c.bf16 %v3983_v3, %v1228_v41 }
  0x81   :  { %3100 = vmatprep.subr.bf16.mxu0 %v3327_v24 }
  0x82   :  { %3021 = vmatmul.mubr.bf16.vlgmr.msra.gmra.mrb[16].mxu1 %v3947_v26  ;;  %v1256_v26 = vpack.c.bf16 %v4010_v43, %v3986_v23 }
  0x83   :  { %3085 = vmatmul.mubr.bf16.vlgmr.msra.gmra.mrb[16].mxu0 %v1252_v58  ;;  %3140 = vmatpush3.bf16.msra.mxu1 %v3327_v24 }
  0x84   :  { %3101 = vmatpush3.bf16.msra.mxu0 %v3327_v24  ;;  %3133 = vmatprep.subr.bf16.mxu1 %v3328_v0 }
  0x85   :  { %3102 = vmatprep.subr.bf16.mxu0 %v3328_v0  ;;  %3024 = vmatprep.mubr.bf16.mxu1 %v3975_v39  ;;  %v3334_v39 = vld [vmem:[%s4549_s1 + $0x238] sm:$0xff]  }
  0x86   :  { %3088 = vmatprep.mubr.bf16.mxu0 %v1253_v37 }
  0x87   :  { %3141 = vmatpush3.bf16.msra.mxu1 %v3328_v0 }
  0x88   :  { %3103 = vmatpush3.bf16.msra.mxu0 %v3328_v0  ;;  %3134 = vmatprep.subr.bf16.mxu1 %v3329_v15 }
  0x89   :  { %3104 = vmatprep.subr.bf16.mxu0 %v3329_v15 }
  0x8a   :  { %3025 = vmatmul.mubr.bf16.gmra.mrb[20].mxu1 %v4573_v33 }
  0x8b   :  { %3089 = vmatmul.mubr.bf16.gmra.mrb[20].mxu0 %v1254_v54  ;;  %3142 = vmatpush3.bf16.msra.mxu1 %v3329_v15 }
  0x8c   :  { %3105 = vmatpush3.bf16.msra.mxu0 %v3329_v15  ;;  %3135 = vmatprep.subr.bf16.mxu1 %v3330_v14 }
  0x8d   :  { %3106 = vmatprep.subr.bf16.mxu0 %v3330_v14  ;;  %3028 = vmatprep.mubr.bf16.mxu1 %v4020_v1 }
  0x8e   :  { %3092 = vmatprep.mubr.bf16.mxu0 %v1255_v19 }
  0x8f   :  { %3143 = vmatpush3.bf16.msra.mxu1 %v3330_v14 }
  0x90   :  { %3107 = vmatpush3.bf16.msra.mxu0 %v3330_v14  ;;  %3136 = vmatprep.subr.bf16.mxu1 %v3331_v34 }
  0x91   :  { %3108 = vmatprep.subr.bf16.mxu0 %v3331_v34 }
  0x92   :  { %3029 = vmatmul.mubr.bf16.gmra.mrb[24].mxu1 %v4038_v11 }
  0x93   :  { %3093 = vmatmul.mubr.bf16.gmra.mrb[24].mxu0 %v1256_v26  ;;  %3144 = vmatpush3.bf16.msra.mxu1 %v3331_v34 }
  0x94   :  { %3109 = vmatpush3.bf16.msra.mxu0 %v3331_v34  ;;  %3137 = vmatprep.subr.bf16.mxu1 %v3332_v2 }
  0x95   :  { %3110 = vmatprep.subr.bf16.mxu0 %v3332_v2  ;;  %3032 = vmatprep.mubr.bf16.mxu1 %v4058_v36 }
  0x96   :  { %3096 = vmatprep.mubr.bf16.mxu0 %v1257_v6 }
  0x97   :  { %3145 = vmatpush3.bf16.msra.mxu1 %v3332_v2 }
  0x98   :  { %3111 = vmatpush3.bf16.msra.mxu0 %v3332_v2  ;;  %3138 = vmatprep.subr.bf16.mxu1 %v3333_v52 }
  0x99   :  { %3112 = vmatprep.subr.bf16.mxu0 %v3333_v52 }
  0x9a   :  { %3033 = vmatmul.mubr.bf16.gmra.mrb[28].mxu1 %v4574_v46 }
  0x9b   :  { %3097 = vmatmul.mubr.bf16.gmra.mrb[28].mxu0 %v1258_v56  ;;  %3146 = vmatpush3.bf16.msra.mxu1 %v3333_v52 }
  0x9c   :  { %3113 = vmatpush3.bf16.msra.mxu0 %v3333_v52  ;;  %3139 = vmatprep.subr.bf16.mxu1 %v3334_v39  ;;  %v3399_v52 = vmov 0.0  }
  0x9d   :  { %3114 = vmatprep.subr.bf16.mxu0 %v3334_v39  ;;  %3116 = vmatprep.mubr.bf16.mxu0 %v1252_v58 }
  0x9e   :  { %3124 = vmatprep.mubr.bf16.mxu1 %v1256_v26 }
  0x9f   :  { %3147 = vmatpush3.bf16.msra.mxu1 %v3334_v39 }
  0xa0   :  { %3115 = vmatpush3.bf16.msra.mxu0 %v3334_v39 }
  0xa2   :  { %3125 = vmatmul.mubr.bf16.vlgmr.msra.gmra.mrb[32].mxu1 %v1257_v6 }
  0xa3   :  { %3117 = vmatmul.mubr.bf16.vlgmr.msra.gmra.mrb[16].mxu0 %v1253_v37  ;;  %3128 = vmatprep.mubr.bf16.mxu1 %v1258_v56  ;;  %v1766_v37 = vlaneseq }
  0xa4   :  { %3120 = vmatprep.mubr.bf16.mxu0 %v1254_v54 }
  0xa5   :  { %v4155_v49 = vshrl.u32 %v1766_v37, 7 }
  0xa7   :  { %v4158_v15 = vadd.s32 16, %v4155_v49  ;;  %v4161_v54 = vadd.s32 24, %v4155_v49  ;;  %v4164_v41 = vadd.s32 8, %v4155_v49  ;;  %v1787_v33 = vand.u32 7, %v4155_v49 }
  0xa8   :  { %v4173_v26 = vadd.s32 48, %v4155_v49  ;;  %v4178_v2 = vadd.s32 32, %v4155_v49  ;;  %v4183_v6 = vadd.s32 56, %v4155_v49  ;;  %v4189_v39 = vadd.s32 40, %v4155_v49 }
  0xa9   :  { %v1801_v14 = vand.u32 7, %v4158_v15  ;;  %v1808_v19 = vand.u32 7, %v4161_v54  ;;  %v1794_v34 = vand.u32 7, %v4164_v41  ;;  %vm1975_vm3 = vcmp.gt.s32.totalorder %v1787_v33, 0 }
  0xaa   :  { %3129 = vmatmul.mubr.bf16.gmra.mrb[36].mxu1 %v1604_v57  ;;  %v2572_v46 = vsel %vm1975_vm3, 1.0, %v3399_v52  ;;  %v4242_v37 = vadd.s32 112, %v4155_v49  ;;  %vm2023_vm3 = vcmp.lt.s32.totalorder %v1787_v33, 7 }
  0xab   :  { %3121 = vmatmul.mubr.bf16.gmra.mrb[20].mxu0 %v1603_v45  ;;  %vm1977_vm2 = vcmp.gt.s32.totalorder %v1801_v14, 0  ;;  %vm1978_vm4 = vcmp.gt.s32.totalorder %v1808_v19, 0  ;;  %vm1976_vm5 = vcmp.gt.s32.totalorder %v1794_v34, 0 }
  0xac   :  { %v2574_v56 = vsel %vm1977_vm2, 1.0, %v3399_v52  ;;  %vm2025_vm2 = vcmp.lt.s32.totalorder %v1801_v14, 7 }
  0xf5   :  { %v2862_v30 = vpop.f32.mrb[0].mxu1 }
  0xf6   :  { %v190_v51 = vpop.f32.mrb[1].mxu1 }
  0xf7   :  { %v2863_v35 = vpop.f32.mrb[2].mxu1 }
  0xf8   :  { %v193_v3 = vpop.f32.mrb[3].mxu1 }
  0xfd   :  { %v2866_v23 = vpop.f32.mrb[4].mxu1 }
  0xfe   :  { %v206_v28 = vpop.f32.mrb[5].mxu1 }
  0xff   :  { %v2867_v5 = vpop.f32.mrb[6].mxu1 }
 0x100   :  { %v209_v61 = vpop.f32.mrb[7].mxu1 }
 0x105   :  { %v2870_v22 = vpop.f32.mrb[8].mxu1 }
 0x106   :  { %v222_v25 = vpop.f32.mrb[9].mxu1 }
 0x107   :  { %v2871_v63 = vpop.f32.mrb[10].mxu1 }
 0x108   :  { %v225_v40 = vpop.f32.mrb[11].mxu1 }
 0x10d   :  { %v2874_v4 = vpop.f32.mrb[12].mxu1 }
 0x10e   :  { %v238_v48 = vpop.f32.mrb[13].mxu1 }
 0x10f   :  { %v2875_v47 = vpop.f32.mrb[14].mxu1 }
 0x110   :  { %v241_v8 = vpop.f32.mrb[15].mxu1 }
 0x116   :  { %v2926_v57 = vpop.f32.mrb[0].mxu0 }
 0x117   :  { %v3148_v9 = vadd.f32 %v2926_v57, %v2862_v30  ;;  %v499_v18 = vpop.f32.mrb[1].mxu0  ;;  %v1829_v30 = vand.u32 7, %v4173_v26  ;;  %v4210_v57 = vadd.s32 64, %v4155_v49 }
 0x118   :  { %v3149_v10 = vadd.f32 %v499_v18, %v190_v51  ;;  %v2927_v45 = vpop.f32.mrb[2].mxu0  ;;  %v2575_v51 = vsel %vm1978_vm4, 1.0, %v3399_v52 }
 0x119   :  { %v3150_v53 = vadd.f32 %v2927_v45, %v2863_v35  ;;  %v502_v27 = vpop.f32.mrb[3].mxu0  ;;  %v1815_v35 = vand.u32 7, %v4178_v2  ;;  %vm1981_vm6 = vcmp.gt.s32.totalorder %v1829_v30, 0 }
 0x11a   :  { %v3151_v60 = vadd.f32 %v502_v27, %v193_v3  ;;  %v2073_v3 = vmul.f32 %v3148_v9, %v2574_v56  ;;  %v4225_v27 = vadd.s32 72, %v4155_v49 }
 0x11b   :  { %vm1979_vm7 = vcmp.gt.s32.totalorder %v1815_v35, 0 }
 0x11e   :  { %v2930_v43 = vpop.f32.mrb[4].mxu0 }
 0x11f   :  { %v4131_v38 = vadd.f32 %v2930_v43, %v2866_v23  ;;  %v515_v55 = vpop.f32.mrb[5].mxu0  ;;  %v2573_v23 = vsel %vm1976_vm5, 1.0, %v3399_v52  ;;  %vm2026_vm5 = vcmp.lt.s32.totalorder %v1808_v19, 7 }
 0x120   :  { %v4133_v1 = vadd.f32 %v515_v55, %v206_v28  ;;  %v2931_v17 = vpop.f32.mrb[6].mxu0  ;;  %v1836_v28 = vand.u32 7, %v4183_v6  ;;  %v2591_v54 = vsel %vm2026_vm5, 1.0, %v3399_v52 }
 0x121   :  { %v4135_v12 = vadd.f32 %v2931_v17, %v2867_v5  ;;  %v518_v21 = vpop.f32.mrb[7].mxu0  ;;  %v1843_v17 = vand.u32 7, %v4210_v57 }
 0x122   :  { %v4137_v50 = vadd.f32 %v518_v21, %v209_v61  ;;  %v2071_v61 = vmul.f32 %v3149_v10, %v2572_v46  ;;  %vm1982_vm8 = vcmp.gt.s32.totalorder %v1836_v28, 0  ;;  %v4217_v10 = vadd.s32 88, %v4155_v49 }
 0x123   :  { %v2579_v55 = vsel %vm1982_vm8, 1.0, %v3399_v52  ;;  %vm1983_vm11 = vcmp.gt.s32.totalorder %v1843_v17, 0  ;;  %vm2024_vm8 = vcmp.lt.s32.totalorder %v1794_v34, 7 }
 0x124   :  { %v2589_v2 = vsel %vm2024_vm8, 1.0, %v3399_v52 }
 0x126   :  { %v2934_v59 = vpop.f32.mrb[8].mxu0 }
 0x127   :  { %v4139_v11 = vadd.f32 %v2934_v59, %v2870_v22  ;;  %v531_v16 = vpop.f32.mrb[9].mxu0  ;;  %v1822_v22 = vand.u32 7, %v4189_v39 }
 0x128   :  { %v4141_v62 = vadd.f32 %v531_v16, %v222_v25  ;;  %v2935_v29 = vpop.f32.mrb[10].mxu0  ;;  %v1864_v16 = vand.u32 7, %v4217_v10 }
 0x129   :  { %v4143_v42 = vadd.f32 %v2935_v29, %v2871_v63  ;;  %v534_v13 = vpop.f32.mrb[11].mxu0  ;;  %vm1980_vm9 = vcmp.gt.s32.totalorder %v1822_v22, 0 }
 0x12a   :  { %v4145_v36 = vadd.f32 %v534_v13, %v225_v40  ;;  %v2074_v40 = vmul.f32 %v3150_v53, %v2575_v51  ;;  %v2578_v53 = vsel %vm1981_vm6, 1.0, %v3399_v52  ;;  %v2577_v59 = vsel %vm1980_vm9, 1.0, %v3399_v52 }
 0x12b   :  { %v2077_v21 = vmul.f32 %v4131_v38, %v2578_v53  ;;  %v2076_v46 = vmul.f32 %v4137_v50, %v2577_v59  ;;  %vm1986_vm12 = vcmp.gt.s32.totalorder %v1864_v16, 0  ;;  %v4265_v50 = vadd.s32 104, %v4155_v49 }
 0x12c   :  { %vm2031_vm6 = vcmp.lt.s32.totalorder %v1843_v17, 7 }
 0x12d   :  { %v2596_v19 = vsel %vm2031_vm6, 1.0, %v3399_v52 }
 0x12e   :  { %v2938_v32 = vpop.f32.mrb[12].mxu0 }
 0x12f   :  { %v4147_v20 = vadd.f32 %v2938_v32, %v2874_v4  ;;  %v547_v44 = vpop.f32.mrb[13].mxu0  ;;  %v4203_v4 = vadd.s32 80, %v4155_v49  ;;  %v1850_v32 = vand.u32 7, %v4225_v27 }
 0x130   :  { %v4149_v31 = vadd.f32 %v547_v44, %v238_v48  ;;  %v2939_v7 = vpop.f32.mrb[14].mxu0 }
 0x131   :  { %v4151_v24 = vadd.f32 %v2939_v7, %v2875_v47  ;;  %v550_v58 = vpop.f32.mrb[15].mxu0  ;;  %v1857_v43 = vand.u32 7, %v4203_v4  ;;  %vm1984_vm13 = vcmp.gt.s32.totalorder %v1850_v32, 0  ;;  %v2588_v4 = vsel %vm2023_vm3, 1.0, %v3399_v52 }
 0x132   :  { %v4153_v0 = vadd.f32 %v550_v58, %v241_v8  ;;  %v2072_v8 = vmul.f32 %v3151_v60, %v2573_v23  ;;  %v2576_v60 = vsel %vm1979_vm7, 1.0, %v3399_v52  ;;  %v2078_v58 = vmul.f32 %v4135_v12, %v2579_v55 }
 0x133   :  { %v2075_v13 = vmul.f32 %v4133_v1, %v2576_v60  ;;  %vm1985_vm10 = vcmp.gt.s32.totalorder %v1857_v43, 0  ;;  %v4250_v1 = vadd.s32 96, %v4155_v49  ;;  %vm2033_vm4 = vcmp.lt.s32.totalorder %v1857_v43, 7 }
 0x134   :  { %vm2034_vm7 = vcmp.lt.s32.totalorder %v1864_v16, 7  ;;  %vm2032_vm9 = vcmp.lt.s32.totalorder %v1850_v32, 7 }
 0x135   :  { %v2599_v26 = vsel %vm2034_vm7, 1.0, %v3399_v52  ;;  %v2597_v6 = vsel %vm2032_vm9, 1.0, %v3399_v52 }
 0x155   :  { %v3022_v5 = vpop.f32.mrb[16].mxu1 }
 0x156   :  { %v4198_v25 = vadd.f32 %v3022_v5, %v2073_v3  ;;  %v1104_v63 = vpop.f32.mrb[17].mxu1  ;;  %v4257_v3 = vadd.s32 120, %v4155_v49  ;;  %v2582_v5 = vsel %vm1985_vm10, 1.0, %v3399_v52  ;;  %vm2029_vm10 = vcmp.lt.s32.totalorder %v1829_v30, 7 }
 0x157   :  { %v4205_v48 = vadd.f32 %v2071_v61, %v1104_v63  ;;  %v3023_v47 = vpop.f32.mrb[18].mxu1  ;;  %v2580_v61 = vsel %vm1983_vm11, 1.0, %v3399_v52  ;;  %v1885_v63 = vand.u32 7, %v4242_v37  ;;  %vm2027_vm11 = vcmp.lt.s32.totalorder %v1815_v35, 7 }
 0x158   :  { %v4212_v9 = vadd.f32 %v3023_v47, %v2074_v40  ;;  %v1107_v18 = vpop.f32.mrb[19].mxu1  ;;  %v2583_v40 = vsel %vm1986_vm12, 1.0, %v3399_v52  ;;  %v1871_v47 = vand.u32 7, %v4250_v1  ;;  %v1892_v53 = vand.u32 7, %v4257_v3 }
 0x159   :  { %v4219_v45 = vadd.f32 %v2072_v8, %v1107_v18  ;;  %v2081_v8 = vmul.f32 %v4139_v11, %v2582_v5  ;;  %v2581_v18 = vsel %vm1984_vm13, 1.0, %v3399_v52  ;;  %v2079_v55 = vmul.f32 %v4141_v62, %v2580_v61 }
 0x15a   :  { %vm1989_vm14 = vcmp.gt.s32.totalorder %v1885_v63, 0  ;;  %vm1987_vm15 = vcmp.gt.s32.totalorder %v1871_v47, 0  ;;  %vm1990_vm0 = vcmp.gt.s32.totalorder %v1892_v53, 0  ;;  %vm4345_vm12 = vcmp.lt.s32.totalorder %v1885_v63, 7 }
 0x15b   :  { %v2584_v5 = vsel %vm1987_vm15, 1.0, %v3399_v52  ;;  %vm4349_vm13 = vcmp.lt.s32.totalorder %v1871_v47, 7  ;;  %vm4361_vm15 = vcmp.lt.s32.totalorder %v1892_v53, 7  ;;  %v4374_v27 = vsel %vm2027_vm11, 1.0, %v3399_v52 }
 0x15c   :  { %v4386_v32 = vsel %vm4345_vm12, 1.0, %v3399_v52  ;;  %v4391_v63 = vsel %vm4349_vm13, 1.0, %v3399_v52 }
 0x15d   :  { %v3026_v29 = vpop.f32.mrb[20].mxu1 }
 0x15e   :  { %v4236_v44 = vadd.f32 %v3026_v29, %v2077_v21  ;;  %v1120_v7 = vpop.f32.mrb[21].mxu1  ;;  %v1878_v21 = vand.u32 7, %v4265_v50 }
 0x15f   :  { %v4244_v38 = vadd.f32 %v2075_v13, %v1120_v7  ;;  %v3027_v56 = vpop.f32.mrb[22].mxu1  ;;  %v2082_v7 = vmul.f32 %v4143_v42, %v2583_v40  ;;  %v2586_v42 = vsel %vm1989_vm14, 1.0, %v3399_v52  ;;  %vm4355_vm14 = vcmp.lt.s32.totalorder %v1836_v28, 7 }
 0x160   :  { %v4252_v51 = vadd.f32 %v3027_v56, %v2078_v58  ;;  %v1123_v12 = vpop.f32.mrb[23].mxu1  ;;  %v2080_v56 = vmul.f32 %v4145_v36, %v2581_v18  ;;  %vm1988_vm1 = vcmp.gt.s32.totalorder %v1878_v21, 0  ;;  %v2587_v36 = vsel %vm1990_vm0, 1.0, %v3399_v52 }
 0x161   :  { %v4259_v23 = vadd.f32 %v2076_v46, %v1123_v12  ;;  %v2085_v61 = vmul.f32 %v4147_v20, %v2586_v42  ;;  %v2585_v40 = vsel %vm1988_vm1, 1.0, %v3399_v52  ;;  %v2083_v18 = vmul.f32 %v4149_v31, %v2584_v5  ;;  %v4410_v5 = vld [vmem:[%s4551_s2] ss:$0 sm:$0xff] }
 0x162   :  { %v2084_v15 = vmul.f32 %v4153_v0, %v2585_v40  ;;  %v2598_v0 = vsel %vm2033_vm4, 1.0, %v3399_v52  ;;  %vm4367_vm0 = vcmp.lt.s32.totalorder %v1822_v22, 7  ;;  %v2594_v28 = vsel %vm2029_vm10, 1.0, %v3399_v52 }
 0x163   :  { %vm4378_vm1 = vcmp.lt.s32.totalorder %v1878_v21, 7  ;;  %v2595_v50 = vsel %vm4355_vm14, 1.0, %v3399_v52  ;;  %v4405_v42 = vsel %vm4367_vm0, 1.0, %v3399_v52 }
 0x165   :  { %v3030_v60 = vpop.f32.mrb[24].mxu1 }
 0x166   :  { %v4276_v59 = vadd.f32 %v3030_v60, %v2081_v8  ;;  %v4278_v29 = vpop.f32.mrb[24].mxu0  ;;  %v1136_v13 = vpop.f32.mrb[25].mxu1 }
 0x167   :  { %v4281_v58 = vadd.f32 %v2079_v55, %v1136_v13  ;;  %v4283_v11 = vpop.f32.mrb[25].mxu0  ;;  %v3031_v37 = vpop.f32.mrb[26].mxu1 }
 0x168   :  { %v4286_v46 = vadd.f32 %v3031_v37, %v2082_v7  ;;  %v4288_v62 = vpop.f32.mrb[26].mxu0  ;;  %v1139_v1 = vpop.f32.mrb[27].mxu1  ;;  %v2086_v7 = vmul.f32 %v4151_v24, %v2587_v36  ;;  %v2590_v24 = vsel %vm2025_vm2, 1.0, %v3399_v52 }
 0x169   :  { %v4290_v12 = vadd.f32 %v2080_v56, %v1139_v1  ;;  %v4292_v3 = vpop.f32.mrb[27].mxu0  ;;  %v4400_v1 = vsel %vm4361_vm15, 1.0, %v3399_v52 }
 0x16d   :  { %v3034_v8 = vpop.f32.mrb[28].mxu1 }
 0x16e   :  { %v4306_v60 = vadd.f32 %v3034_v8, %v2085_v61  ;;  %v4308_v55 = vpop.f32.mrb[28].mxu0  ;;  %v1152_v13 = vpop.f32.mrb[29].mxu1 }
 0x16f   :  { %v4313_v20 = vadd.f32 %v2083_v18, %v1152_v13  ;;  %v4315_v37 = vpop.f32.mrb[29].mxu0  ;;  %v3035_v31 = vpop.f32.mrb[30].mxu1  ;;  %v4416_v18 = vsel %vm4378_vm1, 1.0, %v3399_v52 }
 0x170   :  { %v4320_v49 = vadd.f32 %v3035_v31, %v2086_v7  ;;  %v4322_v14 = vpop.f32.mrb[30].mxu0  ;;  %v1155_v33 = vpop.f32.mrb[31].mxu1 }
 0x171   :  { %v4328_v43 = vadd.f32 %v2084_v15, %v1155_v33  ;;  %v4330_v56 = vpop.f32.mrb[31].mxu0 }
 0x175   :  { %v3126_v10 = vpop.f32.mrb[32].mxu1 }
 0x176   :  { %v3118_v16 = vpop.f32.mrb[16].mxu0  ;;  %v3164_v39 = vadd.f32 %v3126_v10, %v4278_v29  ;;  %v1719_v22 = vpop.f32.mrb[33].mxu1 }
 0x177   :  { %v2105_v47 = vmul.f32 %v3118_v16, %v2590_v24  ;;  %v1687_v53 = vpop.f32.mrb[17].mxu0  ;;  %v3165_v21 = vadd.f32 %v1719_v22, %v4283_v11  ;;  %v3127_v29 = vpop.f32.mrb[34].mxu1 }
 0x178   :  { %v2113_v36 = vmul.f32 %v3164_v39, %v2598_v0  ;;  %v2103_v61 = vmul.f32 %v2588_v4, %v1687_v53  ;;  %v3119_v40 = vpop.f32.mrb[18].mxu0  ;;  %v3166_v11 = vadd.f32 %v3127_v29, %v4288_v62  ;;  %v1722_v8 = vpop.f32.mrb[35].mxu1 }
 0x179   :  { %v2121_v13 = vadd.f32 %v2105_v47, %v4198_v25  ;;  %v2111_v7 = vmul.f32 %v3165_v21, %v2596_v19  ;;  %v2106_v31 = vmul.f32 %v3119_v40, %v2591_v54  ;;  %v1690_v15 = vpop.f32.mrb[19].mxu0  ;;  %v3167_v33 = vadd.f32 %v1722_v8, %v4292_v3 }
 0x17a   :  { %v2129_v24 = vadd.f32 %v2113_v36, %v4276_v59  ;;  %v2119_v4 = vadd.f32 %v2103_v61, %v4205_v48  ;;  %v2114_v0 = vmul.f32 %v3166_v11, %v2599_v26  ;;  %v2104_v57 = vmul.f32 %v2589_v2, %v1690_v15 }
 0x17b   :  { %v4423_v62 = vadd.f32 %v4410_v5, %v2121_v13  ;;  %v2127_v41 = vadd.f32 %v2111_v7, %v4281_v58  ;;  %v2122_v52 = vadd.f32 %v2106_v31, %v4212_v9  ;;  %v2112_v34 = vmul.f32 %v3167_v33, %v2597_v6 }
 0x17c   :  { %v4428_v25 = vadd.f32 %v4410_v5, %v2129_v24  ;;  %v4431_v54 = vadd.f32 %v4410_v5, %v2119_v4  ;;  %v2130_v59 = vadd.f32 %v2114_v0, %v4286_v46  ;;  %v2120_v48 = vadd.f32 %v2104_v57, %v4219_v45 }
 0x17d   :  { %v2607_v3 = vmul.f32 -1.442695, %v4423_v62  ;;  %v4437_v19 = vadd.f32 %v4410_v5, %v2127_v41  ;;  %v4440_v58 = vadd.f32 %v4410_v5, %v2122_v52  ;;  %v2128_v9 = vadd.f32 %v2112_v34, %v4290_v12  ;;  %v3130_v26 = vpop.f32.mrb[36].mxu1 }
 0x17e   :  { %v2615_v2 = vmul.f32 -1.442695, %v4428_v25  ;;  %v2605_v30 = vmul.f32 -1.442695, %v4431_v54  ;;  %v4446_v35 = vadd.f32 %v4410_v5, %v2130_v59  ;;  %v4449_v45 = vadd.f32 %v4410_v5, %v2120_v48  ;;  %v3122_v46 = vpop.f32.mrb[20].mxu0  ;;  %v1735_v10 = vpop.f32.mrb[37].mxu1 }
 0x17f   :  { %3335 = vpow2.f32 %v2607_v3  ;;  %v2613_v6 = vmul.f32 -1.442695, %v4437_v19  ;;  %v2608_v17 = vmul.f32 -1.442695, %v4440_v58  ;;  %v4454_v12 = vadd.f32 %v4410_v5, %v2128_v9  ;;  %v1703_v16 = vpop.f32.mrb[21].mxu0  ;;  %v3131_v39 = vpop.f32.mrb[38].mxu1 }
 0x180   :  { %3337 = vpow2.f32 %v2615_v2  ;;  %v2616_v22 = vmul.f32 -1.442695, %v4446_v35  ;;  %v2606_v47 = vmul.f32 -1.442695, %v4449_v45  ;;  %v2109_v53 = vmul.f32 %v3122_v46, %v2594_v28  ;;  %v3123_v21 = vpop.f32.mrb[22].mxu0  ;;  %v1738_v29 = vpop.f32.mrb[39].mxu1 }
 0x181   :  { %3339 = vpow2.f32 %v2605_v30  ;;  %v2614_v36 = vmul.f32 -1.442695, %v4454_v12  ;;  %v3168_v61 = vadd.f32 %v3130_v26, %v4308_v55  ;;  %v2107_v40 = vmul.f32 %v4374_v27, %v1703_v16  ;;  %v1706_v11 = vpop.f32.mrb[23].mxu0 }
 0x182   :  { %3341 = vpow2.f32 %v2613_v6  ;;  %v2125_v8 = vadd.f32 %v2109_v53, %v4236_v44  ;;  %v3169_v13 = vadd.f32 %v1735_v10, %v4315_v37  ;;  %v2110_v7 = vmul.f32 %v3123_v21, %v2595_v50 }
 0x183   :  { %3343 = vpow2.f32 %v2608_v17  ;;  %v2117_v31 = vmul.f32 %v3168_v61, %v4386_v32  ;;  %v2123_v28 = vadd.f32 %v2107_v40, %v4244_v38  ;;  %v3170_v15 = vadd.f32 %v3131_v39, %v4322_v14 }
 0x184   :  { %3345 = vpow2.f32 %v2616_v22  ;;  %v4467_v33 = vadd.f32 %v4410_v5, %v2125_v8  ;;  %v2115_v55 = vmul.f32 %v3169_v13, %v4391_v63  ;;  %v2126_v27 = vadd.f32 %v2110_v7, %v4252_v51 }
 0x185   :  { %3347 = vpow2.f32 %v2606_v47  ;;  %v2133_v44 = vadd.f32 %v2117_v31, %v4306_v60  ;;  %v4473_v37 = vadd.f32 %v4410_v5, %v2123_v28  ;;  %v2118_v32 = vmul.f32 %v3170_v15, %v4400_v1 }
 0x186   :  { %3349 = vpow2.f32 %v2614_v36  ;;  %v2611_v38 = vmul.f32 -1.442695, %v4467_v33  ;;  %v2131_v14 = vadd.f32 %v2115_v55, %v4313_v20  ;;  %v4479_v50 = vadd.f32 %v4410_v5, %v2126_v27 }
 0x187   :  { %v4482_v63 = vadd.f32 %v4410_v5, %v2133_v44  ;;  %v2609_v51 = vmul.f32 -1.442695, %v4473_v37  ;;  %v2134_v60 = vadd.f32 %v2118_v32, %v4320_v49  ;;  %v2108_v24 = vmul.f32 %v4405_v42, %v1706_v11 }
 0x188   :  { %3351 = vpow2.f32 %v2611_v38  ;;  %v2612_v1 = vmul.f32 -1.442695, %v4479_v50  ;;  %v3171_v4 = vadd.f32 %v1738_v29, %v4330_v56  ;;  %v4493_v3 = vadd.f32 %v4410_v5, %v2131_v14 }
 0x189   :  { %v3336_v0 = vpop.eup %3335  ;;  %v2619_v20 = vmul.f32 -1.442695, %v4482_v63  ;;  %3353 = vpow2.f32 %v2609_v51  ;;  %v2124_v57 = vadd.f32 %v2108_v24, %v4259_v23  ;;  %v4498_v16 = vadd.f32 %v4410_v5, %v2134_v60 }
 0x18a   :  { %v3338_v41 = vpop.eup %3337  ;;  %v2208_v52 = vadd.f32 1.0, %v3336_v0  ;;  %3355 = vpow2.f32 %v2612_v1  ;;  %v2116_v34 = vmul.f32 %v3171_v4, %v4416_v18  ;;  %v2617_v6 = vmul.f32 -1.442695, %v4493_v3 }
 0x18b   :  { %v3340_v59 = vpop.eup %3339  ;;  %v2216_v49 = vadd.f32 1.0, %v3338_v41  ;;  %3357 = vpow2.f32 %v2619_v20  ;;  %v4501_v39 = vadd.f32 %v4410_v5, %v2124_v57  ;;  %v2620_v61 = vmul.f32 -1.442695, %v4498_v16 }
 0x18c   :  { %v3342_v42 = vpop.eup %3341  ;;  %3359 = vrcp.f32 %v2208_v52  ;;  %v2206_v48 = vadd.f32 1.0, %v3340_v59  ;;  %v2132_v56 = vadd.f32 %v2116_v34, %v4328_v43 }
 0x18d   :  { %v3344_v9 = vpop.eup %3343  ;;  %3361 = vrcp.f32 %v2216_v49  ;;  %v2214_v26 = vadd.f32 1.0, %v3342_v42  ;;  %v2610_v11 = vmul.f32 -1.442695, %v4501_v39 }
 0x18e   :  { %v3346_v23 = vpop.eup %3345  ;;  %3363 = vrcp.f32 %v2206_v48  ;;  %v2209_v2 = vadd.f32 1.0, %v3344_v9  ;;  %v4504_v53 = vadd.f32 %v4410_v5, %v2132_v56 }
 0x18f   :  { %v3348_v30 = vpop.eup %3347  ;;  %3365 = vrcp.f32 %v2214_v26  ;;  %v2217_v18 = vadd.f32 1.0, %v3346_v23 }
 0x190   :  { %v3350_v46 = vpop.eup %3349  ;;  %3367 = vrcp.f32 %v2209_v2  ;;  %v2207_v10 = vadd.f32 1.0, %v3348_v30  ;;  %v2618_v13 = vmul.f32 -1.442695, %v4504_v53 }
 0x191   :  { %3369 = vrcp.f32 %v2217_v18  ;;  %v2215_v17 = vadd.f32 1.0, %v3350_v46 }
 0x192   :  { %v3352_v43 = vpop.eup %3351  ;;  %3371 = vrcp.f32 %v2207_v10 }
 0x193   :  { %v3354_v22 = vpop.eup %3353  ;;  %3373 = vrcp.f32 %v2215_v17  ;;  %v2212_v47 = vadd.f32 1.0, %v3352_v43 }
 0x194   :  { %v3356_v21 = vpop.eup %3355  ;;  %3375 = vpow2.f32 %v2617_v6 }
 0x195   :  { %v3358_v29 = vpop.eup %3357  ;;  %3377 = vrcp.f32 %v2212_v47  ;;  %v2213_v36 = vadd.f32 1.0, %v3356_v21 }
 0x196   :  { %v3360_v40 = vpop.eup %3359 }
 0x197   :  { %v3362_v8 = vpop.eup %3361  ;;  %3379 = vrcp.f32 %v2213_v36  ;;  %v2256_v15 = vmul.f32 %v3360_v40, %v4423_v62 }
 0x198   :  { %v3364_v7 = vpop.eup %3363  ;;  %3381 = vpow2.f32 %v2620_v61  ;;  %v2264_v44 = vmul.f32 %v3362_v8, %v4428_v25 }
 0x199   :  { %v3366_v31 = vpop.eup %3365  ;;  %3383 = vpow2.f32 %v2610_v11  ;;  %v2254_v14 = vmul.f32 %v3364_v7, %v4431_v54 }
 0x19a   :  { %v3368_v28 = vpop.eup %3367  ;;  %3385 = vpow2.f32 %v2618_v13  ;;  %v2262_v1 = vmul.f32 %v3366_v31, %v4437_v19 }
 0x19b   :  { %v3370_v5 = vpop.eup %3369  ;;  %v2257_v55 = vmul.f32 %v3368_v28, %v4440_v58  ;;  %v2210_v58 = vadd.f32 1.0, %v3354_v22 }
 0x19c   :  { %v3372_v27 = vpop.eup %3371  ;;  %v2265_v32 = vmul.f32 %v3370_v5, %v4446_v35  ;;  %v2220_v35 = vadd.f32 1.0, %v3358_v29 }
 0x19d   :  { %v3374_v38 = vpop.eup %3373  ;;  %v2661_v51 = vpack.c.bf16 %v2257_v55, %v2256_v15  ;;  %v2255_v60 = vmul.f32 %v3372_v27, %v4449_v45  ;;  %3387 = vrcp.f32 %v2210_v58 }
 0x19e   :  { %v3376_v24 = vpop.eup %3375  ;;  %v2681_v4 = vpack.c.bf16 %v2265_v32, %v2264_v44  ;;  %v2263_v62 = vmul.f32 %v3374_v38, %v4454_v12  ;;  %3389 = vrcp.f32 %v2220_v35 }
 0x19f   :  { %v3378_v0 = vpop.eup %3377  ;;  %2693 = vst [vmem:[%s4552_s3 + $0x8] sm:$0xff] %v2661_v51   ;;  %v2656_v25 = vpack.c.bf16 %v2255_v60, %v2254_v14  ;;  %v2218_v19 = vadd.f32 1.0, %v3376_v24 }
 0x1a0   :  { %2697 = vst [vmem:[%s4552_s3 + $0x28] sm:$0xff] %v2681_v4   ;;  %v2676_v54 = vpack.c.bf16 %v2263_v62, %v2262_v1  ;;  %v2260_v12 = vmul.f32 %v3378_v0, %v4467_v33 }
 0x1a1   :  { %v3380_v45 = vpop.eup %3379  ;;  %2657 = vst [vmem:[%s4552_s3] sm:$0xff] %v2656_v25   ;;  %3391 = vrcp.f32 %v2218_v19 }
 0x1a2   :  { %2696 = vst [vmem:[%s4552_s3 + $0x20] sm:$0xff] %v2676_v54   ;;  %v2261_v20 = vmul.f32 %v3380_v45, %v4479_v50  ;;  %v3382_v57 = vpop.eup %3381 }
 0x1a3   :  { %v3384_v41 = vpop.eup %3383  ;;  %v2221_v34 = vadd.f32 1.0, %v3382_v57 }
 0x1a4   :  { %v2671_v52 = vpack.c.bf16 %v2261_v20, %v2260_v12  ;;  %v3386_v59 = vpop.eup %3385  ;;  %v2211_v49 = vadd.f32 1.0, %v3384_v41 }
 0x1a5   :  { %3393 = vrcp.f32 %v2221_v34  ;;  %v2219_v42 = vadd.f32 1.0, %v3386_v59 }
 0x1a6   :  { %2695 = vst [vmem:[%s4552_s3 + $0x18] sm:$0xff] %v2671_v52   ;;  %3395 = vrcp.f32 %v2211_v49 }
 0x1a7   :  { %3397 = vrcp.f32 %v2219_v42  ;;  %v3388_v33 = vpop.eup %3387 }
 0x1a8   :  { %v3390_v48 = vpop.eup %3389  ;;  %v2258_v30 = vmul.f32 %v3388_v33, %v4473_v37 }
 0x1a9   :  { %v2268_v26 = vmul.f32 %v3390_v48, %v4482_v63 }
 0x1ab   :  { %v3392_v50 = vpop.eup %3391 }
 0x1ac   :  { %v2266_v46 = vmul.f32 %v3392_v50, %v4493_v3 }
 0x1af   :  { %v3394_v56 = vpop.eup %3393 }
 0x1b0   :  { %v3396_v9 = vpop.eup %3395  ;;  %v2269_v23 = vmul.f32 %v3394_v56, %v4498_v16 }
 0x1b1   :  { %v3398_v2 = vpop.eup %3397  ;;  %v2259_v18 = vmul.f32 %v3396_v9, %v4501_v39 }
 0x1b2   :  { %v2691_v10 = vpack.c.bf16 %v2269_v23, %v2268_v26  ;;  %v2267_v6 = vmul.f32 %v3398_v2, %v4504_v53 }
 0x1b3   :  { %v2666_v17 = vpack.c.bf16 %v2259_v18, %v2258_v30 }
 0x1b4   :  { %2699 = vst [vmem:[%s4552_s3 + $0x38] sm:$0xff] %v2691_v10   ;;  %v2686_v43 = vpack.c.bf16 %v2267_v6, %v2266_v46 }
 0x1b5   :  { %2694 = vst [vmem:[%s4552_s3 + $0x10] sm:$0xff] %v2666_v17  }
 0x1b6   :  { %2698 = vst [vmem:[%s4552_s3 + $0x30] sm:$0xff] %v2686_v43  }

// kernel: inception_1_forward.5
= control target key start
LH: loop header
LB: loop body
LE: loop exit
PB: predicated region body
PF: predicated region fallthrough
CT: control target
= control target key end

     0   :  { %v5786_v1 = vmov 0   ;;  %vm764_vm0 = vcmask 1046528   ;;  %vm1520_vm1 = vcmask 1045504   ;;  %s5782_s1 = inlined_call_operand.vmem [shape: bf16[3,3,128,256], index: 1, kind: input, shape index: {}]   ;;  %s5783_s0 = inlined_call_operand.vmem [shape: bf16[192,128], index: 0, kind: input, shape index: {}]   ;;  %s5784_s2 = inlined_call_operand.vmem [shape: f32[1,256], index: 2, kind: input, shape index: {}]   ;;  %s5785_s3 = inlined_call_operand.vmem [shape: bf16[128,256], index: 3, kind: output, shape index: {}]  }
   0x1   :  { %v3659_v0 = vld [vmem:[%s5782_s1 + $0x184] ss:$8 sps:$4 sm:$0xff]   ;;  %220 = vmatprep.mubr.bf16.mxu1 %v5786_v1  ;;  %413 = vmatprep.mubr.bf16.mxu0 %v5786_v1  ;;  %v3663_v3 = vld [vmem:[%s5782_s1 + $0x180] ss:$8 sps:$4 sm:$0xff]   ;;  %v3665_v5 = vld [vmem:[%s5782_s1 + $0x194] ss:$8 sps:$4 sm:$0xff]  }
   0x2   :  { %v4051_v2 = vld [vmem:[%s5782_s1 + $0x4] ss:$8 sps:$4 sm:$0xff]   ;;  %188 = vmatprep.subr.bf16.mxu1 %v3659_v0  ;;  %v4059_v4 = vld [vmem:[%s5782_s1] ss:$8 sps:$4 sm:$0xff]   ;;  %v4069_v6 = vld [vmem:[%s5782_s1 + $0x14] ss:$8 sps:$4 sm:$0xff]  }
   0x3   :  { %381 = vmatprep.subr.bf16.mxu0 %v4051_v2  ;;  %189 = vmatpush1.bf16.msra.mxu1 %v3663_v3  ;;  %v3669_v7 = vld [vmem:[%s5782_s1 + $0x190] ss:$8 sps:$4 sm:$0xff]   ;;  %v3671_v9 = vld [vmem:[%s5782_s1 + $0x1a4] ss:$8 sps:$4 sm:$0xff]   ;;  %v3675_v11 = vld [vmem:[%s5782_s1 + $0x1a0] ss:$8 sps:$4 sm:$0xff]  }
   0x4   :  { %382 = vmatpush1.bf16.msra.mxu0 %v4059_v4  ;;  %190 = vmatprep.subr.bf16.mxu1 %v3665_v5  ;;  %v4077_v8 = vld [vmem:[%s5782_s1 + $0x10] ss:$8 sps:$4 sm:$0xff]   ;;  %v4086_v10 = vld [vmem:[%s5782_s1 + $0x24] ss:$8 sps:$4 sm:$0xff]   ;;  %v4094_v12 = vld [vmem:[%s5782_s1 + $0x20] ss:$8 sps:$4 sm:$0xff]  }
   0x5   :  { %383 = vmatprep.subr.bf16.mxu0 %v4069_v6  ;;  %v3677_v13 = vld [vmem:[%s5782_s1 + $0x1b4] ss:$8 sps:$4 sm:$0xff]   ;;  %v3681_v15 = vld [vmem:[%s5782_s1 + $0x1b0] ss:$8 sps:$4 sm:$0xff]   ;;  %v3683_v17 = vld [vmem:[%s5782_s1 + $0x1c4] ss:$8 sps:$4 sm:$0xff]  }
   0x6   :  { %v4104_v14 = vld [vmem:[%s5782_s1 + $0x34] ss:$8 sps:$4 sm:$0xff]   ;;  %v4113_v16 = vld [vmem:[%s5782_s1 + $0x30] ss:$8 sps:$4 sm:$0xff]   ;;  %v4122_v18 = vld [vmem:[%s5782_s1 + $0x44] ss:$8 sps:$4 sm:$0xff]  }
   0x7   :  { %191 = vmatpush1.bf16.msra.mxu1 %v3669_v7  ;;  %v3687_v19 = vld [vmem:[%s5782_s1 + $0x1c0] ss:$8 sps:$4 sm:$0xff]   ;;  %v3689_v21 = vld [vmem:[%s5782_s1 + $0x1d4] ss:$8 sps:$4 sm:$0xff]   ;;  %v3693_v23 = vld [vmem:[%s5782_s1 + $0x1d0] ss:$8 sps:$4 sm:$0xff]  }
   0x8   :  { %384 = vmatpush1.bf16.msra.mxu0 %v4077_v8  ;;  %192 = vmatprep.subr.bf16.mxu1 %v3671_v9  ;;  %v4130_v20 = vld [vmem:[%s5782_s1 + $0x40] ss:$8 sps:$4 sm:$0xff]   ;;  %v4140_v22 = vld [vmem:[%s5782_s1 + $0x54] ss:$8 sps:$4 sm:$0xff]   ;;  %v4149_v24 = vld [vmem:[%s5782_s1 + $0x50] ss:$8 sps:$4 sm:$0xff]  }
   0x9   :  { %385 = vmatprep.subr.bf16.mxu0 %v4086_v10  ;;  %v3695_v25 = vld [vmem:[%s5782_s1 + $0x1e4] ss:$8 sps:$4 sm:$0xff]   ;;  %v4166_v28 = vld [vmem:[%s5783_s0 + $0x8] sm:$0xf]  ;;  %v15_v31 = vld [vmem:[%s5783_s0] sm:$0xf] }
   0xa   :  { %v4158_v26 = vld [vmem:[%s5782_s1 + $0x64] ss:$8 sps:$4 sm:$0xff]   ;;  %v39_v30 = vunpack.c.l.bf16 %v4166_v28  ;;  %v3699_v32 = vld [vmem:[%s5782_s1 + $0x1e0] ss:$8 sps:$4 sm:$0xff]   ;;  %v37_v34 = vunpack.c.l.bf16 %v15_v31  ;;  %v3701_v39 = vld [vmem:[%s5782_s1 + $0x1f4] ss:$8 sps:$4 sm:$0xff]  }
   0xb   :  { %193 = vmatpush1.bf16.msra.mxu1 %v3675_v11  ;;  %v16_v27 = vld [vmem:[%s5783_s0 + $0x4] sm:$0xf]  ;;  %v4178_v33 = vld [vmem:[%s5782_s1 + $0x60] ss:$8 sps:$4 sm:$0xff]   ;;  %v4188_v40 = vld [vmem:[%s5782_s1 + $0x74] ss:$8 sps:$4 sm:$0xff]  }
   0xc   :  { %386 = vmatpush1.bf16.msra.mxu0 %v4094_v12  ;;  %194 = vmatprep.subr.bf16.mxu1 %v3677_v13  ;;  %v38_v29 = vunpack.c.l.bf16 %v16_v27  ;;  %v768_v36 = vrot.slane %v39_v30, 1  ;;  %v1524_v38 = vrot.slane %v39_v30, 2  ;;  %v765_v41 = vrot.slane %v37_v34, 1  ;;  %v4193_v43 = vld [vmem:[%s5783_s0 + $0xc] sm:$0xf] }
   0xd   :  { %387 = vmatprep.subr.bf16.mxu0 %v4104_v14  ;;  %v1521_v42 = vrot.slane %v37_v34, 2  ;;  %v4198_v44 = vld [vmem:[%s5783_s0 + $0x10] sm:$0xf]  ;;  %v40_v50 = vunpack.c.l.bf16 %v4193_v43  ;;  %v3711_v53 = vld [vmem:[%s5782_s1 + $0x304] ss:$8 sps:$4 sm:$0xff]   ;;  %v3087_v58 = vcombine.low %v16_v27, %v4166_v28  ;;  %v3063_v59 = vcombine.low %v15_v31, %v16_v27 }
   0xe   :  { %v766_v35 = vrot.slane %v38_v29, 1  ;;  %v1522_v37 = vrot.slane %v38_v29, 2  ;;  %v3705_v47 = vld [vmem:[%s5782_s1 + $0x1f0] ss:$8 sps:$4 sm:$0xff]   ;;  %v41_v51 = vunpack.c.l.bf16 %v4198_v44  ;;  %v4230_v56 = vld [vmem:[%s5783_s0 + $0x14] sm:$0xf]  ;;  %v3088_v31 = vcombine.low %v4193_v43, %v4198_v44 }
   0xf   :  { %195 = vmatpush1.bf16.msra.mxu1 %v3681_v15  ;;  %v4221_v52 = vld [vmem:[%s5782_s1 + $0x70] ss:$8 sps:$4 sm:$0xff]   ;;  %v770_v54 = vrot.slane %v40_v50, 1  ;;  %v1526_v55 = vrot.slane %v40_v50, 2  ;;  %v42_v60 = vunpack.c.l.bf16 %v4230_v56  ;;  %v3709_v5 = vld [vmem:[%s5782_s1 + $0x300] ss:$8 sps:$4 sm:$0xff]  }
  0x10   :  { %388 = vmatpush1.bf16.msra.mxu0 %v4113_v16  ;;  %196 = vmatprep.subr.bf16.mxu1 %v3683_v17  ;;  %v4201_v45 = vsel %vm764_vm0, %v766_v35, %v768_v36  ;;  %v4204_v46 = vsel %vm1520_vm1, %v1522_v37, %v1524_v38  ;;  %v4210_v48 = vsel %vm764_vm0, %v765_v41, %v766_v35  ;;  %v4235_v57 = vld [vmem:[%s5783_s0 + $0x18] sm:$0xf]  ;;  %v772_v0 = vrot.slane %v41_v51, 1  ;;  %v3714_v11 = vld [vmem:[%s5782_s1 + $0x314] ss:$8 sps:$4 sm:$0xff]  }
  0x11   :  { %389 = vmatprep.subr.bf16.mxu0 %v4122_v18  ;;  %v4213_v49 = vsel %vm1520_vm1, %v1521_v42, %v1522_v37  ;;  %v43_v61 = vunpack.c.l.bf16 %v4235_v57  ;;  %v4241_v62 = vsel %vm764_vm0, %v768_v36, %v770_v54  ;;  %v4244_v63 = vsel %vm1520_vm1, %v1524_v38, %v1526_v55  ;;  %v3719_v29 = vld [vmem:[%s5782_s1 + $0x324] ss:$8 sps:$4 sm:$0xff]   ;;  %v4296_v34 = vld [vmem:[%s5783_s0 + $0x1c] sm:$0xf]  ;;  %v4310_v36 = vld [vmem:[%s5783_s0 + $0x20] sm:$0xf] }
  0x12   :  { %v1528_v3 = vrot.slane %v41_v51, 2  ;;  %v4259_v13 = vsel %vm764_vm0, %v770_v54, %v772_v0  ;;  %v774_v15 = vrot.slane %v42_v60, 1  ;;  %v44_v35 = vunpack.c.l.bf16 %v4296_v34  ;;  %v4324_v38 = vld [vmem:[%s5783_s0 + $0x34] sm:$0xf]  ;;  %v4332_v42 = vld [vmem:[%s5783_s0 + $0x38] sm:$0xf] }
  0x13   :  { %197 = vmatpush1.bf16.msra.mxu1 %v3687_v19  ;;  %v1530_v19 = vrot.slane %v42_v60, 2  ;;  %v45_v37 = vunpack.c.l.bf16 %v4310_v36  ;;  %v3089_v41 = vcombine.low %v4230_v56, %v4235_v57  ;;  %v1532_v50 = vrot.slane %v43_v61, 2 }
  0x14   :  { %390 = vmatpush1.bf16.msra.mxu0 %v4130_v20  ;;  %198 = vmatprep.subr.bf16.mxu1 %v3689_v21  ;;  %v4262_v17 = vsel %vm1520_vm1, %v1526_v55, %v1528_v3  ;;  %v4265_v21 = vsel %vm764_vm0, %v772_v0, %v774_v15  ;;  %v4342_v51 = vcombine.low %v4198_v44, %v4230_v56  ;;  %v1534_v60 = vrot.slane %v44_v35, 2 }
  0x15   :  { %391 = vmatprep.subr.bf16.mxu0 %v4140_v22  ;;  %v4274_v27 = vsel %vm1520_vm1, %v1528_v3, %v1530_v19  ;;  %v4356_v44 = vrot.slane %v45_v37, 1  ;;  %v4361_v56 = vrot.slane %v45_v37, 2  ;;  %v3091_v9 = vcombine.low %v4324_v38, %v4332_v42 }
  0x16   :  { %v4372_v0 = vsel %vm1520_vm1, %v1532_v50, %v1534_v60 }
  0x17   :  { %199 = vmatpush1.bf16.msra.mxu1 %v3693_v23  ;;  %v776_v23 = vrot.slane %v43_v61, 1  ;;  %v4369_v61 = vld [vmem:[%s5783_s0 + $0x40] sm:$0xf] }
  0x18   :  { %392 = vmatpush1.bf16.msra.mxu0 %v4149_v24  ;;  %200 = vmatprep.subr.bf16.mxu1 %v3695_v25 }
  0x19   :  { %393 = vmatprep.subr.bf16.mxu0 %v4158_v26  ;;  %v4285_v30 = vsel %vm764_vm0, %v774_v15, %v776_v23  ;;  %v4385_v15 = vld [vmem:[%s5783_s0 + $0x44] sm:$0xf] }
  0x1b   :  { %201 = vmatpush1.bf16.msra.mxu1 %v3699_v32  ;;  %v4291_v32 = vcombine.low %v4166_v28, %v4193_v43  ;;  %v3722_v28 = vld [vmem:[%s5782_s1 + $0x334] ss:$8 sps:$4 sm:$0xff]   ;;  %v49_v43 = vunpack.c.l.bf16 %v4324_v38 }
  0x1c   :  { %394 = vmatpush1.bf16.msra.mxu0 %v4178_v33  ;;  %202 = vmatprep.subr.bf16.mxu1 %v3701_v39  ;;  %v778_v39 = vrot.slane %v44_v35, 1  ;;  %v4404_v35 = vcombine.low %v4235_v57, %v4296_v34 }
  0x1d   :  { %395 = vmatprep.subr.bf16.mxu0 %v4188_v40 }
  0x1e   :  { %v4348_v55 = vsel %vm764_vm0, %v776_v23, %v778_v39  ;;  %v4376_v3 = vsel %vm764_vm0, %v778_v39, %v4356_v44  ;;  %v4391_v23 = vsel %vm1520_vm1, %v1534_v60, %v4361_v56  ;;  %v3090_v60 = vcombine.low %v4296_v34, %v4310_v36 }
  0x1f   :  { %203 = vmatpush1.bf16.msra.mxu1 %v3705_v47  ;;  %v4338_v47 = vld [vmem:[%s5783_s0 + $0x3c] sm:$0xf] }
  0x20   :  { %396 = vmatpush1.bf16.msra.mxu0 %v4221_v52  ;;  %3449 = vmatprep.subr.bf16.mxu1 %v4051_v2  ;;  %v3712_v2 = vld [vmem:[%s5782_s1 + $0x310] ss:$8 sps:$4 sm:$0xff]   ;;  %v51_v54 = vunpack.c.l.bf16 %v4338_v47  ;;  %v3068_v7 = vcombine.low %v4332_v42, %v4338_v47 }
  0x21   :  { %593 = vmatprep.subr.bf16.mxu0 %v3711_v53  ;;  %v50_v53 = vunpack.c.l.bf16 %v4332_v42  ;;  %v5809_v42 = vmov 0  }
  0x22   :  { %221 = vmatmul.mubr.bf16.vlgmr.msra.gmra.mrb[0].mxu1 %v3087_v58 }
  0x23   :  { %414 = vmatmul.mubr.bf16.vlgmr.msra.gmra.mrb[0].mxu0 %v3063_v59  ;;  %3457 = vmatpush1.bf16.msra.mxu1 %v4059_v4  ;;  %v4354_v59 = vsel %vm1520_vm1, %v1530_v19, %v1532_v50  ;;  %v1549_v39 = vrot.slane %v50_v53, 2  ;;  %v3736_v4 = vld [vmem:[%s5782_s1 + $0x370] ss:$8 sps:$4 sm:$0xff]  }
  0x24   :  { %594 = vmatpush1.bf16.msra.mxu0 %v3709_v5  ;;  %230 = vmatprep.mubr.bf16.mxu1 %v5786_v1  ;;  %v4378_v5 = vrot.slane %v49_v43, 1 }
  0x25   :  { %595 = vmatprep.subr.bf16.mxu0 %v3714_v11  ;;  %423 = vmatprep.mubr.bf16.mxu0 %v5786_v1  ;;  %v52_v11 = vunpack.c.l.bf16 %v4369_v61 }
  0x26   :  { %3450 = vmatprep.subr.bf16.mxu1 %v4069_v6  ;;  %v3717_v6 = vld [vmem:[%s5782_s1 + $0x320] ss:$8 sps:$4 sm:$0xff]  }
  0x27   :  { %3458 = vmatpush1.bf16.msra.mxu1 %v4077_v8  ;;  %v3720_v8 = vld [vmem:[%s5782_s1 + $0x330] ss:$8 sps:$4 sm:$0xff]   ;;  %v806_v50 = vrot.slane %v52_v11, 1 }
  0x28   :  { %596 = vmatpush1.bf16.msra.mxu0 %v3712_v2  ;;  %3451 = vmatprep.subr.bf16.mxu1 %v4086_v10  ;;  %v3727_v10 = vld [vmem:[%s5782_s1 + $0x344] ss:$8 sps:$4 sm:$0xff]   ;;  %v53_v2 = vunpack.c.l.bf16 %v4385_v15 }
  0x29   :  { %597 = vmatprep.subr.bf16.mxu0 %v3719_v29  ;;  %v804_v29 = vrot.slane %v51_v54, 1 }
  0x2a   :  { %231 = vmatmul.mubr.bf16.gmra.mrb[4].mxu1 %v3088_v31  ;;  %v3728_v31 = vld [vmem:[%s5782_s1 + $0x350] ss:$8 sps:$4 sm:$0xff]  }
  0x2b   :  { %424 = vmatmul.mubr.bf16.gmra.mrb[4].mxu0 %v4291_v32  ;;  %240 = vmatprep.mubr.bf16.mxu1 %v5786_v1 }
  0x2c   :  { %598 = vmatpush1.bf16.msra.mxu0 %v3717_v6  ;;  %433 = vmatprep.mubr.bf16.mxu0 %v5786_v1  ;;  %v4399_v6 = vrot.slane %v49_v43, 2  ;;  %v1551_v43 = vrot.slane %v51_v54, 2  ;;  %v3733_v54 = vld [vmem:[%s5782_s1 + $0x360] ss:$8 sps:$4 sm:$0xff]  }
  0x2d   :  { %599 = vmatprep.subr.bf16.mxu0 %v3722_v28  ;;  %3459 = vmatpush1.bf16.msra.mxu1 %v4094_v12  ;;  %v3725_v12 = vld [vmem:[%s5782_s1 + $0x340] ss:$8 sps:$4 sm:$0xff]   ;;  %v3735_v28 = vld [vmem:[%s5782_s1 + $0x364] ss:$8 sps:$4 sm:$0xff]  }
  0x2e   :  { %3452 = vmatprep.subr.bf16.mxu1 %v4104_v14  ;;  %v3730_v14 = vld [vmem:[%s5782_s1 + $0x354] ss:$8 sps:$4 sm:$0xff]  }
  0x30   :  { %600 = vmatpush1.bf16.msra.mxu0 %v3720_v8  ;;  %v4412_v8 = vld [vmem:[%s5783_s0 + $0x48] sm:$0xf] }
  0x31   :  { %601 = vmatprep.subr.bf16.mxu0 %v3727_v10  ;;  %3460 = vmatpush1.bf16.msra.mxu1 %v4113_v16  ;;  %v802_v16 = vrot.slane %v50_v53, 1  ;;  %v54_v57 = vunpack.c.l.bf16 %v4412_v8  ;;  %v808_v53 = vrot.slane %v53_v2, 1 }
  0x32   :  { %241 = vmatmul.mubr.bf16.gmra.mrb[8].mxu1 %v3089_v41  ;;  %3453 = vmatprep.subr.bf16.mxu1 %v4122_v18  ;;  %v4435_v18 = vsel %vm1520_vm1, %v4399_v6, %v1549_v39  ;;  %v4451_v41 = vsel %vm764_vm0, %v804_v29, %v806_v50 }
  0x33   :  { %434 = vmatmul.mubr.bf16.gmra.mrb[8].mxu0 %v4342_v51  ;;  %250 = vmatprep.mubr.bf16.mxu1 %v5786_v1  ;;  %v4416_v37 = vsel %vm764_vm0, %v4378_v5, %v802_v16  ;;  %v4419_v10 = vsel %vm764_vm0, %v802_v16, %v804_v29  ;;  %v4448_v16 = vsel %vm1520_vm1, %v1549_v39, %v1551_v43  ;;  %v1555_v29 = vrot.slane %v53_v2, 2  ;;  %v3743_v2 = vld [vmem:[%s5782_s1 + $0x284] ss:$8 sps:$4 sm:$0xff]  }
  0x34   :  { %602 = vmatpush1.bf16.msra.mxu0 %v3725_v12  ;;  %443 = vmatprep.mubr.bf16.mxu0 %v5786_v1  ;;  %v4431_v12 = vld [vmem:[%s5783_s0 + $0x4c] sm:$0xf]  ;;  %v4460_v19 = vsel %vm764_vm0, %v806_v50, %v808_v53 }
  0x35   :  { %603 = vmatprep.subr.bf16.mxu0 %v3730_v14  ;;  %3461 = vmatpush1.bf16.msra.mxu1 %v4130_v20  ;;  %v1553_v14 = vrot.slane %v52_v11, 2  ;;  %v4444_v20 = vld [vmem:[%s5783_s0 + $0x50] sm:$0xf]  ;;  %v55_v34 = vunpack.c.l.bf16 %v4431_v12  ;;  %v3738_v11 = vld [vmem:[%s5782_s1 + $0x374] ss:$8 sps:$4 sm:$0xff]  }
  0x36   :  { %3454 = vmatprep.subr.bf16.mxu1 %v4140_v22  ;;  %v56_v22 = vunpack.c.l.bf16 %v4444_v20 }
  0x37   :  { %v4465_v58 = vsel %vm1520_vm1, %v1551_v43, %v1553_v14  ;;  %v4473_v50 = vsel %vm1520_vm1, %v1553_v14, %v1555_v29  ;;  %v812_v43 = vrot.slane %v55_v34, 1 }
  0x38   :  { %604 = vmatpush1.bf16.msra.mxu0 %v3728_v31  ;;  %v1557_v31 = vrot.slane %v54_v57, 2  ;;  %v4484_v25 = vrot.slane %v56_v22, 1 }
  0x39   :  { %605 = vmatprep.subr.bf16.mxu0 %v3735_v28  ;;  %v810_v28 = vrot.slane %v54_v57, 1  ;;  %3462 = vmatpush1.bf16.msra.mxu1 %v4149_v24 }
  0x3a   :  { %251 = vmatmul.mubr.bf16.gmra.mrb[12].mxu1 %v3090_v60  ;;  %3455 = vmatprep.subr.bf16.mxu1 %v4158_v26  ;;  %v4507_v24 = vsel %vm764_vm0, %v812_v43, %v4484_v25 }
  0x3b   :  { %444 = vmatmul.mubr.bf16.gmra.mrb[12].mxu0 %v4404_v35  ;;  %260 = vmatprep.mubr.bf16.mxu1 %v5786_v1  ;;  %v4476_v39 = vsel %vm764_vm0, %v808_v53, %v810_v28  ;;  %v4490_v57 = vsel %vm764_vm0, %v810_v28, %v812_v43  ;;  %v4493_v53 = vsel %vm1520_vm1, %v1555_v29, %v1557_v31  ;;  %v3760_v43 = vld [vmem:[%s5782_s1 + $0x204] ss:$8 sps:$4 sm:$0xff]   ;;  %v3793_v29 = vld [vmem:[%s5782_s1 + $0x2f4] ss:$8 sps:$4 sm:$0xff]  }
  0x3c   :  { %606 = vmatpush1.bf16.msra.mxu0 %v3733_v54  ;;  %625 = vmatprep.mubr.bf16.mxu0 %v5786_v1  ;;  %v1559_v54 = vrot.slane %v55_v34, 2  ;;  %v4609_v28 = vpack.c.bf16 %v4391_v23, %v4372_v0  ;;  %v3758_v34 = vld [vmem:[%s5782_s1 + $0x200] ss:$8 sps:$4 sm:$0xff]  }
  0x3d   :  { %607 = vmatprep.subr.bf16.mxu0 %v3738_v11  ;;  %v4495_v11 = vrot.slane %v56_v22, 2  ;;  %v3741_v22 = vld [vmem:[%s5782_s1 + $0x280] ss:$8 sps:$4 sm:$0xff]   ;;  %3463 = vmatpush1.bf16.msra.mxu1 %v4178_v33  ;;  %v3751_v33 = vld [vmem:[%s5782_s1 + $0x2a4] ss:$8 sps:$4 sm:$0xff]  }
  0x3e   :  { %v4503_v14 = vsel %vm1520_vm1, %v1557_v31, %v1559_v54  ;;  %v3747_v31 = vld [vmem:[%s5782_s1 + $0x294] ss:$8 sps:$4 sm:$0xff]   ;;  %3456 = vmatprep.subr.bf16.mxu1 %v4188_v40 }
  0x3f   :  { %v4516_v26 = vsel %vm1520_vm1, %v1559_v54, %v4495_v11  ;;  %v4549_v54 = vpack.c.bf16 %v4262_v17, %v4244_v63  ;;  %v3756_v40 = vld [vmem:[%s5782_s1 + $0x2b4] ss:$8 sps:$4 sm:$0xff]  }
  0x40   :  { %608 = vmatpush1.bf16.msra.mxu0 %v3736_v4  ;;  %v3745_v4 = vld [vmem:[%s5782_s1 + $0x290] ss:$8 sps:$4 sm:$0xff]  }
  0x41   :  { %1690 = vmatprep.subr.bf16.mxu0 %v3743_v2  ;;  %3464 = vmatpush1.bf16.msra.mxu1 %v4221_v52  ;;  %v3749_v2 = vld [vmem:[%s5782_s1 + $0x2a0] ss:$8 sps:$4 sm:$0xff]   ;;  %v4559_v52 = vpack.c.bf16 %v4285_v30, %v4265_v21 }
  0x42   :  { %261 = vmatmul.mubr.bf16.gmra.mrb[16].mxu1 %v3091_v9  ;;  %v4538_v9 = vpack.c.bf16 %v4259_v13, %v4241_v62  ;;  %945 = vmatprep.subr.bf16.mxu1 %v3760_v43  ;;  %v4574_v43 = vpack.c.bf16 %v4354_v59, %v4274_v27 }
  0x43   :  { %626 = vmatmul.mubr.bf16.vlgmr.msra.gmra.mrb[0].mxu0 %v4291_v32  ;;  %270 = vmatprep.mubr.bf16.mxu1 %v5786_v1  ;;  %v3092_v32 = vcombine.low %v4338_v47, %v4369_v61  ;;  %v4649_v47 = vpack.c.bf16 %v4451_v41, %v4419_v10 }
  0x44   :  { %1691 = vmatpush1.bf16.msra.mxu0 %v3741_v22  ;;  %635 = vmatprep.mubr.bf16.mxu0 %v5786_v1  ;;  %v3754_v22 = vld [vmem:[%s5782_s1 + $0x2b0] ss:$8 sps:$4 sm:$0xff]  }
  0x45   :  { %1692 = vmatprep.subr.bf16.mxu0 %v3747_v31  ;;  %v3763_v31 = vld [vmem:[%s5782_s1 + $0x2c4] ss:$8 sps:$4 sm:$0xff]  }
  0x48   :  { %1693 = vmatpush1.bf16.msra.mxu0 %v3745_v4  ;;  %v3761_v4 = vld [vmem:[%s5782_s1 + $0x2c0] ss:$8 sps:$4 sm:$0xff]  }
  0x49   :  { %1694 = vmatprep.subr.bf16.mxu0 %v3751_v33  ;;  %v3773_v33 = vld [vmem:[%s5782_s1 + $0x2d4] ss:$8 sps:$4 sm:$0xff]  }
  0x4a   :  { %271 = vmatmul.mubr.bf16.gmra.mrb[20].mxu1 %v3092_v32  ;;  %v4585_v32 = vld [vmem:[%s5783_s0 + $0x24] sm:$0xf] }
  0x4b   :  { %636 = vmatmul.mubr.bf16.gmra.mrb[4].mxu0 %v4342_v51  ;;  %280 = vmatprep.mubr.bf16.mxu1 %v5786_v1  ;;  %v3093_v51 = vcombine.low %v4385_v15, %v4412_v8 }
  0x4c   :  { %645 = vmatprep.mubr.bf16.mxu0 %v5786_v1  ;;  %1695 = vmatpush1.bf16.msra.mxu0 %v3749_v2  ;;  %v4589_v2 = vpack.c.bf16 %v4376_v3, %v4348_v55 }
  0x4d   :  { %1696 = vmatprep.subr.bf16.mxu0 %v3756_v40  ;;  %v3771_v40 = vld [vmem:[%s5782_s1 + $0x2d0] ss:$8 sps:$4 sm:$0xff]  }
  0x50   :  { %1697 = vmatpush1.bf16.msra.mxu0 %v3754_v22  ;;  %v26_v22 = vld [vmem:[%s5783_s0 + $0x30] sm:$0xf] }
  0x51   :  { %1698 = vmatprep.subr.bf16.mxu0 %v3763_v31  ;;  %v3094_v31 = vcombine.low %v4431_v12, %v4444_v20  ;;  %v3067_v60 = vcombine.low %v26_v22, %v4324_v38  ;;  %v3764_v38 = vld [vmem:[%s5782_s1 + $0x210] ss:$8 sps:$4 sm:$0xff]  }
  0x52   :  { %281 = vmatmul.mubr.bf16.gmra.mrb[24].mxu1 %v3093_v51  ;;  %v3143_v51 = vcombine.low %v4310_v36, %v4585_v32  ;;  %v3791_v36 = vld [vmem:[%s5782_s1 + $0x2f0] ss:$8 sps:$4 sm:$0xff]  }
  0x53   :  { %646 = vmatmul.mubr.bf16.gmra.mrb[8].mxu0 %v4404_v35  ;;  %290 = vmatprep.mubr.bf16.mxu1 %v5786_v1  ;;  %v3783_v35 = vld [vmem:[%s5782_s1 + $0x2e4] ss:$8 sps:$4 sm:$0xff]  }
  0x54   :  { %655 = vmatprep.mubr.bf16.mxu0 %v5786_v1  ;;  %1699 = vmatpush1.bf16.msra.mxu0 %v3761_v4  ;;  %v48_v4 = vunpack.c.l.bf16 %v26_v22  ;;  %v3776_v22 = vld [vmem:[%s5782_s1 + $0x234] ss:$8 sps:$4 sm:$0xff]  }
  0x55   :  { %1700 = vmatprep.subr.bf16.mxu0 %v3773_v33  ;;  %v3781_v33 = vld [vmem:[%s5782_s1 + $0x2e0] ss:$8 sps:$4 sm:$0xff]  }
  0x58   :  { %1701 = vmatpush1.bf16.msra.mxu0 %v3771_v40  ;;  %v799_v40 = vrot.slane %v48_v4, 1 }
  0x59   :  { %1702 = vmatprep.subr.bf16.mxu0 %v3783_v35  ;;  %v3802_v35 = vld [vmem:[%s5782_s1 + $0x104] ss:$8 sps:$4 sm:$0xff]  }
  0x5a   :  { %291 = vmatmul.mubr.bf16.gmra.mrb[28].mxu1 %v3094_v31  ;;  %v4627_v31 = vsel %vm764_vm0, %v799_v40, %v4378_v5  ;;  %v3778_v40 = vld [vmem:[%s5782_s1 + $0x240] ss:$8 sps:$4 sm:$0xff]  }
  0x5b   :  { %656 = vmatmul.mubr.bf16.gmra.mrb[12].mxu0 %v3143_v51  ;;  %453 = vmatprep.mubr.bf16.mxu1 %v5786_v1  ;;  %v1546_v51 = vrot.slane %v48_v4, 2  ;;  %v4665_v4 = vpack.c.bf16 %v4465_v58, %v4448_v16 }
  0x5c   :  { %665 = vmatprep.mubr.bf16.mxu0 %v5786_v1  ;;  %1703 = vmatpush1.bf16.msra.mxu0 %v3781_v33  ;;  %v3766_v33 = vld [vmem:[%s5782_s1 + $0x214] ss:$8 sps:$4 sm:$0xff]   ;;  %v828_v1 = vpack.c.bf16 %v4416_v37, %v4627_v31 }
  0x5d   :  { %1704 = vmatprep.subr.bf16.mxu0 %v3793_v29  ;;  %v4639_v29 = vsel %vm1520_vm1, %v1546_v51, %v4399_v6  ;;  %v3770_v6 = vld [vmem:[%s5782_s1 + $0x224] ss:$8 sps:$4 sm:$0xff]   ;;  %v4689_v51 = vpack.c.bf16 %v4493_v53, %v4473_v50 }
  0x5e   :  { %v1575_v5 = vpack.c.bf16 %v4435_v18, %v4639_v29 }
  0x60   :  { %1705 = vmatpush1.bf16.msra.mxu0 %v3791_v36  ;;  %v3780_v36 = vld [vmem:[%s5782_s1 + $0x244] ss:$8 sps:$4 sm:$0xff]  }
  0x61   :  { %1883 = vmatprep.subr.bf16.mxu0 %v3802_v35  ;;  %v3786_v35 = vld [vmem:[%s5782_s1 + $0x254] ss:$8 sps:$4 sm:$0xff]  }
  0x62   :  { %454 = vmatmul.mubr.bf16.vlgmr.msra.gmra.mrb[16].mxu1 %v3067_v60  ;;  %v3069_v60 = vcombine.low %v4369_v61, %v4385_v15  ;;  %v3774_v61 = vld [vmem:[%s5782_s1 + $0x230] ss:$8 sps:$4 sm:$0xff]   ;;  %v4673_v15 = vpack.c.bf16 %v4476_v39, %v4460_v19 }
  0x63   :  { %666 = vmatmul.mubr.bf16.gmra.mrb[16].mxu0 %v3068_v7  ;;  %946 = vmatpush1.bf16.msra.mxu1 %v3758_v34  ;;  %v3768_v34 = vld [vmem:[%s5782_s1 + $0x220] ss:$8 sps:$4 sm:$0xff]  }
  0x64   :  { %463 = vmatprep.mubr.bf16.mxu1 %v5809_v42  ;;  %947 = vmatprep.subr.bf16.mxu1 %v3766_v33  ;;  %v3790_v33 = vld [vmem:[%s5782_s1 + $0x264] ss:$8 sps:$4 sm:$0xff]  }
  0x65   :  { %675 = vmatprep.mubr.bf16.mxu0 %v5809_v42 }
  0x67   :  { %948 = vmatpush1.bf16.msra.mxu1 %v3764_v38 }
  0x68   :  { %949 = vmatprep.subr.bf16.mxu1 %v3770_v6  ;;  %v3788_v6 = vld [vmem:[%s5782_s1 + $0x260] ss:$8 sps:$4 sm:$0xff]  }
  0x6a   :  { %464 = vmatmul.mubr.bf16.gmra.mrb[20].mxu1 %v3068_v7  ;;  %v3070_v7 = vcombine.low %v4412_v8, %v4431_v12  ;;  %v3784_v8 = vld [vmem:[%s5782_s1 + $0x250] ss:$8 sps:$4 sm:$0xff]   ;;  %v4698_v12 = vld [vmem:[%s5783_s0 + $0x54] sm:$0xf] }
  0x6b   :  { %676 = vmatmul.mubr.bf16.gmra.mrb[20].mxu0 %v3069_v60  ;;  %950 = vmatpush1.bf16.msra.mxu1 %v3768_v34  ;;  %v3144_v38 = vcombine.low %v4444_v20, %v4698_v12  ;;  %v4714_v34 = vpack.c.bf16 %v4507_v24, %v4490_v57  ;;  %v3794_v20 = vld [vmem:[%s5782_s1 + $0x270] ss:$8 sps:$4 sm:$0xff]  }
  0x6c   :  { %473 = vmatprep.mubr.bf16.mxu1 %v5809_v42  ;;  %951 = vmatprep.subr.bf16.mxu1 %v3776_v22  ;;  %v4718_v22 = vpack.c.bf16 %v4516_v26, %v4503_v14 }
  0x6d   :  { %685 = vmatprep.mubr.bf16.mxu0 %v5809_v42 }
  0x6f   :  { %952 = vmatpush1.bf16.msra.mxu1 %v3774_v61  ;;  %v3799_v61 = vld [vmem:[%s5782_s1 + $0x84] ss:$8 sps:$4 sm:$0xff]  }
  0x70   :  { %953 = vmatprep.subr.bf16.mxu1 %v3780_v36  ;;  %v3797_v36 = vld [vmem:[%s5782_s1 + $0x80] ss:$8 sps:$4 sm:$0xff]  }
  0x72   :  { %474 = vmatmul.mubr.bf16.gmra.mrb[24].mxu1 %v3069_v60  ;;  %v3796_v60 = vld [vmem:[%s5782_s1 + $0x274] ss:$8 sps:$4 sm:$0xff]  }
  0x73   :  { %686 = vmatmul.mubr.bf16.gmra.mrb[24].mxu0 %v3070_v7  ;;  %954 = vmatpush1.bf16.msra.mxu1 %v3778_v40  ;;  %v3805_v40 = vld [vmem:[%s5782_s1 + $0x94] ss:$8 sps:$4 sm:$0xff]  }
  0x74   :  { %483 = vmatprep.mubr.bf16.mxu1 %v5809_v42  ;;  %955 = vmatprep.subr.bf16.mxu1 %v3786_v35  ;;  %v3808_v35 = vld [vmem:[%s5782_s1 + $0x114] ss:$8 sps:$4 sm:$0xff]  }
  0x75   :  { %695 = vmatprep.mubr.bf16.mxu0 %v5809_v42 }
  0x77   :  { %956 = vmatpush1.bf16.msra.mxu1 %v3784_v8  ;;  %v5810_v8 = vpack.c.bf16 %v4241_v62, %v4201_v45  ;;  %v3811_v62 = vld [vmem:[%s5782_s1 + $0xa4] ss:$8 sps:$4 sm:$0xff]  }
  0x78   :  { %957 = vmatprep.subr.bf16.mxu1 %v3790_v33  ;;  %v5811_v33 = vpack.c.bf16 %v4244_v63, %v4204_v46  ;;  %v3814_v63 = vld [vmem:[%s5782_s1 + $0x124] ss:$8 sps:$4 sm:$0xff]  }
  0x7a   :  { %484 = vmatmul.mubr.bf16.gmra.mrb[28].mxu1 %v3070_v7  ;;  %v3800_v7 = vld [vmem:[%s5782_s1 + $0x100] ss:$8 sps:$4 sm:$0xff]  }
  0x7b   :  { %696 = vmatmul.mubr.bf16.gmra.mrb[28].mxu0 %v3144_v38  ;;  %958 = vmatpush1.bf16.msra.mxu1 %v3788_v6  ;;  %v3803_v38 = vld [vmem:[%s5782_s1 + $0x90] ss:$8 sps:$4 sm:$0xff]  }
  0x7c   :  { %977 = vmatprep.mubr.bf16.mxu1 %v5809_v42  ;;  %959 = vmatprep.subr.bf16.mxu1 %v3796_v60  ;;  %v3806_v6 = vld [vmem:[%s5782_s1 + $0x110] ss:$8 sps:$4 sm:$0xff]   ;;  %v3809_v60 = vld [vmem:[%s5782_s1 + $0xa0] ss:$8 sps:$4 sm:$0xff]  }
  0x7d   :  { %1722 = vmatprep.mubr.bf16.mxu0 %v5809_v42 }
  0x7f   :  { %960 = vmatpush1.bf16.msra.mxu1 %v3794_v20  ;;  %v3812_v20 = vld [vmem:[%s5782_s1 + $0x120] ss:$8 sps:$4 sm:$0xff]  }
  0x80   :  { %1138 = vmatprep.subr.bf16.mxu1 %v3799_v61  ;;  %v3817_v61 = vld [vmem:[%s5782_s1 + $0xb4] ss:$8 sps:$4 sm:$0xff]  }
  0x82   :  { %978 = vmatmul.mubr.bf16.vlgmr.msra.gmra.mrb[32].mxu1 %v5810_v8  ;;  %v3815_v8 = vld [vmem:[%s5782_s1 + $0xb0] ss:$8 sps:$4 sm:$0xff]  }
  0x83   :  { %1723 = vmatmul.mubr.bf16.vlgmr.msra.gmra.mrb[32].mxu0 %v5811_v33  ;;  %1139 = vmatpush1.bf16.msra.mxu1 %v3797_v36  ;;  %v3820_v36 = vld [vmem:[%s5782_s1 + $0x134] ss:$8 sps:$4 sm:$0xff]   ;;  %v3821_v33 = vld [vmem:[%s5782_s1 + $0xc0] ss:$8 sps:$4 sm:$0xff]  }
  0x84   :  { %1884 = vmatpush1.bf16.msra.mxu0 %v3800_v7  ;;  %987 = vmatprep.mubr.bf16.mxu1 %v5809_v42  ;;  %v5812_v7 = vpack.c.bf16 %v4265_v21, %v4259_v13  ;;  %v3818_v13 = vld [vmem:[%s5782_s1 + $0x130] ss:$8 sps:$4 sm:$0xff]   ;;  %v3826_v21 = vld [vmem:[%s5782_s1 + $0x144] ss:$8 sps:$4 sm:$0xff]  }
  0x85   :  { %1732 = vmatprep.mubr.bf16.mxu0 %v5809_v42  ;;  %1140 = vmatprep.subr.bf16.mxu1 %v3805_v40  ;;  %v5813_v40 = vpack.c.bf16 %v4274_v27, %v4262_v17  ;;  %v3823_v17 = vld [vmem:[%s5782_s1 + $0xc4] ss:$8 sps:$4 sm:$0xff]  }
  0x86   :  { %1885 = vmatprep.subr.bf16.mxu0 %v3808_v35  ;;  %v46_v35 = vunpack.c.l.bf16 %v4585_v32 }
  0x87   :  { %1141 = vmatpush1.bf16.msra.mxu1 %v3803_v38  ;;  %v3824_v38 = vld [vmem:[%s5782_s1 + $0x140] ss:$8 sps:$4 sm:$0xff]  }
  0x88   :  { %1886 = vmatpush1.bf16.msra.mxu0 %v3806_v6  ;;  %1142 = vmatprep.subr.bf16.mxu1 %v3811_v62  ;;  %v4793_v27 = vrot.slane %v46_v35, 1  ;;  %v4795_v32 = vrot.slane %v46_v35, 2  ;;  %v3829_v6 = vld [vmem:[%s5782_s1 + $0xd4] ss:$8 sps:$4 sm:$0xff]   ;;  %v3842_v35 = vld [vmem:[%s5782_s1 + $0x170] ss:$8 sps:$4 sm:$0xff]  }
  0x89   :  { %1887 = vmatprep.subr.bf16.mxu0 %v3814_v63  ;;  %v3832_v62 = vld [vmem:[%s5782_s1 + $0x154] ss:$8 sps:$4 sm:$0xff]   ;;  %v5814_v63 = vpack.c.bf16 %v4348_v55, %v4285_v30  ;;  %v3827_v30 = vld [vmem:[%s5782_s1 + $0xd0] ss:$8 sps:$4 sm:$0xff]  }
  0x8a   :  { %988 = vmatmul.mubr.bf16.gmra.mrb[36].mxu1 %v5812_v7  ;;  %v3830_v55 = vld [vmem:[%s5782_s1 + $0x150] ss:$8 sps:$4 sm:$0xff]   ;;  %v3836_v7 = vld [vmem:[%s5782_s1 + $0x160] ss:$8 sps:$4 sm:$0xff]  }
  0x8b   :  { %1733 = vmatmul.mubr.bf16.gmra.mrb[36].mxu0 %v5813_v40  ;;  %997 = vmatprep.mubr.bf16.mxu1 %v5809_v42  ;;  %v3841_v40 = vld [vmem:[%s5782_s1 + $0xf4] ss:$8 sps:$4 sm:$0xff]  }
  0x8c   :  { %1742 = vmatprep.mubr.bf16.mxu0 %v5809_v42  ;;  %1143 = vmatpush1.bf16.msra.mxu1 %v3809_v60  ;;  %v5815_v60 = vpack.c.bf16 %v4372_v0, %v4354_v59  ;;  %v3835_v59 = vld [vmem:[%s5782_s1 + $0xe4] ss:$8 sps:$4 sm:$0xff]  }
  0x8d   :  { %1888 = vmatpush1.bf16.msra.mxu0 %v3812_v20  ;;  %1144 = vmatprep.subr.bf16.mxu1 %v3817_v61  ;;  %v4820_v20 = vsel %vm764_vm0, %v4356_v44, %v4793_v27  ;;  %v4825_v61 = vsel %vm1520_vm1, %v4361_v56, %v4795_v32  ;;  %v3838_v44 = vld [vmem:[%s5782_s1 + $0x164] ss:$8 sps:$4 sm:$0xff]  }
  0x8e   :  { %1889 = vmatprep.subr.bf16.mxu0 %v3820_v36  ;;  %v860_v56 = vpack.c.bf16 %v4820_v20, %v4376_v3  ;;  %v1605_v0 = vpack.c.bf16 %v4825_v61, %v4391_v23  ;;  %v3833_v36 = vld [vmem:[%s5782_s1 + $0xe0] ss:$8 sps:$4 sm:$0xff]   ;;  %v3844_v3 = vld [vmem:[%s5782_s1 + $0x174] ss:$8 sps:$4 sm:$0xff]   ;;  %v3839_v23 = vld [vmem:[%s5782_s1 + $0xf0] ss:$8 sps:$4 sm:$0xff]  }
  0x90   :  { %1145 = vmatpush1.bf16.msra.mxu1 %v3815_v8  ;;  %v3847_v8 = vld [vmem:[%s5782_s1 + $0x384] ss:$8 sps:$4 sm:$0xff]  }
  0x91   :  { %1890 = vmatpush1.bf16.msra.mxu0 %v3818_v13  ;;  %1146 = vmatprep.subr.bf16.mxu1 %v3823_v17  ;;  %v3850_v13 = vld [vmem:[%s5782_s1 + $0x404] ss:$8 sps:$4 sm:$0xff]   ;;  %v5816_v17 = vpack.c.bf16 %v4419_v10, %v4416_v37 }
  0x92   :  { %1891 = vmatprep.subr.bf16.mxu0 %v3826_v21  ;;  %998 = vmatmul.mubr.bf16.gmra.mrb[40].mxu1 %v5814_v63  ;;  %v5817_v21 = vpack.c.bf16 %v4448_v16, %v4435_v18  ;;  %v3865_v63 = vld [vmem:[%s5782_s1 + $0x3b4] ss:$8 sps:$4 sm:$0xff]  }
  0x93   :  { %1743 = vmatmul.mubr.bf16.gmra.mrb[40].mxu0 %v5815_v60  ;;  %1007 = vmatprep.mubr.bf16.mxu1 %v5809_v42  ;;  %v3868_v60 = vld [vmem:[%s5782_s1 + $0x434] ss:$8 sps:$4 sm:$0xff]  }
  0x94   :  { %1752 = vmatprep.mubr.bf16.mxu0 %v5809_v42  ;;  %1147 = vmatpush1.bf16.msra.mxu1 %v3821_v33  ;;  %v5818_v33 = vpack.c.bf16 %v4460_v19, %v4451_v41  ;;  %v5821_v19 = vpack.c.bf16 %v4503_v14, %v4493_v53  ;;  %v3848_v14 = vld [vmem:[%s5782_s1 + $0x400] ss:$8 sps:$4 sm:$0xff]   ;;  %v3856_v53 = vld [vmem:[%s5782_s1 + $0x414] ss:$8 sps:$4 sm:$0xff]  }
  0x95   :  { %1892 = vmatpush1.bf16.msra.mxu0 %v3824_v38  ;;  %1148 = vmatprep.subr.bf16.mxu1 %v3829_v6  ;;  %v5819_v38 = vpack.c.bf16 %v4473_v50, %v4465_v58  ;;  %v57_v6 = vunpack.c.l.bf16 %v4698_v12  ;;  %v3854_v12 = vld [vmem:[%s5782_s1 + $0x410] ss:$8 sps:$4 sm:$0xff]  }
  0x96   :  { %1893 = vmatprep.subr.bf16.mxu0 %v3832_v62  ;;  %v5820_v62 = vpack.c.bf16 %v4490_v57, %v4476_v39  ;;  %v3853_v57 = vld [vmem:[%s5782_s1 + $0x394] ss:$8 sps:$4 sm:$0xff]  }
  0x97   :  { %v4886_v10 = vrot.slane %v57_v6, 1  ;;  %v4888_v16 = vrot.slane %v57_v6, 2 }
  0x98   :  { %1149 = vmatpush1.bf16.msra.mxu1 %v3827_v30  ;;  %v3863_v30 = vld [vmem:[%s5782_s1 + $0x3b0] ss:$8 sps:$4 sm:$0xff]  }
  0x99   :  { %1894 = vmatpush1.bf16.msra.mxu0 %v3830_v55  ;;  %1150 = vmatprep.subr.bf16.mxu1 %v3835_v59  ;;  %v4901_v58 = vsel %vm764_vm0, %v4484_v25, %v4886_v10  ;;  %v4906_v41 = vsel %vm1520_vm1, %v4495_v11, %v4888_v16  ;;  %v3845_v25 = vld [vmem:[%s5782_s1 + $0x380] ss:$8 sps:$4 sm:$0xff]   ;;  %v5822_v11 = vpack.c.bf16 %v4201_v45, %v4210_v48  ;;  %v3859_v45 = vld [vmem:[%s5782_s1 + $0x3a4] ss:$8 sps:$4 sm:$0xff]   ;;  %v3866_v55 = vld [vmem:[%s5782_s1 + $0x430] ss:$8 sps:$4 sm:$0xff]  }
  0x9a   :  { %1895 = vmatprep.subr.bf16.mxu0 %v3838_v44  ;;  %1008 = vmatmul.mubr.bf16.gmra.mrb[44].mxu1 %v860_v56  ;;  %v864_v39 = vpack.c.bf16 %v4901_v58, %v4507_v24  ;;  %v1609_v50 = vpack.c.bf16 %v4906_v41, %v4516_v26  ;;  %v5823_v24 = vpack.c.bf16 %v4204_v46, %v4213_v49  ;;  %v3851_v26 = vld [vmem:[%s5782_s1 + $0x390] ss:$8 sps:$4 sm:$0xff]   ;;  %v3862_v46 = vld [vmem:[%s5782_s1 + $0x424] ss:$8 sps:$4 sm:$0xff]   ;;  %v3857_v48 = vld [vmem:[%s5782_s1 + $0x3a0] ss:$8 sps:$4 sm:$0xff]  }
  0x9b   :  { %1753 = vmatmul.mubr.bf16.gmra.mrb[44].mxu0 %v1605_v0  ;;  %1017 = vmatprep.mubr.bf16.mxu1 %v5809_v42  ;;  %v3860_v49 = vld [vmem:[%s5782_s1 + $0x420] ss:$8 sps:$4 sm:$0xff]   ;;  %v3871_v59 = vld [vmem:[%s5782_s1 + $0x3c4] ss:$8 sps:$4 sm:$0xff]  }
  0x9c   :  { %1762 = vmatprep.mubr.bf16.mxu0 %v5809_v42  ;;  %1151 = vmatpush1.bf16.msra.mxu1 %v3833_v36  ;;  %v3874_v44 = vld [vmem:[%s5782_s1 + $0x444] ss:$8 sps:$4 sm:$0xff]   ;;  %v3869_v56 = vld [vmem:[%s5782_s1 + $0x3c0] ss:$8 sps:$4 sm:$0xff]   ;;  %v3877_v36 = vld [vmem:[%s5782_s1 + $0x3d4] ss:$8 sps:$4 sm:$0xff]  }
  0x9d   :  { %1896 = vmatpush1.bf16.msra.mxu0 %v3836_v7  ;;  %1152 = vmatprep.subr.bf16.mxu1 %v3841_v40  ;;  %v3872_v0 = vld [vmem:[%s5782_s1 + $0x440] ss:$8 sps:$4 sm:$0xff]   ;;  %v3880_v7 = vld [vmem:[%s5782_s1 + $0x454] ss:$8 sps:$4 sm:$0xff]   ;;  %v3875_v40 = vld [vmem:[%s5782_s1 + $0x3d0] ss:$8 sps:$4 sm:$0xff]  }
  0x9e   :  { %1897 = vmatprep.subr.bf16.mxu0 %v3844_v3  ;;  %v3878_v3 = vld [vmem:[%s5782_s1 + $0x450] ss:$8 sps:$4 sm:$0xff]  }
  0xa0   :  { %1153 = vmatpush1.bf16.msra.mxu1 %v3839_v23  ;;  %v3883_v23 = vld [vmem:[%s5782_s1 + $0x3e4] ss:$8 sps:$4 sm:$0xff]  }
  0xa1   :  { %1898 = vmatpush1.bf16.msra.mxu0 %v3842_v35  ;;  %1358 = vmatprep.subr.bf16.mxu1 %v3847_v8  ;;  %v3886_v35 = vld [vmem:[%s5782_s1 + $0x464] ss:$8 sps:$4 sm:$0xff]   ;;  %v3881_v8 = vld [vmem:[%s5782_s1 + $0x3e0] ss:$8 sps:$4 sm:$0xff]  }
  0xa2   :  { %2101 = vmatprep.subr.bf16.mxu0 %v3850_v13  ;;  %1018 = vmatmul.mubr.bf16.gmra.mrb[48].mxu1 %v5816_v17  ;;  %v3884_v13 = vld [vmem:[%s5782_s1 + $0x460] ss:$8 sps:$4 sm:$0xff]   ;;  %v3889_v17 = vld [vmem:[%s5782_s1 + $0x3f4] ss:$8 sps:$4 sm:$0xff]  }
  0xa3   :  { %1763 = vmatmul.mubr.bf16.gmra.mrb[48].mxu0 %v5817_v21  ;;  %1027 = vmatprep.mubr.bf16.mxu1 %v5809_v42  ;;  %v3892_v21 = vld [vmem:[%s5782_s1 + $0x474] ss:$8 sps:$4 sm:$0xff]  }
  0xa4   :  { %1772 = vmatprep.mubr.bf16.mxu0 %v5809_v42 }
  0xaa   :  { %1028 = vmatmul.mubr.bf16.gmra.mrb[52].mxu1 %v5818_v33  ;;  %v3887_v33 = vld [vmem:[%s5782_s1 + $0x3f0] ss:$8 sps:$4 sm:$0xff]  }
  0xab   :  { %1773 = vmatmul.mubr.bf16.gmra.mrb[52].mxu0 %v5819_v38  ;;  %1037 = vmatprep.mubr.bf16.mxu1 %v5809_v42  ;;  %v3890_v38 = vld [vmem:[%s5782_s1 + $0x470] ss:$8 sps:$4 sm:$0xff]  }
  0xac   :  { %1782 = vmatprep.mubr.bf16.mxu0 %v5809_v42 }
  0xb2   :  { %1038 = vmatmul.mubr.bf16.gmra.mrb[56].mxu1 %v5820_v62 }
  0xb3   :  { %1783 = vmatmul.mubr.bf16.gmra.mrb[56].mxu0 %v5821_v19  ;;  %1047 = vmatprep.mubr.bf16.mxu1 %v5809_v42 }
  0xb4   :  { %1792 = vmatprep.mubr.bf16.mxu0 %v5809_v42 }
  0xba   :  { %1048 = vmatmul.mubr.bf16.gmra.mrb[60].mxu1 %v864_v39 }
  0xbb   :  { %1793 = vmatmul.mubr.bf16.gmra.mrb[60].mxu0 %v1609_v50  ;;  %1170 = vmatprep.mubr.bf16.mxu1 %v5809_v42 }
  0xbc   :  { %1915 = vmatprep.mubr.bf16.mxu0 %v5809_v42 }
  0xc2   :  { %1171 = vmatmul.mubr.bf16.vlgmr.msra.gmra.mrb[32].mxu1 %v5822_v11 }
  0xc3   :  { %1916 = vmatmul.mubr.bf16.vlgmr.msra.gmra.mrb[32].mxu0 %v5823_v24  ;;  %1359 = vmatpush1.bf16.msra.mxu1 %v3845_v25 }
  0xc4   :  { %2102 = vmatpush1.bf16.msra.mxu0 %v3848_v14  ;;  %1180 = vmatprep.mubr.bf16.mxu1 %v5809_v42  ;;  %v5051_v14 = vld [vmem:[%s5783_s0 + $0x28] ss:$48 sps:$4 sm:$0xff]  }
  0xc5   :  { %1925 = vmatprep.mubr.bf16.mxu0 %v5809_v42  ;;  %1360 = vmatprep.subr.bf16.mxu1 %v3853_v57 }
  0xc6   :  { %2103 = vmatprep.subr.bf16.mxu0 %v3856_v53 }
  0xc7   :  { %1361 = vmatpush1.bf16.msra.mxu1 %v3851_v26 }
  0xc8   :  { %2104 = vmatpush1.bf16.msra.mxu0 %v3854_v12  ;;  %1362 = vmatprep.subr.bf16.mxu1 %v3859_v45 }
  0xc9   :  { %2105 = vmatprep.subr.bf16.mxu0 %v3862_v46 }
  0xca   :  { %1181 = vmatmul.mubr.bf16.gmra.mrb[36].mxu1 %v4538_v9 }
  0xcb   :  { %1926 = vmatmul.mubr.bf16.gmra.mrb[36].mxu0 %v4549_v54  ;;  %1190 = vmatprep.mubr.bf16.mxu1 %v5809_v42 }
  0xcc   :  { %1935 = vmatprep.mubr.bf16.mxu0 %v5809_v42  ;;  %1363 = vmatpush1.bf16.msra.mxu1 %v3857_v48 }
  0xcd   :  { %2106 = vmatpush1.bf16.msra.mxu0 %v3860_v49  ;;  %1364 = vmatprep.subr.bf16.mxu1 %v3865_v63 }
  0xce   :  { %2107 = vmatprep.subr.bf16.mxu0 %v3868_v60 }
  0xd0   :  { %1365 = vmatpush1.bf16.msra.mxu1 %v3863_v30 }
  0xd1   :  { %2108 = vmatpush1.bf16.msra.mxu0 %v3866_v55  ;;  %1366 = vmatprep.subr.bf16.mxu1 %v3871_v59 }
  0xd2   :  { %2109 = vmatprep.subr.bf16.mxu0 %v3874_v44  ;;  %1191 = vmatmul.mubr.bf16.gmra.mrb[40].mxu1 %v4559_v52 }
  0xd3   :  { %1936 = vmatmul.mubr.bf16.gmra.mrb[40].mxu0 %v4574_v43  ;;  %1200 = vmatprep.mubr.bf16.mxu1 %v5809_v42 }
  0xd4   :  { %1945 = vmatprep.mubr.bf16.mxu0 %v5809_v42  ;;  %1367 = vmatpush1.bf16.msra.mxu1 %v3869_v56 }
  0xd5   :  { %2110 = vmatpush1.bf16.msra.mxu0 %v3872_v0  ;;  %1368 = vmatprep.subr.bf16.mxu1 %v3877_v36 }
  0xd6   :  { %2111 = vmatprep.subr.bf16.mxu0 %v3880_v7 }
  0xd8   :  { %1369 = vmatpush1.bf16.msra.mxu1 %v3875_v40 }
  0xd9   :  { %2112 = vmatpush1.bf16.msra.mxu0 %v3878_v3  ;;  %1370 = vmatprep.subr.bf16.mxu1 %v3883_v23 }
  0xda   :  { %2113 = vmatprep.subr.bf16.mxu0 %v3886_v35  ;;  %1201 = vmatmul.mubr.bf16.gmra.mrb[44].mxu1 %v4589_v2 }
  0xdb   :  { %1946 = vmatmul.mubr.bf16.gmra.mrb[44].mxu0 %v4609_v28  ;;  %1210 = vmatprep.mubr.bf16.mxu1 %v5809_v42 }
  0xdc   :  { %1955 = vmatprep.mubr.bf16.mxu0 %v5809_v42  ;;  %1371 = vmatpush1.bf16.msra.mxu1 %v3881_v8 }
  0xdd   :  { %2114 = vmatpush1.bf16.msra.mxu0 %v3884_v13  ;;  %1372 = vmatprep.subr.bf16.mxu1 %v3889_v17 }
  0xde   :  { %2115 = vmatprep.subr.bf16.mxu0 %v3892_v21 }
  0xe0   :  { %1373 = vmatpush1.bf16.msra.mxu1 %v3887_v33 }
  0xe1   :  { %2116 = vmatpush1.bf16.msra.mxu0 %v3890_v38 }
  0xe2   :  { %1211 = vmatmul.mubr.bf16.gmra.mrb[48].mxu1 %v828_v1 }
  0xe3   :  { %1956 = vmatmul.mubr.bf16.gmra.mrb[48].mxu0 %v1575_v5  ;;  %1220 = vmatprep.mubr.bf16.mxu1 %v5809_v42 }
  0xe4   :  { %1965 = vmatprep.mubr.bf16.mxu0 %v5809_v42 }
  0xea   :  { %1221 = vmatmul.mubr.bf16.gmra.mrb[52].mxu1 %v4649_v47 }
  0xeb   :  { %1966 = vmatmul.mubr.bf16.gmra.mrb[52].mxu0 %v4665_v4  ;;  %1230 = vmatprep.mubr.bf16.mxu1 %v5809_v42 }
  0xec   :  { %1975 = vmatprep.mubr.bf16.mxu0 %v5809_v42 }
  0xf2   :  { %1231 = vmatmul.mubr.bf16.gmra.mrb[56].mxu1 %v4673_v15 }
  0xf3   :  { %1976 = vmatmul.mubr.bf16.gmra.mrb[56].mxu0 %v4689_v51  ;;  %1240 = vmatprep.mubr.bf16.mxu1 %v5809_v42 }
  0xf4   :  { %1985 = vmatprep.mubr.bf16.mxu0 %v5809_v42 }
  0xf5   :  { %v222_v1 = vpop.f32.mrb[0].mxu1 }
  0xf6   :  { %v224_v37 = vpop.f32.mrb[1].mxu1 }
  0xf7   :  { %v226_v18 = vpop.f32.mrb[2].mxu1 }
  0xf8   :  { %v228_v31 = vpop.f32.mrb[3].mxu1 }
  0xfa   :  { %1241 = vmatmul.mubr.bf16.gmra.mrb[60].mxu1 %v4714_v34 }
  0xfb   :  { %1986 = vmatmul.mubr.bf16.gmra.mrb[60].mxu0 %v4718_v22  ;;  %1390 = vmatprep.mubr.bf16.mxu1 %v5809_v42 }
  0xfc   :  { %2133 = vmatprep.mubr.bf16.mxu0 %v5809_v42 }
  0xfd   :  { %v232_v29 = vpop.f32.mrb[4].mxu1 }
  0xfe   :  { %v234_v5 = vpop.f32.mrb[5].mxu1 }
  0xff   :  { %v236_v6 = vpop.f32.mrb[6].mxu1 }
 0x100   :  { %v238_v62 = vpop.f32.mrb[7].mxu1 }
 0x102   :  { %1391 = vmatmul.mubr.bf16.vlgmr.msra.gmra.mrb[32].mxu1 %v4538_v9  ;;  %v47_v9 = vunpack.c.l.bf16 %v5051_v14 }
 0x103   :  { %2134 = vmatmul.mubr.bf16.vlgmr.msra.gmra.mrb[32].mxu0 %v4549_v54  ;;  %1400 = vmatprep.mubr.bf16.mxu1 %v5809_v42 }
 0x104   :  { %2143 = vmatprep.mubr.bf16.mxu0 %v5809_v42  ;;  %v1269_v11 = vrot.slane %v47_v9, 1  ;;  %v2013_v24 = vrot.slane %v47_v9, 2 }
 0x105   :  { %v242_v19 = vpop.f32.mrb[8].mxu1 }
 0x106   :  { %v244_v39 = vpop.f32.mrb[9].mxu1 }
 0x107   :  { %v246_v50 = vpop.f32.mrb[10].mxu1 }
 0x108   :  { %v248_v25 = vpop.f32.mrb[11].mxu1 }
 0x10a   :  { %1401 = vmatmul.mubr.bf16.gmra.mrb[36].mxu1 %v4559_v52  ;;  %v1270_v52 = vsel %vm764_vm0, %v4793_v27, %v1269_v11 }
 0x10b   :  { %2144 = vmatmul.mubr.bf16.gmra.mrb[36].mxu0 %v4574_v43  ;;  %1410 = vmatprep.mubr.bf16.mxu1 %v5809_v42  ;;  %v2014_v43 = vsel %vm1520_vm1, %v4795_v32, %v2013_v24  ;;  %v1276_v48 = vpack.c.bf16 %v1270_v52, %v4820_v20 }
 0x10c   :  { %2153 = vmatprep.mubr.bf16.mxu0 %v5809_v42 }
 0x10d   :  { %v252_v54 = vpop.f32.mrb[12].mxu1 }
 0x10e   :  { %v254_v57 = vpop.f32.mrb[13].mxu1 }
 0x10f   :  { %v256_v53 = vpop.f32.mrb[14].mxu1 }
 0x110   :  { %v258_v26 = vpop.f32.mrb[15].mxu1 }
 0x112   :  { %1411 = vmatmul.mubr.bf16.gmra.mrb[40].mxu1 %v4589_v2  ;;  %v2019_v2 = vpack.c.bf16 %v2014_v43, %v4825_v61 }
 0x113   :  { %2154 = vmatmul.mubr.bf16.gmra.mrb[40].mxu0 %v4609_v28  ;;  %1420 = vmatprep.mubr.bf16.mxu1 %v5809_v42 }
 0x114   :  { %2163 = vmatprep.mubr.bf16.mxu0 %v5809_v42 }
 0x116   :  { %v627_v12 = vpop.f32.mrb[0].mxu0 }
 0x117   :  { %v5066_v45 = vadd.f32 %v627_v12, %v222_v1  ;;  %v629_v46 = vpop.f32.mrb[1].mxu0 }
 0x118   :  { %v5070_v49 = vadd.f32 %v629_v46, %v224_v37  ;;  %v631_v28 = vpop.f32.mrb[2].mxu0 }
 0x119   :  { %v5072_v63 = vadd.f32 %v631_v28, %v226_v18  ;;  %v633_v60 = vpop.f32.mrb[3].mxu0 }
 0x11a   :  { %v5074_v30 = vadd.f32 %v633_v60, %v228_v31  ;;  %1421 = vmatmul.mubr.bf16.gmra.mrb[44].mxu1 %v1276_v48 }
 0x11b   :  { %2164 = vmatmul.mubr.bf16.gmra.mrb[44].mxu0 %v2019_v2  ;;  %1430 = vmatprep.mubr.bf16.mxu1 %v5809_v42 }
 0x11c   :  { %2173 = vmatprep.mubr.bf16.mxu0 %v5809_v42 }
 0x11e   :  { %v637_v27 = vpop.f32.mrb[4].mxu0 }
 0x11f   :  { %v5078_v32 = vadd.f32 %v637_v27, %v232_v29  ;;  %v639_v20 = vpop.f32.mrb[5].mxu0 }
 0x120   :  { %v5080_v55 = vadd.f32 %v639_v20, %v234_v5  ;;  %v641_v61 = vpop.f32.mrb[6].mxu0 }
 0x121   :  { %v5082_v59 = vadd.f32 %v641_v61, %v236_v6  ;;  %v643_v44 = vpop.f32.mrb[7].mxu0 }
 0x122   :  { %v5084_v56 = vadd.f32 %v643_v44, %v238_v62  ;;  %1431 = vmatmul.mubr.bf16.gmra.mrb[48].mxu1 %v4649_v47  ;;  %v58_v47 = vunpack.c.h.bf16 %v5051_v14 }
 0x123   :  { %2174 = vmatmul.mubr.bf16.gmra.mrb[48].mxu0 %v4665_v4  ;;  %1440 = vmatprep.mubr.bf16.mxu1 %v5809_v42 }
 0x124   :  { %2183 = vmatprep.mubr.bf16.mxu0 %v5809_v42  ;;  %v1273_v38 = vrot.slane %v58_v47, 1  ;;  %v2016_v1 = vrot.slane %v58_v47, 2 }
 0x126   :  { %v647_v0 = vpop.f32.mrb[8].mxu0  ;;  %v2017_v31 = vsel %vm1520_vm1, %v4888_v16, %v2016_v1 }
 0x127   :  { %v5090_v36 = vadd.f32 %v647_v0, %v242_v19  ;;  %v649_v7 = vpop.f32.mrb[9].mxu0 }
 0x128   :  { %v5092_v40 = vadd.f32 %v649_v7, %v244_v39  ;;  %v651_v3 = vpop.f32.mrb[10].mxu0 }
 0x129   :  { %v5094_v23 = vadd.f32 %v651_v3, %v246_v50  ;;  %v653_v35 = vpop.f32.mrb[11].mxu0 }
 0x12a   :  { %v5096_v8 = vadd.f32 %v653_v35, %v248_v25  ;;  %1441 = vmatmul.mubr.bf16.gmra.mrb[52].mxu1 %v4673_v15 }
 0x12b   :  { %2184 = vmatmul.mubr.bf16.gmra.mrb[52].mxu0 %v4689_v51  ;;  %1450 = vmatprep.mubr.bf16.mxu1 %v5809_v42  ;;  %v1274_v51 = vsel %vm764_vm0, %v4886_v10, %v1273_v38 }
 0x12c   :  { %2193 = vmatprep.mubr.bf16.mxu0 %v5809_v42 }
 0x12e   :  { %v657_v4 = vpop.f32.mrb[12].mxu0 }
 0x12f   :  { %v5103_v13 = vadd.f32 %v657_v4, %v252_v54  ;;  %v659_v17 = vpop.f32.mrb[13].mxu0 }
 0x130   :  { %v5105_v21 = vadd.f32 %v659_v17, %v254_v57  ;;  %v661_v33 = vpop.f32.mrb[14].mxu0 }
 0x131   :  { %v5107_v37 = vadd.f32 %v661_v33, %v256_v53  ;;  %v663_v15 = vpop.f32.mrb[15].mxu0 }
 0x132   :  { %v5109_v18 = vadd.f32 %v663_v15, %v258_v26  ;;  %1451 = vmatmul.mubr.bf16.gmra.mrb[56].mxu1 %v4714_v34  ;;  %v1277_v34 = vpack.c.bf16 %v1274_v51, %v4901_v58 }
 0x133   :  { %2194 = vmatmul.mubr.bf16.gmra.mrb[56].mxu0 %v4718_v22  ;;  %1460 = vmatprep.mubr.bf16.mxu1 %v5809_v42  ;;  %v2020_v22 = vpack.c.bf16 %v2017_v31, %v4906_v41 }
 0x134   :  { %2203 = vmatprep.mubr.bf16.mxu0 %v5809_v42 }
 0x135   :  { %v455_v29 = vpop.f32.mrb[16].mxu1 }
 0x136   :  { %v667_v5 = vpop.f32.mrb[16].mxu0  ;;  %v457_v62 = vpop.f32.mrb[17].mxu1 }
 0x137   :  { %v5119_v6 = vadd.f32 %v667_v5, %v455_v29  ;;  %v669_v19 = vpop.f32.mrb[17].mxu0  ;;  %v459_v50 = vpop.f32.mrb[18].mxu1 }
 0x138   :  { %v5123_v39 = vadd.f32 %v669_v19, %v457_v62  ;;  %v671_v42 = vpop.f32.mrb[18].mxu0  ;;  %v461_v10 = vpop.f32.mrb[19].mxu1  ;;  %v2246_v62 = vlaneseq }
 0x139   :  { %v5125_v25 = vadd.f32 %v671_v42, %v459_v50  ;;  %v673_v14 = vpop.f32.mrb[19].mxu0 }
 0x13a   :  { %v5127_v9 = vadd.f32 %v673_v14, %v461_v10  ;;  %1461 = vmatmul.mubr.bf16.gmra.mrb[60].mxu1 %v1277_v34  ;;  %v5153_v19 = vshrl.u32 %v2246_v62, 7 }
 0x13b   :  { %2204 = vmatmul.mubr.bf16.gmra.mrb[60].mxu0 %v2020_v22 }
 0x13c   :  { %v5791_v34 = vand.u32 7, %v5153_v19  ;;  %v5157_v22 = vadd.s32 8, %v5153_v19  ;;  %v5160_v50 = vadd.s32 16, %v5153_v19  ;;  %v5163_v42 = vadd.s32 24, %v5153_v19 }
 0x13d   :  { %v465_v16 = vpop.f32.mrb[20].mxu1 }
 0x13e   :  { %v677_v54 = vpop.f32.mrb[20].mxu0  ;;  %v467_v53 = vpop.f32.mrb[21].mxu1  ;;  %vm5167_vm2 = vcmp.gt.s32.totalorder %v5791_v34, 0  ;;  %v5790_v14 = vand.u32 7, %v5157_v22  ;;  %v5807_v34 = vmov 0.0  }
 0x13f   :  { %v5129_v57 = vadd.f32 %v677_v54, %v465_v16  ;;  %v679_v58 = vpop.f32.mrb[21].mxu0  ;;  %v469_v41 = vpop.f32.mrb[22].mxu1  ;;  %v5789_v16 = vand.u32 7, %v5160_v50  ;;  %v5788_v54 = vand.u32 7, %v5163_v42 }
 0x140   :  { %v5131_v11 = vadd.f32 %v679_v58, %v467_v53  ;;  %v681_v24 = vpop.f32.mrb[22].mxu0  ;;  %v471_v52 = vpop.f32.mrb[23].mxu1  ;;  %v5175_v53 = vadd.s32 32, %v5153_v19  ;;  %v5178_v58 = vadd.s32 40, %v5153_v19  ;;  %vm5209_vm3 = vcmp.gt.s32.totalorder %v5790_v14, 0 }
 0x141   :  { %v5133_v26 = vadd.f32 %v681_v24, %v469_v41  ;;  %v683_v43 = vpop.f32.mrb[23].mxu0  ;;  %v5181_v41 = vadd.s32 48, %v5153_v19  ;;  %v5184_v24 = vadd.s32 56, %v5153_v19  ;;  %vm5215_vm4 = vcmp.gt.s32.totalorder %v5789_v16, 0 }
 0x142   :  { %v5135_v12 = vadd.f32 %v683_v43, %v471_v52  ;;  %v5187_v52 = vadd.s32 64, %v5153_v19  ;;  %v5190_v43 = vadd.s32 72, %v5153_v19  ;;  %vm5224_vm5 = vcmp.gt.s32.totalorder %v5788_v54, 0 }
 0x143   :  { %v3356_v16 = vsel %vm5224_vm5, 1.0, %v5807_v34  ;;  %v5840_v10 = vand.u32 7, %v5181_v41 }
 0x144   :  { %5826 = vst [vmem:[#allocation2_spill] sm:$0xff] %v5187_v52  ;;  %5827 = vst [vmem:[#allocation3_spill] sm:$0xff] %v5190_v43 }
 0x145   :  { %v475_v46 = vpop.f32.mrb[24].mxu1  ;;  %vm2461_vm8 = vcmp.gt.s32.totalorder %v5840_v10, 0 }
 0x146   :  { %v687_v48 = vpop.f32.mrb[24].mxu0  ;;  %v477_v28 = vpop.f32.mrb[25].mxu1 }
 0x147   :  { %v5137_v2 = vadd.f32 %v687_v48, %v475_v46  ;;  %v689_v60 = vpop.f32.mrb[25].mxu0  ;;  %v479_v20 = vpop.f32.mrb[26].mxu1  ;;  %v5193_v46 = vadd.s32 80, %v5153_v19  ;;  %v5196_v48 = vadd.s32 88, %v5153_v19 }
 0x148   :  { %v5139_v27 = vadd.f32 %v689_v60, %v477_v28  ;;  %v691_v61 = vpop.f32.mrb[26].mxu0  ;;  %v481_v0 = vpop.f32.mrb[27].mxu1  ;;  %v5199_v28 = vadd.s32 96, %v5153_v19  ;;  %v5202_v60 = vadd.s32 104, %v5153_v19 }
 0x149   :  { %v5141_v44 = vadd.f32 %v691_v61, %v479_v20  ;;  %v693_v7 = vpop.f32.mrb[27].mxu0  ;;  %5828 = vst [vmem:[#allocation4_spill] sm:$0xff] %v5193_v46  ;;  %5829 = vst [vmem:[#allocation5_spill] sm:$0xff] %v5196_v48  ;;  %v5205_v20 = vadd.s32 112, %v5153_v19  ;;  %v5841_v61 = vand.u32 7, %v5187_v52  ;;  %v5301_v52 = vmul.f32 %v5082_v59, %v3356_v16 }
 0x14a   :  { %v5143_v3 = vadd.f32 %v693_v7, %v481_v0  ;;  %5830 = vst [vmem:[#allocation6_spill] sm:$0xff] %v5199_v28  ;;  %5831 = vst [vmem:[#allocation7_spill] sm:$0xff] %v5202_v60  ;;  %v5220_v7 = vadd.s32 120, %v5153_v19  ;;  %v5794_v54 = vand.u32 7, %v5199_v28  ;;  %v5842_v0 = vand.u32 7, %v5193_v46 }
 0x14b   :  { %5832 = vst [vmem:[#allocation8_spill] sm:$0xff] %v5205_v20  ;;  %v5796_v14 = vand.u32 7, %v5205_v20  ;;  %vm2463_vm10 = vcmp.gt.s32.totalorder %v5841_v61, 0  ;;  %v5844_v10 = vand.u32 7, %v5202_v60 }
 0x14c   :  { %5837 = vst [vmem:[#allocation9_spill] sm:$0xff] %v5220_v7  ;;  %v5800_v62 = vand.u32 7, %v5220_v7  ;;  %vm2465_vm12 = vcmp.gt.s32.totalorder %v5842_v0, 0  ;;  %vm2467_vm14 = vcmp.gt.s32.totalorder %v5794_v54, 0 }
 0x14d   :  { %v485_v35 = vpop.f32.mrb[28].mxu1  ;;  %vm2468_vm15 = vcmp.gt.s32.totalorder %v5844_v10, 0  ;;  %vm2469_vm0 = vcmp.gt.s32.totalorder %v5796_v14, 0  ;;  %v3363_v10 = vsel %vm2465_vm12, 1.0, %v5807_v34  ;;  %v3365_v14 = vsel %vm2467_vm14, 1.0, %v5807_v34 }
 0x14e   :  { %v697_v47 = vpop.f32.mrb[28].mxu0  ;;  %v487_v17 = vpop.f32.mrb[29].mxu1  ;;  %vm2470_vm1 = vcmp.gt.s32.totalorder %v5800_v62, 0  ;;  %v3367_v20 = vsel %vm2469_vm0, 1.0, %v5807_v34 }
 0x14f   :  { %v5145_v4 = vadd.f32 %v697_v47, %v485_v35  ;;  %v699_v33 = vpop.f32.mrb[29].mxu0  ;;  %v489_v1 = vpop.f32.mrb[30].mxu1  ;;  %v5797_v47 = vand.u32 7, %v5175_v53  ;;  %v5843_v35 = vand.u32 7, %v5196_v48  ;;  %v3368_v28 = vsel %vm2470_vm1, 1.0, %v5807_v34 }
 0x150   :  { %v5147_v38 = vadd.f32 %v699_v33, %v487_v17  ;;  %v701_v15 = vpop.f32.mrb[30].mxu0  ;;  %v491_v31 = vpop.f32.mrb[31].mxu1  ;;  %v5795_v17 = vand.u32 7, %v5178_v58  ;;  %v3353_v33 = vsel %vm5167_vm2, 1.0, %v5807_v34 }
 0x151   :  { %v5149_v51 = vadd.f32 %v701_v15, %v489_v1  ;;  %v703_v29 = vpop.f32.mrb[31].mxu0  ;;  %v5792_v1 = vand.u32 7, %v5184_v24  ;;  %v3354_v15 = vsel %vm5209_vm3, 1.0, %v5807_v34  ;;  %vm2459_vm6 = vcmp.gt.s32.totalorder %v5797_v47, 0 }
 0x152   :  { %v5151_v5 = vadd.f32 %v703_v29, %v491_v31  ;;  %v5793_v31 = vand.u32 7, %v5190_v43  ;;  %v3355_v29 = vsel %vm5215_vm4, 1.0, %v5807_v34  ;;  %vm2460_vm7 = vcmp.gt.s32.totalorder %v5795_v17, 0 }
 0x153   :  { %vm2462_vm9 = vcmp.gt.s32.totalorder %v5792_v1, 0  ;;  %vm2466_vm13 = vcmp.gt.s32.totalorder %v5843_v35, 0  ;;  %v3357_v61 = vsel %vm2459_vm6, 1.0, %v5807_v34  ;;  %v3358_v1 = vsel %vm2460_vm7, 1.0, %v5807_v34 }
 0x154   :  { %vm2464_vm11 = vcmp.gt.s32.totalorder %v5793_v31, 0  ;;  %v3359_v31 = vsel %vm2461_vm8, 1.0, %v5807_v34  ;;  %v3360_v0 = vsel %vm2462_vm9, 1.0, %v5807_v34  ;;  %v3361_v35 = vsel %vm2463_vm10, 1.0, %v5807_v34 }
 0x155   :  { %v3362_v54 = vsel %vm2464_vm11, 1.0, %v5807_v34  ;;  %v3364_v17 = vsel %vm2466_vm13, 1.0, %v5807_v34  ;;  %v3366_v47 = vsel %vm2468_vm15, 1.0, %v5807_v34  ;;  %v2551_v60 = vmul.f32 %v5066_v45, %v3353_v33 }
 0x156   :  { %v2552_v62 = vmul.f32 %v5070_v49, %v3353_v33  ;;  %v2553_v7 = vmul.f32 %v5072_v63, %v3354_v15  ;;  %v5292_v48 = vmul.f32 %v5074_v30, %v3354_v15  ;;  %v5295_v46 = vmul.f32 %v5078_v32, %v3355_v29 }
 0x157   :  { %v5298_v43 = vmul.f32 %v5080_v55, %v3355_v29  ;;  %v5304_v45 = vmul.f32 %v5084_v56, %v3356_v16  ;;  %v5307_v49 = vmul.f32 %v5090_v36, %v3357_v61  ;;  %v5310_v63 = vmul.f32 %v5092_v40, %v3357_v61 }
 0x158   :  { %v5313_v30 = vmul.f32 %v5094_v23, %v3358_v1  ;;  %v5316_v32 = vmul.f32 %v5096_v8, %v3358_v1  ;;  %v5319_v55 = vmul.f32 %v5103_v13, %v3359_v31  ;;  %v5322_v59 = vmul.f32 %v5105_v21, %v3359_v31 }
 0x159   :  { %v5325_v56 = vmul.f32 %v5107_v37, %v3360_v0  ;;  %v5328_v36 = vmul.f32 %v5109_v18, %v3360_v0  ;;  %v5331_v40 = vmul.f32 %v5119_v6, %v3361_v35  ;;  %v5334_v23 = vmul.f32 %v5123_v39, %v3361_v35 }
 0x15a   :  { %v5337_v8 = vmul.f32 %v5125_v25, %v3362_v54  ;;  %v5845_v13 = vand.u32 7, %v5153_v19  ;;  %v5342_v21 = vmul.f32 %v5127_v9, %v3362_v54  ;;  %v5345_v37 = vmul.f32 %v5129_v57, %v3363_v10  ;;  %v2679_v9 = vld [vmem:[%s5784_s2] sm:$0x3] }
 0x15b   :  { %v5348_v18 = vmul.f32 %v5131_v11, %v3363_v10  ;;  %v2683_v6 = vsub.s32 0, %v5153_v19  ;;  %v2687_v39 = vsub.s32 1, %v5153_v19  ;;  %v5353_v16 = vmul.f32 %v5133_v26, %v3364_v17 }
 0x15c   :  { %vm2503_vm2 = vcmp.lt.s32.totalorder %v5845_v13, 7  ;;  %v5356_v25 = vmul.f32 %v5135_v12, %v3364_v17  ;;  %v5846_v57 = vand.u32 7, %v5157_v22  ;;  %v5849_v11 = vand.u32 7, %v5160_v50 }
 0x15d   :  { %v5374_v26 = vmul.f32 %v5137_v2, %v3365_v14  ;;  %v5377_v12 = vmul.f32 %v5139_v27, %v3365_v14  ;;  %v3369_v17 = vsel %vm2503_vm2, 1.0, %v5807_v34  ;;  %v5852_v22 = vand.u32 7, %v5163_v42 }
 0x15e   :  { %vm5363_vm3 = vcmp.lt.s32.totalorder %v5846_v57, 7  ;;  %vm5369_vm4 = vcmp.lt.s32.totalorder %v5849_v11, 7  ;;  %v5387_v50 = vmul.f32 %v5141_v44, %v3366_v47  ;;  %v5390_v1 = vmul.f32 %v5143_v3, %v3366_v47 }
 0x15f   :  { %vm5382_vm5 = vcmp.lt.s32.totalorder %v5852_v22, 7  ;;  %v5393_v2 = vmul.f32 %v5145_v4, %v3367_v20  ;;  %v5396_v27 = vmul.f32 %v5147_v38, %v3367_v20  ;;  %v5399_v14 = vmul.f32 %v5149_v51, %v3368_v28 }
 0x160   :  { %v5402_v42 = vmul.f32 %v5151_v5, %v3368_v28  ;;  %v5404_v29 = vrot.slane %v2679_v9, %v2683_v6  ;;  %v5406_v44 = vrot.slane %v2679_v9, %v2687_v39  ;;  %v3370_v3 = vsel %vm5363_vm3, 1.0, %v5807_v34 }
 0x161   :  { %v3371_v4 = vsel %vm5369_vm4, 1.0, %v5807_v34  ;;  %v3372_v5 = vsel %vm5382_vm5, 1.0, %v5807_v34  ;;  %v5856_v28 = vand.u32 7, %v5175_v53  ;;  %v5859_v6 = vand.u32 7, %v5178_v58 }
 0x162   :  { %5855 = vst [vmem:[#allocation10_spill] sm:$0xff] %v5402_v42  ;;  %v5861_v53 = vand.u32 7, %v5184_v24 }
 0x163   :  { %vm5419_vm6 = vcmp.lt.s32.totalorder %v5856_v28, 7  ;;  %vm2508_vm7 = vcmp.lt.s32.totalorder %v5859_v6, 7 }
 0x164   :  { %vm2510_vm9 = vcmp.lt.s32.totalorder %v5861_v53, 7  ;;  %v5433_v58 = vsel %vm5419_vm6, 1.0, %v5807_v34 }
 0x1d5   :  { %v1392_v15 = vpop.f32.mrb[32].mxu1 }
 0x1d6   :  { %v2135_v31 = vpop.f32.mrb[32].mxu0  ;;  %v2583_v38 = vadd.f32 %v2551_v60, %v1392_v15  ;;  %v1394_v20 = vpop.f32.mrb[33].mxu1  ;;  %v5860_v60 = vand.u32 7, %v5181_v41  ;;  %v5448_v15 = vsel %vm2510_vm9, 1.0, %v5807_v34 }
 0x1d7   :  { %v2615_v51 = vmul.f32 %v3369_v17, %v2135_v31  ;;  %v2137_v47 = vpop.f32.mrb[33].mxu0  ;;  %v2584_v0 = vadd.f32 %v2552_v62, %v1394_v20  ;;  %v1396_v10 = vpop.f32.mrb[34].mxu1  ;;  %v5862_v31 = vld [vmem:[#allocation2_spill] sm:$0xff] }
 0x1d8   :  { %v2616_v35 = vmul.f32 %v3369_v17, %v2137_v47  ;;  %v2139_v13 = vpop.f32.mrb[34].mxu0  ;;  %vm2509_vm8 = vcmp.lt.s32.totalorder %v5860_v60, 7  ;;  %v2585_v9 = vadd.f32 %v2553_v7, %v1396_v10  ;;  %v1398_v54 = vpop.f32.mrb[35].mxu1  ;;  %v5439_v7 = vsel %vm2508_vm7, 1.0, %v5807_v34  ;;  %v5866_v47 = vld [vmem:[#allocation3_spill] sm:$0xff] }
 0x1d9   :  { %v2647_v39 = vadd.f32 %v2615_v51, %v2583_v38  ;;  %v2617_v57 = vmul.f32 %v3370_v3, %v2139_v13  ;;  %v2141_v11 = vpop.f32.mrb[35].mxu0  ;;  %v2586_v62 = vadd.f32 %v5292_v48, %v1398_v54  ;;  %v5442_v33 = vsel %vm2509_vm8, 1.0, %v5807_v34 }
 0x1da   :  { %v2648_v19 = vadd.f32 %v2616_v35, %v2584_v0  ;;  %v2618_v17 = vmul.f32 %v3370_v3, %v2141_v11  ;;  %v5863_v3 = vand.u32 7, %v5862_v31  ;;  %v5867_v28 = vand.u32 7, %v5866_v47  ;;  %v5870_v0 = vld [vmem:[#allocation4_spill] sm:$0xff]  ;;  %v5878_v11 = vld [vmem:[#allocation6_spill] sm:$0xff] }
 0x1db   :  { %v5436_v41 = vadd.f32 %v5404_v29, %v2647_v39  ;;  %v2649_v22 = vadd.f32 %v2617_v57, %v2585_v9  ;;  %v5871_v35 = vand.u32 7, %v5870_v0  ;;  %v5874_v9 = vld [vmem:[#allocation5_spill] sm:$0xff]  ;;  %v5879_v53 = vand.u32 7, %v5878_v11 }
 0x1dc   :  { %v5445_v24 = vadd.f32 %v5406_v44, %v2648_v19  ;;  %v2650_v48 = vadd.f32 %v2618_v17, %v2586_v62  ;;  %vm5452_vm10 = vcmp.lt.s32.totalorder %v5863_v3, 7  ;;  %vm5462_vm11 = vcmp.lt.s32.totalorder %v5867_v28, 7 }
 0x1dd   :  { %v3385_v51 = vmul.f32 -1.442695, %v5436_v41  ;;  %v5458_v20 = vadd.f32 %v5404_v29, %v2649_v22  ;;  %vm5468_vm12 = vcmp.lt.s32.totalorder %v5871_v35, 7  ;;  %v1402_v60 = vpop.f32.mrb[36].mxu1  ;;  %v5875_v57 = vand.u32 7, %v5874_v9 }
 0x1de   :  { %v3386_v13 = vmul.f32 -1.442695, %v5445_v24  ;;  %v5474_v6 = vadd.f32 %v5406_v44, %v2650_v48  ;;  %v2145_v39 = vpop.f32.mrb[36].mxu0  ;;  %vm5484_vm14 = vcmp.lt.s32.totalorder %v5879_v53, 7  ;;  %v2587_v17 = vadd.f32 %v5295_v46, %v1402_v60  ;;  %v1404_v48 = vpop.f32.mrb[37].mxu1 }
 0x1df   :  { %vm5478_vm13 = vcmp.lt.s32.totalorder %v5875_v57, 7  ;;  %3893 = vpow2.f32 %v3385_v51  ;;  %v3387_v62 = vmul.f32 -1.442695, %v5458_v20  ;;  %v2619_v22 = vmul.f32 %v3371_v4, %v2145_v39  ;;  %v2147_v31 = vpop.f32.mrb[37].mxu0  ;;  %v1406_v0 = vpop.f32.mrb[38].mxu1 }
 0x1e0   :  { %3895 = vpow2.f32 %v3386_v13  ;;  %v3388_v3 = vmul.f32 -1.442695, %v5474_v6  ;;  %v2588_v47 = vadd.f32 %v5298_v43, %v1404_v48  ;;  %v2620_v28 = vmul.f32 %v3371_v4, %v2147_v31  ;;  %v2149_v35 = vpop.f32.mrb[38].mxu0  ;;  %v1408_v11 = vpop.f32.mrb[39].mxu1 }
 0x1e1   :  { %3897 = vpow2.f32 %v3387_v62  ;;  %v2651_v9 = vadd.f32 %v2619_v22, %v2587_v17  ;;  %v2589_v57 = vadd.f32 %v5301_v52, %v1406_v0  ;;  %v2621_v51 = vmul.f32 %v3372_v5, %v2149_v35  ;;  %v2151_v53 = vpop.f32.mrb[39].mxu0  ;;  %v5883_v62 = vld [vmem:[#allocation7_spill] sm:$0xff]  ;;  %v5885_v0 = vld [vmem:[#allocation8_spill] sm:$0xff] }
 0x1e2   :  { %3899 = vpow2.f32 %v3388_v3  ;;  %v2652_v46 = vadd.f32 %v2620_v28, %v2588_v47  ;;  %v2590_v60 = vadd.f32 %v5304_v45, %v1408_v11  ;;  %v2622_v39 = vmul.f32 %v3372_v5, %v2151_v53 }
 0x1e3   :  { %v5495_v13 = vadd.f32 %v5404_v29, %v2651_v9  ;;  %v2653_v34 = vadd.f32 %v2621_v51, %v2589_v57  ;;  %v5882_v43 = vmov 0.0   ;;  %v5884_v17 = vand.u32 7, %v5883_v62 }
 0x1e4   :  { %v5500_v4 = vsel %vm5452_vm10, 1.0, %v5882_v43  ;;  %v5505_v52 = vadd.f32 %v5406_v44, %v2652_v46  ;;  %v2654_v22 = vadd.f32 %v2622_v39, %v2590_v60  ;;  %v5510_v45 = vsel %vm5462_vm11, 1.0, %v5882_v43 }
 0x1e5   :  { %vm2516_vm15 = vcmp.lt.s32.totalorder %v5884_v17, 7  ;;  %v5515_v5 = vsel %vm5468_vm12, 1.0, %v5882_v43  ;;  %v3389_v38 = vmul.f32 -1.442695, %v5495_v13  ;;  %v5519_v48 = vadd.f32 %v5404_v29, %v2653_v34  ;;  %v1412_v47 = vpop.f32.mrb[40].mxu1 }
 0x1e6   :  { %v5524_v31 = vsel %vm5478_vm13, 1.0, %v5882_v43  ;;  %v5529_v61 = vsel %vm5484_vm14, 1.0, %v5882_v43  ;;  %v3390_v3 = vmul.f32 -1.442695, %v5505_v52  ;;  %v5533_v10 = vadd.f32 %v5406_v44, %v2654_v22  ;;  %v2155_v28 = vpop.f32.mrb[40].mxu0  ;;  %v1414_v51 = vpop.f32.mrb[41].mxu1 }
 0x1e7   :  { %v5536_v34 = vsel %vm2516_vm15, 1.0, %v5882_v43  ;;  %v5886_v35 = vand.u32 7, %v5885_v0  ;;  %3901 = vpow2.f32 %v3389_v38  ;;  %v3391_v19 = vmul.f32 -1.442695, %v5519_v48  ;;  %v2157_v11 = vpop.f32.mrb[41].mxu0  ;;  %v1416_v39 = vpop.f32.mrb[42].mxu1 }
 0x1e8   :  { %v2591_v9 = vadd.f32 %v5307_v49, %v1412_v47  ;;  %v2623_v57 = vmul.f32 %v5433_v58, %v2155_v28  ;;  %3903 = vpow2.f32 %v3390_v3  ;;  %v3392_v53 = vmul.f32 -1.442695, %v5533_v10  ;;  %v2159_v62 = vpop.f32.mrb[42].mxu0  ;;  %v1418_v47 = vpop.f32.mrb[43].mxu1 }
 0x1e9   :  { %vm5540_vm0 = vcmp.lt.s32.totalorder %v5886_v35, 7  ;;  %v2592_v46 = vadd.f32 %v5310_v63, %v1414_v51  ;;  %v2624_v60 = vmul.f32 %v5433_v58, %v2157_v11  ;;  %v3894_v17 = vpop.eup %3893  ;;  %3905 = vpow2.f32 %v3391_v19  ;;  %v2161_v28 = vpop.f32.mrb[43].mxu0 }
 0x1ea   :  { %v2655_v22 = vadd.f32 %v2623_v57, %v2591_v9  ;;  %v2593_v38 = vadd.f32 %v5313_v30, %v1416_v39  ;;  %v2625_v49 = vmul.f32 %v5439_v7, %v2159_v62  ;;  %v3896_v0 = vpop.eup %3895  ;;  %v2819_v35 = vadd.f32 1.0, %v3894_v17 }
 0x1eb   :  { %3907 = vpow2.f32 %v3392_v53  ;;  %v2656_v3 = vadd.f32 %v2624_v60, %v2592_v46  ;;  %v2594_v42 = vadd.f32 %v5316_v32, %v1418_v47  ;;  %v3898_v63 = vpop.eup %3897  ;;  %v2820_v51 = vadd.f32 1.0, %v3896_v0 }
 0x1ec   :  { %v5554_v58 = vadd.f32 %v5404_v29, %v2655_v22  ;;  %v2657_v11 = vadd.f32 %v2625_v49, %v2593_v38  ;;  %v2626_v19 = vmul.f32 %v5439_v7, %v2161_v28  ;;  %v3900_v9 = vpop.eup %3899  ;;  %3909 = vrcp.f32 %v2819_v35  ;;  %v5889_v22 = vld [vmem:[#allocation9_spill] sm:$0xff] }
 0x1ed   :  { %v2821_v30 = vadd.f32 1.0, %v3898_v63  ;;  %v5558_v57 = vadd.f32 %v5406_v44, %v2656_v3  ;;  %v5563_v53 = vsel %vm5540_vm0, 1.0, %v5882_v43  ;;  %3911 = vrcp.f32 %v2820_v51  ;;  %v1422_v62 = vpop.f32.mrb[44].mxu1 }
 0x1ee   :  { %v2822_v32 = vadd.f32 1.0, %v3900_v9  ;;  %v3393_v46 = vmul.f32 -1.442695, %v5554_v58  ;;  %v5567_v60 = vadd.f32 %v5404_v29, %v2657_v11  ;;  %v2658_v39 = vadd.f32 %v2626_v19, %v2594_v42  ;;  %v2165_v17 = vpop.f32.mrb[44].mxu0  ;;  %v1424_v0 = vpop.f32.mrb[45].mxu1 }
 0x1ef   :  { %3913 = vrcp.f32 %v2821_v30  ;;  %v3394_v7 = vmul.f32 -1.442695, %v5558_v57  ;;  %v5890_v38 = vand.u32 7, %v5889_v22  ;;  %v2595_v47 = vadd.f32 %v5319_v55, %v1422_v62  ;;  %v2167_v35 = vpop.f32.mrb[45].mxu0  ;;  %v1426_v51 = vpop.f32.mrb[46].mxu1 }
 0x1f0   :  { %3915 = vrcp.f32 %v2822_v32  ;;  %v3395_v54 = vmul.f32 -1.442695, %v5567_v60  ;;  %v2627_v28 = vmul.f32 %v5442_v33, %v2165_v17  ;;  %v5580_v42 = vadd.f32 %v5406_v44, %v2658_v39  ;;  %v2169_v11 = vpop.f32.mrb[46].mxu0  ;;  %v1428_v32 = vpop.f32.mrb[47].mxu1 }
 0x1f1   :  { %vm5572_vm1 = vcmp.lt.s32.totalorder %v5890_v38, 7  ;;  %3917 = vpow2.f32 %v3393_v46  ;;  %v2596_v3 = vadd.f32 %v5322_v59, %v1424_v0  ;;  %v2628_v63 = vmul.f32 %v5442_v33, %v2167_v35  ;;  %v3902_v19 = vpop.eup %3901  ;;  %v2171_v62 = vpop.f32.mrb[47].mxu0 }
 0x1f2   :  { %3919 = vpow2.f32 %v3394_v7  ;;  %v2659_v9 = vadd.f32 %v2627_v28, %v2595_v47  ;;  %v2597_v30 = vadd.f32 %v5325_v56, %v1426_v51  ;;  %v2629_v55 = vmul.f32 %v5448_v15, %v2169_v11  ;;  %v3904_v17 = vpop.eup %3903 }
 0x1f3   :  { %v2823_v46 = vadd.f32 1.0, %v3902_v19  ;;  %3921 = vpow2.f32 %v3395_v54  ;;  %v3396_v39 = vmul.f32 -1.442695, %v5580_v42  ;;  %v2660_v22 = vadd.f32 %v2628_v63, %v2596_v3  ;;  %v3906_v59 = vpop.eup %3905 }
 0x1f4   :  { %v2824_v38 = vadd.f32 1.0, %v3904_v17  ;;  %v5588_v33 = vadd.f32 %v5404_v29, %v2659_v9  ;;  %v2661_v0 = vadd.f32 %v2629_v55, %v2597_v30  ;;  %v2598_v7 = vadd.f32 %v5328_v36, %v1428_v32 }
 0x1f5   :  { %v3908_v47 = vpop.eup %3907  ;;  %3923 = vrcp.f32 %v2823_v46  ;;  %v2825_v56 = vadd.f32 1.0, %v3906_v59  ;;  %v5592_v28 = vadd.f32 %v5406_v44, %v2660_v22  ;;  %v2630_v35 = vmul.f32 %v5448_v15, %v2171_v62  ;;  %v1432_v19 = vpop.f32.mrb[48].mxu1 }
 0x1f6   :  { %3925 = vrcp.f32 %v2824_v38  ;;  %v2826_v54 = vadd.f32 1.0, %v3908_v47  ;;  %v3397_v3 = vmul.f32 -1.442695, %v5588_v33  ;;  %v5597_v63 = vadd.f32 %v5404_v29, %v2661_v0  ;;  %v3910_v51 = vpop.eup %3909  ;;  %v2175_v9 = vpop.f32.mrb[48].mxu0 }
 0x1f7   :  { %3927 = vrcp.f32 %v2825_v56  ;;  %v3398_v11 = vmul.f32 -1.442695, %v5592_v28  ;;  %v2662_v36 = vadd.f32 %v2630_v35, %v2598_v7  ;;  %v5603_v30 = vsel %vm5572_vm1, 1.0, %v5882_v43  ;;  %v3912_v15 = vpop.eup %3911  ;;  %v1434_v17 = vpop.f32.mrb[49].mxu1 }
 0x1f8   :  { %v2915_v55 = vmul.f32 %v3910_v51, %v5436_v41  ;;  %3929 = vrcp.f32 %v2826_v54  ;;  %v3399_v32 = vmul.f32 -1.442695, %v5597_v63  ;;  %v2599_v62 = vadd.f32 %v5331_v40, %v1432_v19  ;;  %v2177_v46 = vpop.f32.mrb[49].mxu0  ;;  %v1436_v49 = vpop.f32.mrb[50].mxu1 }
 0x1f9   :  { %v3914_v22 = vpop.eup %3913  ;;  %v2916_v59 = vmul.f32 %v3912_v15, %v5445_v24  ;;  %3931 = vpow2.f32 %v3396_v39  ;;  %v5610_v38 = vadd.f32 %v5406_v44, %v2662_v36  ;;  %v2631_v43 = vmul.f32 %v5500_v4, %v2175_v9  ;;  %v2179_v0 = vpop.f32.mrb[50].mxu0 }
 0x1fa   :  { %v3916_v7 = vpop.eup %3915  ;;  %v2917_v41 = vmul.f32 %v3914_v22, %v5458_v20  ;;  %3933 = vpow2.f32 %v3397_v3  ;;  %v2600_v47 = vadd.f32 %v5334_v23, %v1434_v17  ;;  %v2632_v40 = vmul.f32 %v5500_v4, %v2177_v46  ;;  %v1438_v56 = vpop.f32.mrb[51].mxu1 }
 0x1fb   :  { %v2181_v35 = vpop.f32.mrb[51].mxu0  ;;  %v3918_v54 = vpop.eup %3917  ;;  %v3433_v24 = vpack.c.bf16 %v2916_v59, %v2915_v55  ;;  %v2918_v39 = vmul.f32 %v3916_v7, %v5474_v6  ;;  %3935 = vpow2.f32 %v3398_v11  ;;  %v3400_v51 = vmul.f32 -1.442695, %v5610_v38 }
 0x1fc   :  { %v3920_v36 = vpop.eup %3919  ;;  %v2827_v19 = vadd.f32 1.0, %v3918_v54  ;;  %3937 = vpow2.f32 %v3399_v32  ;;  %v2663_v9 = vadd.f32 %v2631_v43, %v2599_v62  ;;  %v2664_v15 = vadd.f32 %v2632_v40, %v2600_v47 }
 0x1fd   :  { %v3922_v20 = vpop.eup %3921  ;;  %3043 = vst [vmem:[%s5785_s3] sm:$0xff] %v3433_v24  ;;  %v3434_v23 = vpack.c.bf16 %v2918_v39, %v2917_v41  ;;  %v2828_v4 = vadd.f32 1.0, %v3920_v36  ;;  %3939 = vpow2.f32 %v3400_v51  ;;  %v2601_v3 = vadd.f32 %v5337_v8, %v1436_v49  ;;  %v1442_v46 = vpop.f32.mrb[52].mxu1 }
 0x1fe   :  { %3941 = vrcp.f32 %v2827_v19  ;;  %v2829_v6 = vadd.f32 1.0, %v3922_v20  ;;  %v5623_v11 = vadd.f32 %v5404_v29, %v2663_v9  ;;  %v5626_v55 = vadd.f32 %v5406_v44, %v2664_v15  ;;  %v2185_v22 = vpop.f32.mrb[52].mxu0  ;;  %v1444_v41 = vpop.f32.mrb[53].mxu1 }
 0x1ff   :  { %v3924_v32 = vpop.eup %3923  ;;  %3044 = vst [vmem:[%s5785_s3 + $0x8] sm:$0xff] %v3434_v23  ;;  %3943 = vrcp.f32 %v2828_v4  ;;  %v2633_v62 = vmul.f32 %v5510_v45, %v2179_v0  ;;  %v2602_v17 = vadd.f32 %v5342_v21, %v1438_v56  ;;  %v2634_v8 = vmul.f32 %v5510_v45, %v2181_v35  ;;  %v2187_v47 = vpop.f32.mrb[53].mxu0 }
 0x200   :  { %v3926_v59 = vpop.eup %3925  ;;  %v2919_v43 = vmul.f32 %v3924_v32, %v5495_v13  ;;  %3945 = vrcp.f32 %v2829_v6  ;;  %v3401_v49 = vmul.f32 -1.442695, %v5623_v11  ;;  %v3402_v7 = vmul.f32 -1.442695, %v5626_v55  ;;  %v1446_v45 = vpop.f32.mrb[54].mxu1 }
 0x201   :  { %v3928_v40 = vpop.eup %3927  ;;  %v2920_v54 = vmul.f32 %v3926_v59, %v5505_v52  ;;  %v2665_v0 = vadd.f32 %v2633_v62, %v2601_v3  ;;  %v2666_v24 = vadd.f32 %v2634_v8, %v2602_v17  ;;  %v2603_v21 = vadd.f32 %v5345_v37, %v1442_v46  ;;  %v2189_v56 = vpop.f32.mrb[54].mxu0 }
 0x202   :  { %v3930_v35 = vpop.eup %3929  ;;  %v2921_v39 = vmul.f32 %v3928_v40, %v5519_v48  ;;  %3947 = vpow2.f32 %v3401_v49  ;;  %v2635_v13 = vmul.f32 %v5515_v5, %v2185_v22  ;;  %v2604_v51 = vadd.f32 %v5348_v18, %v1444_v41  ;;  %v1448_v36 = vpop.f32.mrb[55].mxu1 }
 0x203   :  { %v2191_v19 = vpop.f32.mrb[55].mxu0  ;;  %v3932_v9 = vpop.eup %3931  ;;  %v3435_v15 = vpack.c.bf16 %v2920_v54, %v2919_v43  ;;  %v2922_v52 = vmul.f32 %v3930_v35, %v5533_v10  ;;  %3949 = vpow2.f32 %v3402_v7  ;;  %v5644_v20 = vadd.f32 %v5404_v29, %v2665_v0 }
 0x204   :  { %v3934_v37 = vpop.eup %3933  ;;  %v2830_v23 = vadd.f32 1.0, %v3932_v9  ;;  %v5647_v4 = vadd.f32 %v5406_v44, %v2666_v24  ;;  %v2667_v48 = vadd.f32 %v2635_v13, %v2603_v21  ;;  %v2636_v3 = vmul.f32 %v5515_v5, %v2187_v47 }
 0x205   :  { %v3936_v6 = vpop.eup %3935  ;;  %3045 = vst [vmem:[%s5785_s3 + $0x10] sm:$0xff] %v3435_v15  ;;  %v3436_v18 = vpack.c.bf16 %v2922_v52, %v2921_v39  ;;  %v2831_v32 = vadd.f32 1.0, %v3934_v37  ;;  %v3403_v10 = vmul.f32 -1.442695, %v5644_v20  ;;  %v2605_v62 = vadd.f32 %v5353_v16, %v1446_v45  ;;  %v1452_v7 = vpop.f32.mrb[56].mxu1 }
 0x206   :  { %v3938_v17 = vpop.eup %3937  ;;  %3951 = vrcp.f32 %v2830_v23  ;;  %v2832_v8 = vadd.f32 1.0, %v3936_v6  ;;  %v3404_v46 = vmul.f32 -1.442695, %v5647_v4  ;;  %v5657_v22 = vadd.f32 %v5404_v29, %v2667_v48  ;;  %v2195_v16 = vpop.f32.mrb[56].mxu0 }
 0x207   :  { %v3940_v5 = vpop.eup %3939  ;;  %3046 = vst [vmem:[%s5785_s3 + $0x18] sm:$0xff] %v3436_v18  ;;  %3953 = vrcp.f32 %v2831_v32  ;;  %v2833_v59 = vadd.f32 1.0, %v3938_v17  ;;  %v2668_v43 = vadd.f32 %v2636_v3, %v2604_v51  ;;  %v2637_v49 = vmul.f32 %v5524_v31, %v2189_v56  ;;  %v1454_v0 = vpop.f32.mrb[57].mxu1 }
 0x208   :  { %v3942_v41 = vpop.eup %3941  ;;  %3955 = vrcp.f32 %v2832_v8  ;;  %v2834_v47 = vadd.f32 1.0, %v3940_v5  ;;  %v3405_v40 = vmul.f32 -1.442695, %v5657_v22  ;;  %v2606_v54 = vadd.f32 %v5356_v25, %v1448_v36  ;;  %v2197_v24 = vpop.f32.mrb[57].mxu0 }
 0x209   :  { %v3944_v21 = vpop.eup %3943  ;;  %v2923_v45 = vmul.f32 %v3942_v41, %v5554_v58  ;;  %3957 = vrcp.f32 %v2833_v59  ;;  %v5667_v35 = vadd.f32 %v5406_v44, %v2668_v43  ;;  %v2669_v39 = vadd.f32 %v2637_v49, %v2605_v62  ;;  %v1456_v56 = vpop.f32.mrb[58].mxu1 }
 0x20a   :  { %v2199_v13 = vpop.f32.mrb[58].mxu0  ;;  %v3946_v51 = vpop.eup %3945  ;;  %v2924_v9 = vmul.f32 %v3944_v21, %v5558_v57  ;;  %3959 = vrcp.f32 %v2834_v47  ;;  %v2638_v15 = vmul.f32 %v5524_v31, %v2191_v19  ;;  %v2607_v25 = vadd.f32 %v5374_v26, %v1452_v7 }
 0x20b   :  { %v1458_v36 = vpop.f32.mrb[59].mxu1  ;;  %v2201_v52 = vpop.f32.mrb[59].mxu0  ;;  %v2925_v37 = vmul.f32 %v3946_v51, %v5567_v60  ;;  %3961 = vpow2.f32 %v3403_v10  ;;  %v3406_v58 = vmul.f32 -1.442695, %v5667_v35  ;;  %v5675_v23 = vadd.f32 %v5404_v29, %v2669_v39 }
 0x20c   :  { %v3948_v48 = vpop.eup %3947  ;;  %v3437_v3 = vpack.c.bf16 %v2924_v9, %v2923_v45  ;;  %3963 = vpow2.f32 %v3404_v46  ;;  %v2670_v6 = vadd.f32 %v2638_v15, %v2606_v54  ;;  %v2639_v57 = vmul.f32 %v5529_v61, %v2195_v16 }
 0x20d   :  { %v3950_v18 = vpop.eup %3949  ;;  %v2835_v31 = vadd.f32 1.0, %v3948_v48  ;;  %3965 = vpow2.f32 %v3405_v40  ;;  %v3407_v26 = vmul.f32 -1.442695, %v5675_v23  ;;  %v2608_v19 = vadd.f32 %v5377_v12, %v1454_v0  ;;  %v1462_v46 = vpop.f32.mrb[60].mxu1 }
 0x20e   :  { %3047 = vst [vmem:[%s5785_s3 + $0x20] sm:$0xff] %v3437_v3  ;;  %v2836_v60 = vadd.f32 1.0, %v3950_v18  ;;  %3967 = vpow2.f32 %v3406_v58  ;;  %v5684_v32 = vadd.f32 %v5406_v44, %v2670_v6  ;;  %v2671_v10 = vadd.f32 %v2639_v57, %v2607_v25  ;;  %v2205_v5 = vpop.f32.mrb[60].mxu0  ;;  %v1464_v7 = vpop.f32.mrb[61].mxu1 }
 0x20f   :  { %3969 = vrcp.f32 %v2835_v31  ;;  %v2640_v62 = vmul.f32 %v5529_v61, %v2197_v24  ;;  %v2609_v17 = vadd.f32 %v5387_v50, %v1456_v56  ;;  %v2641_v8 = vmul.f32 %v5536_v34, %v2199_v13  ;;  %v2207_v16 = vpop.f32.mrb[61].mxu0  ;;  %v1466_v40 = vpop.f32.mrb[62].mxu1 }
 0x210   :  { %v3952_v12 = vpop.eup %3951  ;;  %3971 = vrcp.f32 %v2836_v60  ;;  %v3408_v59 = vmul.f32 -1.442695, %v5684_v32  ;;  %v5691_v43 = vadd.f32 %v5404_v29, %v2671_v10  ;;  %v2610_v49 = vadd.f32 %v5390_v1, %v1458_v36  ;;  %v2209_v54 = vpop.f32.mrb[62].mxu0 }
 0x211   :  { %v3954_v41 = vpop.eup %3953  ;;  %v2926_v61 = vmul.f32 %v3952_v12, %v5580_v42  ;;  %3973 = vpow2.f32 %v3407_v26  ;;  %v2672_v50 = vadd.f32 %v2640_v62, %v2608_v19  ;;  %v2673_v47 = vadd.f32 %v2641_v8, %v2609_v17  ;;  %v1468_v39 = vpop.f32.mrb[63].mxu1 }
 0x212   :  { %v3956_v0 = vpop.eup %3955  ;;  %v2927_v24 = vmul.f32 %v3954_v41, %v5588_v33  ;;  %3975 = vpow2.f32 %v3408_v59  ;;  %v3409_v21 = vmul.f32 -1.442695, %v5691_v43  ;;  %v2642_v45 = vmul.f32 %v5536_v34, %v2201_v52  ;;  %v2211_v1 = vpop.f32.mrb[63].mxu0 }
 0x213   :  { %v3958_v56 = vpop.eup %3957  ;;  %v3438_v13 = vpack.c.bf16 %v2926_v61, %v2925_v37  ;;  %v2928_v51 = vmul.f32 %v3956_v0, %v5592_v28  ;;  %v5700_v42 = vadd.f32 %v5406_v44, %v2672_v50  ;;  %v5703_v9 = vadd.f32 %v5404_v29, %v2673_v47 }
 0x214   :  { %v3960_v15 = vpop.eup %3959  ;;  %v2929_v33 = vmul.f32 %v3958_v56, %v5597_v63  ;;  %3977 = vpow2.f32 %v3409_v21  ;;  %v2674_v25 = vadd.f32 %v2642_v45, %v2610_v49  ;;  %v2611_v36 = vadd.f32 %v5393_v2, %v1462_v46 }
 0x215   :  { %v3962_v34 = vpop.eup %3961  ;;  %3048 = vst [vmem:[%s5785_s3 + $0x28] sm:$0xff] %v3438_v13  ;;  %v3439_v52 = vpack.c.bf16 %v2928_v51, %v2927_v24  ;;  %v2930_v28 = vmul.f32 %v3960_v15, %v5610_v38  ;;  %v3410_v37 = vmul.f32 -1.442695, %v5700_v42  ;;  %v3411_v58 = vmul.f32 -1.442695, %v5703_v9 }
 0x216   :  { %v3964_v48 = vpop.eup %3963  ;;  %v2837_v3 = vadd.f32 1.0, %v3962_v34  ;;  %v5714_v63 = vadd.f32 %v5406_v44, %v2674_v25  ;;  %v2643_v6 = vmul.f32 %v5563_v53, %v2205_v5  ;;  %v2612_v2 = vadd.f32 %v5396_v27, %v1464_v7 }
 0x217   :  { %v3966_v57 = vpop.eup %3965  ;;  %3049 = vst [vmem:[%s5785_s3 + $0x30] sm:$0xff] %v3439_v52  ;;  %v3440_v18 = vpack.c.bf16 %v2930_v28, %v2929_v33  ;;  %v2838_v38 = vadd.f32 1.0, %v3964_v48  ;;  %3979 = vpow2.f32 %v3410_v37  ;;  %v2644_v31 = vmul.f32 %v5563_v53, %v2207_v16  ;;  %v5893_v16 = vld [vmem:[#allocation10_spill] sm:$0xff] }
 0x218   :  { %v3968_v26 = vpop.eup %3967  ;;  %3981 = vrcp.f32 %v2837_v3  ;;  %v2839_v19 = vadd.f32 1.0, %v3966_v57  ;;  %v3412_v60 = vmul.f32 -1.442695, %v5714_v63  ;;  %v2675_v10 = vadd.f32 %v2643_v6, %v2611_v36 }
 0x219   :  { %v3970_v62 = vpop.eup %3969  ;;  %3050 = vst [vmem:[%s5785_s3 + $0x38] sm:$0xff] %v3440_v18  ;;  %3983 = vrcp.f32 %v2838_v38  ;;  %v2840_v27 = vadd.f32 1.0, %v3968_v26  ;;  %v2676_v17 = vadd.f32 %v2644_v31, %v2612_v2  ;;  %v2613_v8 = vadd.f32 %v5399_v14, %v1466_v40 }
 0x21a   :  { %v3972_v46 = vpop.eup %3971  ;;  %v2931_v5 = vmul.f32 %v3970_v62, %v5623_v11  ;;  %3985 = vrcp.f32 %v2839_v19  ;;  %v5729_v53 = vadd.f32 %v5404_v29, %v2675_v10  ;;  %v2645_v12 = vmul.f32 %v5603_v30, %v2209_v54 }
 0x21b   :  { %v3974_v59 = vpop.eup %3973  ;;  %v2932_v49 = vmul.f32 %v3972_v46, %v5626_v55  ;;  %3987 = vrcp.f32 %v2840_v27  ;;  %v5734_v7 = vadd.f32 %v5406_v44, %v2676_v17  ;;  %v2614_v41 = vadd.f32 %v5893_v16, %v1468_v39 }
 0x21c   :  { %v3976_v61 = vpop.eup %3975  ;;  %v2841_v14 = vadd.f32 1.0, %v3974_v59  ;;  %3989 = vpow2.f32 %v3411_v58  ;;  %v3413_v11 = vmul.f32 -1.442695, %v5729_v53  ;;  %v2677_v50 = vadd.f32 %v2645_v12, %v2613_v8 }
 0x21d   :  { %v3441_v47 = vpack.c.bf16 %v2932_v49, %v2931_v5  ;;  %v2842_v40 = vadd.f32 1.0, %v3976_v61  ;;  %3991 = vpow2.f32 %v3412_v60  ;;  %v3414_v54 = vmul.f32 -1.442695, %v5734_v7 }
 0x21e   :  { %v3978_v0 = vpop.eup %3977  ;;  %3993 = vrcp.f32 %v2841_v14  ;;  %v5740_v55 = vadd.f32 %v5404_v29, %v2677_v50  ;;  %v2646_v24 = vmul.f32 %v5603_v30, %v2211_v1 }
 0x21f   :  { %3051 = vst [vmem:[%s5785_s3 + $0x40] sm:$0xff] %v3441_v47  ;;  %3995 = vrcp.f32 %v2842_v40  ;;  %v2843_v21 = vadd.f32 1.0, %v3978_v0 }
 0x220   :  { %3997 = vpow2.f32 %v3413_v11  ;;  %v3415_v45 = vmul.f32 -1.442695, %v5740_v55  ;;  %v2678_v39 = vadd.f32 %v2646_v24, %v2614_v41 }
 0x221   :  { %v3980_v56 = vpop.eup %3979  ;;  %3999 = vrcp.f32 %v2843_v21 }
 0x222   :  { %v3982_v13 = vpop.eup %3981  ;;  %v2844_v51 = vadd.f32 1.0, %v3980_v56  ;;  %4001 = vpow2.f32 %v3414_v54  ;;  %v2722_v29 = vadd.f32 %v5406_v44, %v2678_v39 }
 0x223   :  { %v3984_v15 = vpop.eup %3983  ;;  %v2933_v30 = vmul.f32 %v3982_v13, %v5644_v20  ;;  %4003 = vpow2.f32 %v3415_v45 }
 0x224   :  { %v3986_v1 = vpop.eup %3985  ;;  %v2934_v33 = vmul.f32 %v3984_v15, %v5647_v4  ;;  %4005 = vrcp.f32 %v2844_v51  ;;  %v3416_v25 = vmul.f32 -1.442695, %v2722_v29 }
 0x225   :  { %v3988_v36 = vpop.eup %3987  ;;  %v2935_v34 = vmul.f32 %v3986_v1, %v5657_v22 }
 0x226   :  { %v3990_v52 = vpop.eup %3989  ;;  %v3442_v28 = vpack.c.bf16 %v2934_v33, %v2933_v30  ;;  %v2936_v37 = vmul.f32 %v3988_v36, %v5667_v35  ;;  %4007 = vpow2.f32 %v3416_v25 }
 0x227   :  { %v3992_v58 = vpop.eup %3991  ;;  %v2845_v48 = vadd.f32 1.0, %v3990_v52 }
 0x228   :  { %v3994_v44 = vpop.eup %3993  ;;  %3052 = vst [vmem:[%s5785_s3 + $0x48] sm:$0xff] %v3442_v28  ;;  %v3443_v20 = vpack.c.bf16 %v2936_v37, %v2935_v34  ;;  %v2846_v3 = vadd.f32 1.0, %v3992_v58 }
 0x229   :  { %v3996_v4 = vpop.eup %3995  ;;  %v2937_v6 = vmul.f32 %v3994_v44, %v5675_v23  ;;  %4009 = vrcp.f32 %v2845_v48 }
 0x22a   :  { %v3998_v2 = vpop.eup %3997  ;;  %3053 = vst [vmem:[%s5785_s3 + $0x50] sm:$0xff] %v3443_v20  ;;  %v2938_v22 = vmul.f32 %v3996_v4, %v5684_v32  ;;  %4011 = vrcp.f32 %v2846_v3 }
 0x22b   :  { %v4000_v35 = vpop.eup %3999  ;;  %v2847_v57 = vadd.f32 1.0, %v3998_v2 }
 0x22c   :  { %v4002_v18 = vpop.eup %4001  ;;  %v3444_v38 = vpack.c.bf16 %v2938_v22, %v2937_v6  ;;  %v2939_v26 = vmul.f32 %v4000_v35, %v5691_v43 }
 0x22d   :  { %v4004_v31 = vpop.eup %4003  ;;  %4013 = vrcp.f32 %v2847_v57  ;;  %v2848_v19 = vadd.f32 1.0, %v4002_v18 }
 0x22e   :  { %v4006_v60 = vpop.eup %4005  ;;  %3054 = vst [vmem:[%s5785_s3 + $0x58] sm:$0xff] %v3444_v38  ;;  %v2849_v23 = vadd.f32 1.0, %v4004_v31 }
 0x22f   :  { %v2940_v10 = vmul.f32 %v4006_v60, %v5700_v42  ;;  %4015 = vrcp.f32 %v2848_v19 }
 0x230   :  { %v4008_v32 = vpop.eup %4007  ;;  %4017 = vrcp.f32 %v2849_v23 }
 0x231   :  { %v3445_v62 = vpack.c.bf16 %v2940_v10, %v2939_v26  ;;  %v2850_v27 = vadd.f32 1.0, %v4008_v32 }
 0x233   :  { %v4010_v17 = vpop.eup %4009  ;;  %3055 = vst [vmem:[%s5785_s3 + $0x60] sm:$0xff] %v3445_v62  ;;  %4019 = vrcp.f32 %v2850_v27 }
 0x234   :  { %v4012_v43 = vpop.eup %4011  ;;  %v2941_v8 = vmul.f32 %v4010_v17, %v5703_v9 }
 0x235   :  { %v2942_v46 = vmul.f32 %v4012_v43, %v5714_v63 }
 0x237   :  { %v4014_v5 = vpop.eup %4013  ;;  %v3446_v12 = vpack.c.bf16 %v2942_v46, %v2941_v8 }
 0x238   :  { %v2943_v42 = vmul.f32 %v4014_v5, %v5729_v53 }
 0x239   :  { %v4016_v59 = vpop.eup %4015  ;;  %3056 = vst [vmem:[%s5785_s3 + $0x68] sm:$0xff] %v3446_v12 }
 0x23a   :  { %v4018_v49 = vpop.eup %4017  ;;  %v2944_v16 = vmul.f32 %v4016_v59, %v5734_v7 }
 0x23b   :  { %v2945_v61 = vmul.f32 %v4018_v49, %v5740_v55 }
 0x23c   :  { %v3447_v41 = vpack.c.bf16 %v2944_v16, %v2943_v42 }
 0x23d   :  { %v4020_v14 = vpop.eup %4019 }
 0x23e   :  { %3057 = vst [vmem:[%s5785_s3 + $0x70] sm:$0xff] %v3447_v41  ;;  %v2946_v9 = vmul.f32 %v4020_v14, %v2722_v29 }
 0x240   :  { %v3448_v63 = vpack.c.bf16 %v2946_v9, %v2945_v61 }
 0x242   :  { %3058 = vst [vmem:[%s5785_s3 + $0x78] sm:$0xff] %v3448_v63 }

</bundles_post_ra>
